<compile_context>
chip_gen: v7x
topology: tpu7x:2x2x1
jax: 0.10.0
libtpu: 0.0.40
codegen_flags: <defaults>
</compile_context>

<pallas_src>
import math

import jax
import jax.numpy as jnp
from jax.experimental import pallas as pl
from jax.experimental.pallas import tpu as pltpu


# ----------------------------- config (small) -----------------------------
BATCH = 2
SEQ = 8
HIDDEN = 32            # real hidden size
NUM_HEADS = 4
HEAD_DIM = HIDDEN // NUM_HEADS      # 8 (real)
INTERMEDIATE = 64      # real FFN size
NUM_LAYERS = 2
VOCAB = 100
MAX_POS = 16
TYPE_VOCAB = 2
LN_EPS = 1e-12

# padded (lane-dense) sizes
HP = 128                       # padded hidden
DHP = HP // NUM_HEADS          # 32 = padded head dim (real 8 + 24 zeros)
IP = 128                       # padded intermediate
VOCABP = 128                   # padded vocab (one-hot gather over 128 lanes)
BS = BATCH * SEQ

assert VOCAB <= VOCABP, "one-hot MXU gather requires VOCAB <= 128"


# ----------------------------- fused encoder kernel -----------------------------
def encoder_kernel(ids_ref, word_ref, const_ref, wslab_ref, w2_ref, vslab_ref,
                   out_ref):
    """Whole forward pass: embeddings -> NUM_LAYERS encoder layers -> CLS rows."""
    lane_mask = (jax.lax.broadcasted_iota(jnp.int32, (1, HP), 1) < HIDDEN
                 ).astype(jnp.float32)
    inv_h = 1.0 / HIDDEN

    def layernorm(x, gamma, beta):
        # Padded lanes of x are provably zero at every call site (inputs,
        # biases, gamma/beta and the Wo/W2 output columns are zero-padded),
        # so the 128-lane sum already equals the 32-lane sum: no mask needed
        # on the mean, only on the centered value for the variance.
        mu = jnp.sum(x, axis=-1, keepdims=True) * inv_h
        d = (x - mu) * lane_mask
        var = jnp.sum(d * d, axis=-1, keepdims=True) * inv_h
        return d * jax.lax.rsqrt(var + LN_EPS) * gamma + beta

    # ---- embeddings: one-hot MXU gather + pos/type add + embedding LN ----
    ids = ids_ref[...]                                               # (BS, 1) i32
    onehot = (ids == jax.lax.broadcasted_iota(jnp.int32, (BS, VOCABP), 1)
              ).astype(jnp.bfloat16)                                 # (BS, 128)
    word = jnp.dot(onehot, word_ref[...],
                   preferred_element_type=jnp.float32)               # (BS, HP)

    pos = jnp.tile(const_ref[0:SEQ, :], (BATCH, 1))                  # (BS, HP)
    typ = const_ref[SEQ:SEQ + 1, :]                                  # (1, HP) type 0
    emb_g = const_ref[SEQ + 1:SEQ + 2, :]
    emb_b = const_ref[SEQ + 2:SEQ + 3, :]
    x = layernorm(word + pos + typ, emb_g, emb_b)                    # (BS, HP) f32

    # ---- statically unrolled encoder layers (all weights resident in VMEM) ----
    for li in range(NUM_LAYERS):
        vec = vslab_ref[li]                                          # (10, HP) f32
        xb = x.astype(jnp.bfloat16)                                  # single bf16 copy

        # fused QKV projection (1/sqrt(head_dim) folded into Wq / bq)
        qkv = jnp.dot(xb, wslab_ref[li, :, 0:3 * HP],
                      preferred_element_type=jnp.float32)            # (BS, 3*HP)
        q = (qkv[:, 0 * HP:1 * HP] + vec[0:1]).reshape(BATCH, SEQ, HP)
        k = (qkv[:, 1 * HP:2 * HP] + vec[1:2]).reshape(BATCH, SEQ, HP)
        v = (qkv[:, 2 * HP:3 * HP] + vec[2:3]).reshape(BATCH, SEQ, HP)

        # per-head attention; head contexts are lane-packed, then ONE Wo matmul
        ctx_heads = []
        for h in range(NUM_HEADS):                    # static unroll (4 heads)
            sl = slice(h * DHP, (h + 1) * DHP)
            qh = q[..., sl].astype(jnp.bfloat16)                     # (B, S, DHP)
            kh = k[..., sl].astype(jnp.bfloat16)
            vh = v[..., sl].astype(jnp.bfloat16)
            s = jnp.einsum("bqd,bkd->bqk", qh, kh,
                           preferred_element_type=jnp.float32)       # (B, S, S)
            # TODO(synk): real padded batches need an additive attention mask;
            #             the synthetic input is fixed-length so none is applied.
            s = s - jnp.max(s, axis=-1, keepdims=True)
            p = jnp.exp(s)
            p = p * pl.reciprocal(jnp.sum(p, axis=-1, keepdims=True), approx=True)
            ctx_heads.append(
                jnp.einsum("bqk,bkd->bqd", p.astype(jnp.bfloat16), vh,
                           preferred_element_type=jnp.float32))      # (B, S, DHP)
        ctx = jnp.concatenate(ctx_heads, axis=-1).reshape(BS, HP)    # (BS, HP)
        attn = jnp.dot(ctx.astype(jnp.bfloat16), wslab_ref[li, :, 3 * HP:4 * HP],
                       preferred_element_type=jnp.float32) + vec[3:4]
        x = layernorm(x + attn, vec[4:5], vec[5:6])

        # feed-forward
        hmid = jnp.dot(x.astype(jnp.bfloat16), wslab_ref[li, :, 4 * HP:4 * HP + IP],
                       preferred_element_type=jnp.float32) + vec[6:7]
        # TODO(synk): HF BERT/MiniLM use exact erf-GELU; tanh approximation here.
        hmid = jax.nn.gelu(hmid, approximate=True)
        y = jnp.dot(hmid.astype(jnp.bfloat16), w2_ref[li],
                    preferred_element_type=jnp.float32) + vec[7:8]
        x = layernorm(x + y, vec[8:9], vec[9:10])

    # ---- emit only the CLS rows: last_hidden_state[:, 0, :] (lane-dense) ----
    for b in range(BATCH):
        out_ref[b:b + 1, :] = x[b * SEQ:b * SEQ + 1, :]


# ----------------------------- parameter init (real shapes) -----------------------------
def init_params(key):
    def nrm(k, shape, scale=0.02):
        return (scale * jax.random.normal(k, shape)).astype(jnp.float32)

    keys = jax.random.split(key, 3 + NUM_LAYERS)
    params = {
        "word_emb": nrm(keys[0], (VOCAB, HIDDEN)),
        "pos_emb": nrm(keys[1], (MAX_POS, HIDDEN)),
        "type_emb": nrm(keys[2], (TYPE_VOCAB, HIDDEN)),
        "emb_ln_g": jnp.ones((HIDDEN,), jnp.float32),
        "emb_ln_b": jnp.zeros((HIDDEN,), jnp.float32),
        "layers": [],
    }
    for li in range(NUM_LAYERS):
        ks = jax.random.split(keys[3 + li], 6)
        params["layers"].append({
            "wq": nrm(ks[0], (HIDDEN, HIDDEN)), "bq": jnp.zeros((HIDDEN,), jnp.float32),
            "wk": nrm(ks[1], (HIDDEN, HIDDEN)), "bk": jnp.zeros((HIDDEN,), jnp.float32),
            "wv": nrm(ks[2], (HIDDEN, HIDDEN)), "bv": jnp.zeros((HIDDEN,), jnp.float32),
            "wo": nrm(ks[3], (HIDDEN, HIDDEN)), "bo": jnp.zeros((HIDDEN,), jnp.float32),
            "attn_ln_g": jnp.ones((HIDDEN,), jnp.float32),
            "attn_ln_b": jnp.zeros((HIDDEN,), jnp.float32),
            "w1": nrm(ks[4], (HIDDEN, INTERMEDIATE)),
            "b1": jnp.zeros((INTERMEDIATE,), jnp.float32),
            "w2": nrm(ks[5], (INTERMEDIATE, HIDDEN)),
            "b2": jnp.zeros((HIDDEN,), jnp.float32),
            "ffn_ln_g": jnp.ones((HIDDEN,), jnp.float32),
            "ffn_ln_b": jnp.zeros((HIDDEN,), jnp.float32),
        })
    return params


# ----------------------------- layout / packing (pure plumbing) -----------------------------
def _pad2(w, rows, cols):
    return jnp.zeros((rows, cols), w.dtype).at[: w.shape[0], : w.shape[1]].set(w)


def _pad1(v, n):
    return jnp.zeros((n,), v.dtype).at[: v.shape[0]].set(v)


def _head_cols(w):
    """(H, H) -> (HP, HP): output cols so head h occupies lanes [h*DHP, h*DHP+HEAD_DIM)."""
    w3 = w.reshape(HIDDEN, NUM_HEADS, HEAD_DIM)
    out = jnp.zeros((HP, NUM_HEADS, DHP), w.dtype)
    out = out.at[:HIDDEN, :, :HEAD_DIM].set(w3)
    return out.reshape(HP, HP)


def _head_vec(b):
    b2 = b.reshape(NUM_HEADS, HEAD_DIM)
    out = jnp.zeros((NUM_HEADS, DHP), b.dtype)
    return out.at[:, :HEAD_DIM].set(b2).reshape(HP)


def _head_rows(w):
    """(H, H) -> (HP, HP): input rows per-head-padded, output cols std-padded (zero)."""
    w3 = w.reshape(NUM_HEADS, HEAD_DIM, HIDDEN)
    out = jnp.zeros((NUM_HEADS, DHP, HP), w.dtype)
    out = out.at[:, :HEAD_DIM, :HIDDEN].set(w3)
    return out.reshape(HP, HP)


def prepare_kernel_params(p):
    """Pad to lane-dense layouts, fuse QKV, fold the attention scale, pack slabs."""
    scale = 1.0 / math.sqrt(HEAD_DIM)          # folded into Wq / bq
    wslab, w2s, vslab = [], [], []
    for l in p["layers"]:
        wqkv = jnp.concatenate(
            [_head_cols(l["wq"] * scale), _head_cols(l["wk"]), _head_cols(l["wv"])],
            axis=1)                                                    # (HP, 3*HP)
        wo = _head_rows(l["wo"])                                       # (HP, HP)
        w1 = _pad2(l["w1"], HP, IP)                                    # (HP, IP)
        wslab.append(jnp.concatenate([wqkv, wo, w1], axis=1))          # (HP, 5*HP)
        w2s.append(_pad2(l["w2"], IP, HP))                             # (IP, HP)
        vslab.append(jnp.stack([                                       # (10, HP)
            _head_vec(l["bq"] * scale), _head_vec(l["bk"]), _head_vec(l["bv"]),
            _pad1(l["bo"], HP),
            _pad1(l["attn_ln_g"], HP), _pad1(l["attn_ln_b"], HP),
            _pad1(l["b1"], IP),
            _pad1(l["b2"], HP),
            _pad1(l["ffn_ln_g"], HP), _pad1(l["ffn_ln_b"], HP)], axis=0))

    const_slab = jnp.concatenate([                                     # (SEQ+3, HP)
        _pad2(p["pos_emb"][:SEQ], SEQ, HP),
        _pad2(p["type_emb"][0:1], 1, HP),
        _pad1(p["emb_ln_g"], HP)[None, :],
        _pad1(p["emb_ln_b"], HP)[None, :]], axis=0)

    return {
        "word_tab": _pad2(p["word_emb"], VOCABP, HP).astype(jnp.bfloat16),  # (128, HP)
        "const": const_slab,                                                # f32
        "wslab": jnp.stack(wslab).astype(jnp.bfloat16),                     # (L, HP, 5*HP)
        "w2": jnp.stack(w2s).astype(jnp.bfloat16),                          # (L, IP, HP)
        "vslab": jnp.stack(vslab),                                          # (L, 10, HP) f32
    }


# ----------------------------- forward (single grid-less pallas_call) -----------------------------
def embedder_forward(kp, input_ids):
    """input_ids: (B, S) int32 -> CLS embedding (B, HIDDEN)."""
    B, S = input_ids.shape
    assert (B, S) == (BATCH, SEQ)
    ids = input_ids.reshape(BS, 1).astype(jnp.int32)

    cls = pl.pallas_call(
        encoder_kernel,
        out_shape=jax.ShapeDtypeStruct((BATCH, HP), jnp.float32),
    )(ids, kp["word_tab"], kp["const"], kp["wslab"], kp["w2"], kp["vslab"])

    return cls[:, :HIDDEN]                      # drop padded lanes -> (B, HIDDEN)


# ----------------------------- main -----------------------------
if __name__ == "__main__":
    key = jax.random.PRNGKey(0)
    pkey, ikey = jax.random.split(key)
    params = init_params(pkey)
    kparams = prepare_kernel_params(params)

    # Deterministic synthetic "tokenized" input; column 0 = CLS token id (1).
    input_ids = jax.random.randint(ikey, (BATCH, SEQ), minval=2, maxval=VOCAB,
                                   dtype=jnp.int32)
    input_ids = input_ids.at[:, 0].set(1)

    fwd = jax.jit(embedder_forward)
    cls_emb = fwd(kparams, input_ids)
    jax.block_until_ready(cls_emb)

    assert cls_emb.shape == (BATCH, HIDDEN)
    assert cls_emb.dtype == jnp.float32
    assert bool(jnp.all(jnp.isfinite(cls_emb)))
    print("KERNEL_OK")
</pallas_src>

<mosaic_0001>
module attributes {stable_mosaic.version = 11 : i64} {
  func.func @encoder_kernel(%arg0: memref<16x1xi32, #tpu.memory_space<vmem>>, %arg1: memref<128x128xbf16, #tpu.memory_space<vmem>>, %arg2: memref<11x128xf32, #tpu.memory_space<vmem>>, %arg3: memref<2x128x640xbf16, #tpu.memory_space<vmem>>, %arg4: memref<2x128x128xbf16, #tpu.memory_space<vmem>>, %arg5: memref<2x10x128xf32, #tpu.memory_space<vmem>>, %arg6: memref<2x128xf32, #tpu.memory_space<vmem>>) attributes {dimension_semantics = [], scalar_prefetch = 0 : i64, scratch_operands = 0 : i64, tpu.core_type = #tpu.core_type<tc>} {
    %0 = tpu.iota {dimensions = array<i32: 1>} : vector<1x128xi32>
    %c32_i32 = arith.constant 32 : i32
    %1 = vector.broadcast %c32_i32 : i32 to vector<1x128xi32>
    %2 = arith.cmpi slt, %0, %1 : vector<1x128xi32>
    %3 = arith.extui %2 : vector<1x128xi1> to vector<1x128xi32>
    %4 = arith.sitofp %3 : vector<1x128xi32> to vector<1x128xf32>
    %c0 = arith.constant 0 : index
    %c0_0 = arith.constant 0 : index
    %5 = vector.load %arg0[%c0, %c0_0] : memref<16x1xi32, #tpu.memory_space<vmem>>, vector<16x1xi32>
    %6 = tpu.iota {dimensions = array<i32: 1>} : vector<16x128xi32>
    %7 = vector.broadcast %5 : vector<16x1xi32> to vector<16x128xi32>
    %8 = arith.cmpi eq, %7, %6 : vector<16x128xi32>
    %9 = arith.extui %8 : vector<16x128xi1> to vector<16x128xi32>
    %10 = arith.sitofp %9 : vector<16x128xi32> to vector<16x128xf32>
    %11 = arith.truncf %10 : vector<16x128xf32> to vector<16x128xbf16>
    %c0_1 = arith.constant 0 : index
    %c0_2 = arith.constant 0 : index
    %12 = vector.load %arg1[%c0_1, %c0_2] : memref<128x128xbf16, #tpu.memory_space<vmem>>, vector<128x128xbf16>
    %cst = arith.constant dense<0.000000e+00> : vector<16x128xf32>
    %13 = tpu.matmul %11, %12, %cst {dimension_numbers = #tpu.dot_dimension_numbers<[1], [0], [0], [1], [0, 0, 1, 1], [], []>} : vector<16x128xbf16>, vector<128x128xbf16>, vector<16x128xf32> -> vector<16x128xf32>
    %c0_3 = arith.constant 0 : index
    %c0_4 = arith.constant 0 : index
    %14 = vector.load %arg2[%c0_3, %c0_4] : memref<11x128xf32, #tpu.memory_space<vmem>>, vector<8x128xf32>
    %15 = tpu.concatenate %14, %14 in 0 : vector<8x128xf32>, vector<8x128xf32> -> vector<16x128xf32>
    %c8 = arith.constant 8 : index
    %c0_5 = arith.constant 0 : index
    %16 = vector.load %arg2[%c8, %c0_5] : memref<11x128xf32, #tpu.memory_space<vmem>>, vector<1x128xf32>
    %c9 = arith.constant 9 : index
    %c0_6 = arith.constant 0 : index
    %17 = vector.load %arg2[%c9, %c0_6] : memref<11x128xf32, #tpu.memory_space<vmem>>, vector<1x128xf32>
    %c10 = arith.constant 10 : index
    %c0_7 = arith.constant 0 : index
    %18 = vector.load %arg2[%c10, %c0_7] : memref<11x128xf32, #tpu.memory_space<vmem>>, vector<1x128xf32>
    %19 = arith.addf %13, %15 : vector<16x128xf32>
    %20 = vector.broadcast %16 : vector<1x128xf32> to vector<16x128xf32>
    %21 = arith.addf %19, %20 : vector<16x128xf32>
    %cst_8 = arith.constant dense<0.000000e+00> : vector<16xf32>
    %22 = vector.multi_reduction <add>, %21, %cst_8 [1] : vector<16x128xf32> to vector<16xf32>
    %23 = vector.shape_cast %22 : vector<16xf32> to vector<16x1xf32>
    %cst_9 = arith.constant 3.125000e-02 : f32
    %24 = vector.broadcast %cst_9 : f32 to vector<16x1xf32>
    %25 = arith.mulf %23, %24 : vector<16x1xf32>
    %26 = vector.broadcast %25 : vector<16x1xf32> to vector<16x128xf32>
    %27 = arith.subf %21, %26 : vector<16x128xf32>
    %28 = vector.broadcast %4 : vector<1x128xf32> to vector<16x128xf32>
    %29 = arith.mulf %27, %28 : vector<16x128xf32>
    %30 = arith.mulf %29, %29 : vector<16x128xf32>
    %cst_10 = arith.constant dense<0.000000e+00> : vector<16xf32>
    %31 = vector.multi_reduction <add>, %30, %cst_10 [1] : vector<16x128xf32> to vector<16xf32>
    %32 = vector.shape_cast %31 : vector<16xf32> to vector<16x1xf32>
    %cst_11 = arith.constant 3.125000e-02 : f32
    %33 = vector.broadcast %cst_11 : f32 to vector<16x1xf32>
    %34 = arith.mulf %32, %33 : vector<16x1xf32>
    %cst_12 = arith.constant 9.99999996E-13 : f32
    %35 = vector.broadcast %cst_12 : f32 to vector<16x1xf32>
    %36 = arith.addf %34, %35 : vector<16x1xf32>
    %37 = math.rsqrt %36 : vector<16x1xf32>
    %38 = vector.broadcast %37 : vector<16x1xf32> to vector<16x128xf32>
    %39 = arith.mulf %29, %38 : vector<16x128xf32>
    %40 = vector.broadcast %17 : vector<1x128xf32> to vector<16x128xf32>
    %41 = arith.mulf %39, %40 : vector<16x128xf32>
    %42 = vector.broadcast %18 : vector<1x128xf32> to vector<16x128xf32>
    %43 = arith.addf %41, %42 : vector<16x128xf32>
    %c0_13 = arith.constant 0 : index
    %c0_14 = arith.constant 0 : index
    %c0_15 = arith.constant 0 : index
    %44 = vector.load %arg5[%c0_13, %c0_14, %c0_15] : memref<2x10x128xf32, #tpu.memory_space<vmem>>, vector<1x10x128xf32>
    %45 = vector.shape_cast %44 : vector<1x10x128xf32> to vector<10x128xf32>
    %46 = arith.truncf %43 : vector<16x128xf32> to vector<16x128xbf16>
    %c0_16 = arith.constant 0 : index
    %c0_17 = arith.constant 0 : index
    %c0_18 = arith.constant 0 : index
    %47 = vector.load %arg3[%c0_16, %c0_17, %c0_18] : memref<2x128x640xbf16, #tpu.memory_space<vmem>>, vector<1x128x384xbf16>
    %48 = vector.shape_cast %47 : vector<1x128x384xbf16> to vector<128x384xbf16>
    %cst_19 = arith.constant dense<0.000000e+00> : vector<16x384xf32>
    %49 = tpu.matmul %46, %48, %cst_19 {dimension_numbers = #tpu.dot_dimension_numbers<[1], [0], [0], [1], [0, 0, 1, 1], [], []>} : vector<16x128xbf16>, vector<128x384xbf16>, vector<16x384xf32> -> vector<16x384xf32>
    %50 = vector.extract_strided_slice %49 {offsets = [0, 0], sizes = [16, 128], strides = [1, 1]} : vector<16x384xf32> to vector<16x128xf32>
    %51 = vector.extract_strided_slice %45 {offsets = [0, 0], sizes = [1, 128], strides = [1, 1]} : vector<10x128xf32> to vector<1x128xf32>
    %52 = vector.broadcast %51 : vector<1x128xf32> to vector<16x128xf32>
    %53 = arith.addf %50, %52 : vector<16x128xf32>
    %54 = vector.shape_cast %53 : vector<16x128xf32> to vector<2x8x128xf32>
    %55 = vector.extract_strided_slice %49 {offsets = [0, 128], sizes = [16, 128], strides = [1, 1]} : vector<16x384xf32> to vector<16x128xf32>
    %56 = vector.extract_strided_slice %45 {offsets = [1, 0], sizes = [1, 128], strides = [1, 1]} : vector<10x128xf32> to vector<1x128xf32>
    %57 = vector.broadcast %56 : vector<1x128xf32> to vector<16x128xf32>
    %58 = arith.addf %55, %57 : vector<16x128xf32>
    %59 = vector.shape_cast %58 : vector<16x128xf32> to vector<2x8x128xf32>
    %60 = vector.extract_strided_slice %49 {offsets = [0, 256], sizes = [16, 128], strides = [1, 1]} : vector<16x384xf32> to vector<16x128xf32>
    %61 = vector.extract_strided_slice %45 {offsets = [2, 0], sizes = [1, 128], strides = [1, 1]} : vector<10x128xf32> to vector<1x128xf32>
    %62 = vector.broadcast %61 : vector<1x128xf32> to vector<16x128xf32>
    %63 = arith.addf %60, %62 : vector<16x128xf32>
    %64 = vector.shape_cast %63 : vector<16x128xf32> to vector<2x8x128xf32>
    %65 = vector.extract_strided_slice %54 {offsets = [0, 0, 0], sizes = [2, 8, 32], strides = [1, 1, 1]} : vector<2x8x128xf32> to vector<2x8x32xf32>
    %66 = arith.truncf %65 : vector<2x8x32xf32> to vector<2x8x32xbf16>
    %67 = vector.extract_strided_slice %59 {offsets = [0, 0, 0], sizes = [2, 8, 32], strides = [1, 1, 1]} : vector<2x8x128xf32> to vector<2x8x32xf32>
    %68 = arith.truncf %67 : vector<2x8x32xf32> to vector<2x8x32xbf16>
    %69 = vector.extract_strided_slice %64 {offsets = [0, 0, 0], sizes = [2, 8, 32], strides = [1, 1, 1]} : vector<2x8x128xf32> to vector<2x8x32xf32>
    %70 = arith.truncf %69 : vector<2x8x32xf32> to vector<2x8x32xbf16>
    "tpu.trace_start"() <{level = 10 : i32, message = "bqd,bkd->bqk"}> : () -> ()
    %cst_20 = arith.constant dense<0.000000e+00> : vector<2x8x8xf32>
    %71 = tpu.matmul %66, %68, %cst_20 {dimension_numbers = #tpu.dot_dimension_numbers<[2], [2], [1], [1], [0, 0, 0, 1, 1, 1], [0], [0]>} : vector<2x8x32xbf16>, vector<2x8x32xbf16>, vector<2x8x8xf32> -> vector<2x8x8xf32>
    "tpu.trace_stop"() : () -> ()
    %cst_21 = arith.constant dense<0xFF800000> : vector<2x8xf32>
    %72 = vector.multi_reduction <maximumf>, %71, %cst_21 [2] : vector<2x8x8xf32> to vector<2x8xf32>
    %73 = vector.shape_cast %72 : vector<2x8xf32> to vector<2x8x1xf32>
    %74 = vector.broadcast %73 : vector<2x8x1xf32> to vector<2x8x8xf32>
    %75 = arith.subf %71, %74 : vector<2x8x8xf32>
    %76 = math.exp %75 : vector<2x8x8xf32>
    %cst_22 = arith.constant dense<0.000000e+00> : vector<2x8xf32>
    %77 = vector.multi_reduction <add>, %76, %cst_22 [2] : vector<2x8x8xf32> to vector<2x8xf32>
    %78 = vector.shape_cast %77 : vector<2x8xf32> to vector<2x8x1xf32>
    %79 = tpu.reciprocal %78 {approx = true} : vector<2x8x1xf32> -> vector<2x8x1xf32>
    %80 = vector.broadcast %79 : vector<2x8x1xf32> to vector<2x8x8xf32>
    %81 = arith.mulf %76, %80 : vector<2x8x8xf32>
    %82 = arith.truncf %81 : vector<2x8x8xf32> to vector<2x8x8xbf16>
    "tpu.trace_start"() <{level = 10 : i32, message = "bqk,bkd->bqd"}> : () -> ()
    %cst_23 = arith.constant dense<0.000000e+00> : vector<2x8x32xf32>
    %83 = tpu.matmul %82, %70, %cst_23 {dimension_numbers = #tpu.dot_dimension_numbers<[2], [1], [1], [2], [0, 0, 0, 1, 1, 2], [0], [0]>} : vector<2x8x8xbf16>, vector<2x8x32xbf16>, vector<2x8x32xf32> -> vector<2x8x32xf32>
    "tpu.trace_stop"() : () -> ()
    %84 = vector.extract_strided_slice %54 {offsets = [0, 0, 32], sizes = [2, 8, 32], strides = [1, 1, 1]} : vector<2x8x128xf32> to vector<2x8x32xf32>
    %85 = arith.truncf %84 : vector<2x8x32xf32> to vector<2x8x32xbf16>
    %86 = vector.extract_strided_slice %59 {offsets = [0, 0, 32], sizes = [2, 8, 32], strides = [1, 1, 1]} : vector<2x8x128xf32> to vector<2x8x32xf32>
    %87 = arith.truncf %86 : vector<2x8x32xf32> to vector<2x8x32xbf16>
    %88 = vector.extract_strided_slice %64 {offsets = [0, 0, 32], sizes = [2, 8, 32], strides = [1, 1, 1]} : vector<2x8x128xf32> to vector<2x8x32xf32>
    %89 = arith.truncf %88 : vector<2x8x32xf32> to vector<2x8x32xbf16>
    "tpu.trace_start"() <{level = 10 : i32, message = "bqd,bkd->bqk"}> : () -> ()
    %cst_24 = arith.constant dense<0.000000e+00> : vector<2x8x8xf32>
    %90 = tpu.matmul %85, %87, %cst_24 {dimension_numbers = #tpu.dot_dimension_numbers<[2], [2], [1], [1], [0, 0, 0, 1, 1, 1], [0], [0]>} : vector<2x8x32xbf16>, vector<2x8x32xbf16>, vector<2x8x8xf32> -> vector<2x8x8xf32>
    "tpu.trace_stop"() : () -> ()
    %cst_25 = arith.constant dense<0xFF800000> : vector<2x8xf32>
    %91 = vector.multi_reduction <maximumf>, %90, %cst_25 [2] : vector<2x8x8xf32> to vector<2x8xf32>
    %92 = vector.shape_cast %91 : vector<2x8xf32> to vector<2x8x1xf32>
    %93 = vector.broadcast %92 : vector<2x8x1xf32> to vector<2x8x8xf32>
    %94 = arith.subf %90, %93 : vector<2x8x8xf32>
    %95 = math.exp %94 : vector<2x8x8xf32>
    %cst_26 = arith.constant dense<0.000000e+00> : vector<2x8xf32>
    %96 = vector.multi_reduction <add>, %95, %cst_26 [2] : vector<2x8x8xf32> to vector<2x8xf32>
    %97 = vector.shape_cast %96 : vector<2x8xf32> to vector<2x8x1xf32>
    %98 = tpu.reciprocal %97 {approx = true} : vector<2x8x1xf32> -> vector<2x8x1xf32>
    %99 = vector.broadcast %98 : vector<2x8x1xf32> to vector<2x8x8xf32>
    %100 = arith.mulf %95, %99 : vector<2x8x8xf32>
    %101 = arith.truncf %100 : vector<2x8x8xf32> to vector<2x8x8xbf16>
    "tpu.trace_start"() <{level = 10 : i32, message = "bqk,bkd->bqd"}> : () -> ()
    %cst_27 = arith.constant dense<0.000000e+00> : vector<2x8x32xf32>
    %102 = tpu.matmul %101, %89, %cst_27 {dimension_numbers = #tpu.dot_dimension_numbers<[2], [1], [1], [2], [0, 0, 0, 1, 1, 2], [0], [0]>} : vector<2x8x8xbf16>, vector<2x8x32xbf16>, vector<2x8x32xf32> -> vector<2x8x32xf32>
    "tpu.trace_stop"() : () -> ()
    %103 = vector.extract_strided_slice %54 {offsets = [0, 0, 64], sizes = [2, 8, 32], strides = [1, 1, 1]} : vector<2x8x128xf32> to vector<2x8x32xf32>
    %104 = arith.truncf %103 : vector<2x8x32xf32> to vector<2x8x32xbf16>
    %105 = vector.extract_strided_slice %59 {offsets = [0, 0, 64], sizes = [2, 8, 32], strides = [1, 1, 1]} : vector<2x8x128xf32> to vector<2x8x32xf32>
    %106 = arith.truncf %105 : vector<2x8x32xf32> to vector<2x8x32xbf16>
    %107 = vector.extract_strided_slice %64 {offsets = [0, 0, 64], sizes = [2, 8, 32], strides = [1, 1, 1]} : vector<2x8x128xf32> to vector<2x8x32xf32>
    %108 = arith.truncf %107 : vector<2x8x32xf32> to vector<2x8x32xbf16>
    "tpu.trace_start"() <{level = 10 : i32, message = "bqd,bkd->bqk"}> : () -> ()
    %cst_28 = arith.constant dense<0.000000e+00> : vector<2x8x8xf32>
    %109 = tpu.matmul %104, %106, %cst_28 {dimension_numbers = #tpu.dot_dimension_numbers<[2], [2], [1], [1], [0, 0, 0, 1, 1, 1], [0], [0]>} : vector<2x8x32xbf16>, vector<2x8x32xbf16>, vector<2x8x8xf32> -> vector<2x8x8xf32>
    "tpu.trace_stop"() : () -> ()
    %cst_29 = arith.constant dense<0xFF800000> : vector<2x8xf32>
    %110 = vector.multi_reduction <maximumf>, %109, %cst_29 [2] : vector<2x8x8xf32> to vector<2x8xf32>
    %111 = vector.shape_cast %110 : vector<2x8xf32> to vector<2x8x1xf32>
    %112 = vector.broadcast %111 : vector<2x8x1xf32> to vector<2x8x8xf32>
    %113 = arith.subf %109, %112 : vector<2x8x8xf32>
    %114 = math.exp %113 : vector<2x8x8xf32>
    %cst_30 = arith.constant dense<0.000000e+00> : vector<2x8xf32>
    %115 = vector.multi_reduction <add>, %114, %cst_30 [2] : vector<2x8x8xf32> to vector<2x8xf32>
    %116 = vector.shape_cast %115 : vector<2x8xf32> to vector<2x8x1xf32>
    %117 = tpu.reciprocal %116 {approx = true} : vector<2x8x1xf32> -> vector<2x8x1xf32>
    %118 = vector.broadcast %117 : vector<2x8x1xf32> to vector<2x8x8xf32>
    %119 = arith.mulf %114, %118 : vector<2x8x8xf32>
    %120 = arith.truncf %119 : vector<2x8x8xf32> to vector<2x8x8xbf16>
    "tpu.trace_start"() <{level = 10 : i32, message = "bqk,bkd->bqd"}> : () -> ()
    %cst_31 = arith.constant dense<0.000000e+00> : vector<2x8x32xf32>
    %121 = tpu.matmul %120, %108, %cst_31 {dimension_numbers = #tpu.dot_dimension_numbers<[2], [1], [1], [2], [0, 0, 0, 1, 1, 2], [0], [0]>} : vector<2x8x8xbf16>, vector<2x8x32xbf16>, vector<2x8x32xf32> -> vector<2x8x32xf32>
    "tpu.trace_stop"() : () -> ()
    %122 = vector.extract_strided_slice %54 {offsets = [0, 0, 96], sizes = [2, 8, 32], strides = [1, 1, 1]} : vector<2x8x128xf32> to vector<2x8x32xf32>
    %123 = arith.truncf %122 : vector<2x8x32xf32> to vector<2x8x32xbf16>
    %124 = vector.extract_strided_slice %59 {offsets = [0, 0, 96], sizes = [2, 8, 32], strides = [1, 1, 1]} : vector<2x8x128xf32> to vector<2x8x32xf32>
    %125 = arith.truncf %124 : vector<2x8x32xf32> to vector<2x8x32xbf16>
    %126 = vector.extract_strided_slice %64 {offsets = [0, 0, 96], sizes = [2, 8, 32], strides = [1, 1, 1]} : vector<2x8x128xf32> to vector<2x8x32xf32>
    %127 = arith.truncf %126 : vector<2x8x32xf32> to vector<2x8x32xbf16>
    "tpu.trace_start"() <{level = 10 : i32, message = "bqd,bkd->bqk"}> : () -> ()
    %cst_32 = arith.constant dense<0.000000e+00> : vector<2x8x8xf32>
    %128 = tpu.matmul %123, %125, %cst_32 {dimension_numbers = #tpu.dot_dimension_numbers<[2], [2], [1], [1], [0, 0, 0, 1, 1, 1], [0], [0]>} : vector<2x8x32xbf16>, vector<2x8x32xbf16>, vector<2x8x8xf32> -> vector<2x8x8xf32>
    "tpu.trace_stop"() : () -> ()
    %cst_33 = arith.constant dense<0xFF800000> : vector<2x8xf32>
    %129 = vector.multi_reduction <maximumf>, %128, %cst_33 [2] : vector<2x8x8xf32> to vector<2x8xf32>
    %130 = vector.shape_cast %129 : vector<2x8xf32> to vector<2x8x1xf32>
    %131 = vector.broadcast %130 : vector<2x8x1xf32> to vector<2x8x8xf32>
    %132 = arith.subf %128, %131 : vector<2x8x8xf32>
    %133 = math.exp %132 : vector<2x8x8xf32>
    %cst_34 = arith.constant dense<0.000000e+00> : vector<2x8xf32>
    %134 = vector.multi_reduction <add>, %133, %cst_34 [2] : vector<2x8x8xf32> to vector<2x8xf32>
    %135 = vector.shape_cast %134 : vector<2x8xf32> to vector<2x8x1xf32>
    %136 = tpu.reciprocal %135 {approx = true} : vector<2x8x1xf32> -> vector<2x8x1xf32>
    %137 = vector.broadcast %136 : vector<2x8x1xf32> to vector<2x8x8xf32>
    %138 = arith.mulf %133, %137 : vector<2x8x8xf32>
    %139 = arith.truncf %138 : vector<2x8x8xf32> to vector<2x8x8xbf16>
    "tpu.trace_start"() <{level = 10 : i32, message = "bqk,bkd->bqd"}> : () -> ()
    %cst_35 = arith.constant dense<0.000000e+00> : vector<2x8x32xf32>
    %140 = tpu.matmul %139, %127, %cst_35 {dimension_numbers = #tpu.dot_dimension_numbers<[2], [1], [1], [2], [0, 0, 0, 1, 1, 2], [0], [0]>} : vector<2x8x8xbf16>, vector<2x8x32xbf16>, vector<2x8x32xf32> -> vector<2x8x32xf32>
    "tpu.trace_stop"() : () -> ()
    %141 = tpu.concatenate %83, %102, %121, %140 in 2 : vector<2x8x32xf32>, vector<2x8x32xf32>, vector<2x8x32xf32>, vector<2x8x32xf32> -> vector<2x8x128xf32>
    %142 = vector.shape_cast %141 : vector<2x8x128xf32> to vector<16x128xf32>
    %143 = arith.truncf %142 : vector<16x128xf32> to vector<16x128xbf16>
    %c0_36 = arith.constant 0 : index
    %c0_37 = arith.constant 0 : index
    %c384 = arith.constant 384 : index
    %144 = vector.load %arg3[%c0_36, %c0_37, %c384] : memref<2x128x640xbf16, #tpu.memory_space<vmem>>, vector<1x128x128xbf16>
    %145 = vector.shape_cast %144 : vector<1x128x128xbf16> to vector<128x128xbf16>
    %cst_38 = arith.constant dense<0.000000e+00> : vector<16x128xf32>
    %146 = tpu.matmul %143, %145, %cst_38 {dimension_numbers = #tpu.dot_dimension_numbers<[1], [0], [0], [1], [0, 0, 1, 1], [], []>} : vector<16x128xbf16>, vector<128x128xbf16>, vector<16x128xf32> -> vector<16x128xf32>
    %147 = vector.extract_strided_slice %45 {offsets = [3, 0], sizes = [1, 128], strides = [1, 1]} : vector<10x128xf32> to vector<1x128xf32>
    %148 = vector.broadcast %147 : vector<1x128xf32> to vector<16x128xf32>
    %149 = arith.addf %146, %148 : vector<16x128xf32>
    %150 = arith.addf %43, %149 : vector<16x128xf32>
    %151 = vector.extract_strided_slice %45 {offsets = [4, 0], sizes = [1, 128], strides = [1, 1]} : vector<10x128xf32> to vector<1x128xf32>
    %152 = vector.extract_strided_slice %45 {offsets = [5, 0], sizes = [1, 128], strides = [1, 1]} : vector<10x128xf32> to vector<1x128xf32>
    %cst_39 = arith.constant dense<0.000000e+00> : vector<16xf32>
    %153 = vector.multi_reduction <add>, %150, %cst_39 [1] : vector<16x128xf32> to vector<16xf32>
    %154 = vector.shape_cast %153 : vector<16xf32> to vector<16x1xf32>
    %cst_40 = arith.constant 3.125000e-02 : f32
    %155 = vector.broadcast %cst_40 : f32 to vector<16x1xf32>
    %156 = arith.mulf %154, %155 : vector<16x1xf32>
    %157 = vector.broadcast %156 : vector<16x1xf32> to vector<16x128xf32>
    %158 = arith.subf %150, %157 : vector<16x128xf32>
    %159 = vector.broadcast %4 : vector<1x128xf32> to vector<16x128xf32>
    %160 = arith.mulf %158, %159 : vector<16x128xf32>
    %161 = arith.mulf %160, %160 : vector<16x128xf32>
    %cst_41 = arith.constant dense<0.000000e+00> : vector<16xf32>
    %162 = vector.multi_reduction <add>, %161, %cst_41 [1] : vector<16x128xf32> to vector<16xf32>
    %163 = vector.shape_cast %162 : vector<16xf32> to vector<16x1xf32>
    %cst_42 = arith.constant 3.125000e-02 : f32
    %164 = vector.broadcast %cst_42 : f32 to vector<16x1xf32>
    %165 = arith.mulf %163, %164 : vector<16x1xf32>
    %cst_43 = arith.constant 9.99999996E-13 : f32
    %166 = vector.broadcast %cst_43 : f32 to vector<16x1xf32>
    %167 = arith.addf %165, %166 : vector<16x1xf32>
    %168 = math.rsqrt %167 : vector<16x1xf32>
    %169 = vector.broadcast %168 : vector<16x1xf32> to vector<16x128xf32>
    %170 = arith.mulf %160, %169 : vector<16x128xf32>
    %171 = vector.broadcast %151 : vector<1x128xf32> to vector<16x128xf32>
    %172 = arith.mulf %170, %171 : vector<16x128xf32>
    %173 = vector.broadcast %152 : vector<1x128xf32> to vector<16x128xf32>
    %174 = arith.addf %172, %173 : vector<16x128xf32>
    %175 = arith.truncf %174 : vector<16x128xf32> to vector<16x128xbf16>
    %c0_44 = arith.constant 0 : index
    %c0_45 = arith.constant 0 : index
    %c512 = arith.constant 512 : index
    %176 = vector.load %arg3[%c0_44, %c0_45, %c512] : memref<2x128x640xbf16, #tpu.memory_space<vmem>>, vector<1x128x128xbf16>
    %177 = vector.shape_cast %176 : vector<1x128x128xbf16> to vector<128x128xbf16>
    %cst_46 = arith.constant dense<0.000000e+00> : vector<16x128xf32>
    %178 = tpu.matmul %175, %177, %cst_46 {dimension_numbers = #tpu.dot_dimension_numbers<[1], [0], [0], [1], [0, 0, 1, 1], [], []>} : vector<16x128xbf16>, vector<128x128xbf16>, vector<16x128xf32> -> vector<16x128xf32>
    %179 = vector.extract_strided_slice %45 {offsets = [6, 0], sizes = [1, 128], strides = [1, 1]} : vector<10x128xf32> to vector<1x128xf32>
    %180 = vector.broadcast %179 : vector<1x128xf32> to vector<16x128xf32>
    %181 = arith.addf %178, %180 : vector<16x128xf32>
    %182 = arith.mulf %181, %181 : vector<16x128xf32>
    %183 = arith.mulf %181, %182 : vector<16x128xf32>
    %cst_47 = arith.constant 4.471500e-02 : f32
    %184 = vector.broadcast %cst_47 : f32 to vector<16x128xf32>
    %185 = arith.mulf %184, %183 : vector<16x128xf32>
    %186 = arith.addf %181, %185 : vector<16x128xf32>
    %cst_48 = arith.constant 0.797884583 : f32
    %187 = vector.broadcast %cst_48 : f32 to vector<16x128xf32>
    %188 = arith.mulf %187, %186 : vector<16x128xf32>
    %189 = math.tanh %188 : vector<16x128xf32>
    %cst_49 = arith.constant 1.000000e+00 : f32
    %190 = vector.broadcast %cst_49 : f32 to vector<16x128xf32>
    %191 = arith.addf %190, %189 : vector<16x128xf32>
    %cst_50 = arith.constant 5.000000e-01 : f32
    %192 = vector.broadcast %cst_50 : f32 to vector<16x128xf32>
    %193 = arith.mulf %192, %191 : vector<16x128xf32>
    %194 = arith.mulf %181, %193 : vector<16x128xf32>
    %195 = arith.truncf %194 : vector<16x128xf32> to vector<16x128xbf16>
    %c0_51 = arith.constant 0 : index
    %c0_52 = arith.constant 0 : index
    %c0_53 = arith.constant 0 : index
    %196 = vector.load %arg4[%c0_51, %c0_52, %c0_53] : memref<2x128x128xbf16, #tpu.memory_space<vmem>>, vector<1x128x128xbf16>
    %197 = vector.shape_cast %196 : vector<1x128x128xbf16> to vector<128x128xbf16>
    %cst_54 = arith.constant dense<0.000000e+00> : vector<16x128xf32>
    %198 = tpu.matmul %195, %197, %cst_54 {dimension_numbers = #tpu.dot_dimension_numbers<[1], [0], [0], [1], [0, 0, 1, 1], [], []>} : vector<16x128xbf16>, vector<128x128xbf16>, vector<16x128xf32> -> vector<16x128xf32>
    %199 = vector.extract_strided_slice %45 {offsets = [7, 0], sizes = [1, 128], strides = [1, 1]} : vector<10x128xf32> to vector<1x128xf32>
    %200 = vector.broadcast %199 : vector<1x128xf32> to vector<16x128xf32>
    %201 = arith.addf %198, %200 : vector<16x128xf32>
    %202 = arith.addf %174, %201 : vector<16x128xf32>
    %203 = vector.extract_strided_slice %45 {offsets = [8, 0], sizes = [1, 128], strides = [1, 1]} : vector<10x128xf32> to vector<1x128xf32>
    %204 = vector.extract_strided_slice %45 {offsets = [9, 0], sizes = [1, 128], strides = [1, 1]} : vector<10x128xf32> to vector<1x128xf32>
    %cst_55 = arith.constant dense<0.000000e+00> : vector<16xf32>
    %205 = vector.multi_reduction <add>, %202, %cst_55 [1] : vector<16x128xf32> to vector<16xf32>
    %206 = vector.shape_cast %205 : vector<16xf32> to vector<16x1xf32>
    %cst_56 = arith.constant 3.125000e-02 : f32
    %207 = vector.broadcast %cst_56 : f32 to vector<16x1xf32>
    %208 = arith.mulf %206, %207 : vector<16x1xf32>
    %209 = vector.broadcast %208 : vector<16x1xf32> to vector<16x128xf32>
    %210 = arith.subf %202, %209 : vector<16x128xf32>
    %211 = vector.broadcast %4 : vector<1x128xf32> to vector<16x128xf32>
    %212 = arith.mulf %210, %211 : vector<16x128xf32>
    %213 = arith.mulf %212, %212 : vector<16x128xf32>
    %cst_57 = arith.constant dense<0.000000e+00> : vector<16xf32>
    %214 = vector.multi_reduction <add>, %213, %cst_57 [1] : vector<16x128xf32> to vector<16xf32>
    %215 = vector.shape_cast %214 : vector<16xf32> to vector<16x1xf32>
    %cst_58 = arith.constant 3.125000e-02 : f32
    %216 = vector.broadcast %cst_58 : f32 to vector<16x1xf32>
    %217 = arith.mulf %215, %216 : vector<16x1xf32>
    %cst_59 = arith.constant 9.99999996E-13 : f32
    %218 = vector.broadcast %cst_59 : f32 to vector<16x1xf32>
    %219 = arith.addf %217, %218 : vector<16x1xf32>
    %220 = math.rsqrt %219 : vector<16x1xf32>
    %221 = vector.broadcast %220 : vector<16x1xf32> to vector<16x128xf32>
    %222 = arith.mulf %212, %221 : vector<16x128xf32>
    %223 = vector.broadcast %203 : vector<1x128xf32> to vector<16x128xf32>
    %224 = arith.mulf %222, %223 : vector<16x128xf32>
    %225 = vector.broadcast %204 : vector<1x128xf32> to vector<16x128xf32>
    %226 = arith.addf %224, %225 : vector<16x128xf32>
    %c1 = arith.constant 1 : index
    %c0_60 = arith.constant 0 : index
    %c0_61 = arith.constant 0 : index
    %227 = vector.load %arg5[%c1, %c0_60, %c0_61] : memref<2x10x128xf32, #tpu.memory_space<vmem>>, vector<1x10x128xf32>
    %228 = vector.shape_cast %227 : vector<1x10x128xf32> to vector<10x128xf32>
    %229 = arith.truncf %226 : vector<16x128xf32> to vector<16x128xbf16>
    %c1_62 = arith.constant 1 : index
    %c0_63 = arith.constant 0 : index
    %c0_64 = arith.constant 0 : index
    %230 = vector.load %arg3[%c1_62, %c0_63, %c0_64] : memref<2x128x640xbf16, #tpu.memory_space<vmem>>, vector<1x128x384xbf16>
    %231 = vector.shape_cast %230 : vector<1x128x384xbf16> to vector<128x384xbf16>
    %cst_65 = arith.constant dense<0.000000e+00> : vector<16x384xf32>
    %232 = tpu.matmul %229, %231, %cst_65 {dimension_numbers = #tpu.dot_dimension_numbers<[1], [0], [0], [1], [0, 0, 1, 1], [], []>} : vector<16x128xbf16>, vector<128x384xbf16>, vector<16x384xf32> -> vector<16x384xf32>
    %233 = vector.extract_strided_slice %232 {offsets = [0, 0], sizes = [16, 128], strides = [1, 1]} : vector<16x384xf32> to vector<16x128xf32>
    %234 = vector.extract_strided_slice %228 {offsets = [0, 0], sizes = [1, 128], strides = [1, 1]} : vector<10x128xf32> to vector<1x128xf32>
    %235 = vector.broadcast %234 : vector<1x128xf32> to vector<16x128xf32>
    %236 = arith.addf %233, %235 : vector<16x128xf32>
    %237 = vector.shape_cast %236 : vector<16x128xf32> to vector<2x8x128xf32>
    %238 = vector.extract_strided_slice %232 {offsets = [0, 128], sizes = [16, 128], strides = [1, 1]} : vector<16x384xf32> to vector<16x128xf32>
    %239 = vector.extract_strided_slice %228 {offsets = [1, 0], sizes = [1, 128], strides = [1, 1]} : vector<10x128xf32> to vector<1x128xf32>
    %240 = vector.broadcast %239 : vector<1x128xf32> to vector<16x128xf32>
    %241 = arith.addf %238, %240 : vector<16x128xf32>
    %242 = vector.shape_cast %241 : vector<16x128xf32> to vector<2x8x128xf32>
    %243 = vector.extract_strided_slice %232 {offsets = [0, 256], sizes = [16, 128], strides = [1, 1]} : vector<16x384xf32> to vector<16x128xf32>
    %244 = vector.extract_strided_slice %228 {offsets = [2, 0], sizes = [1, 128], strides = [1, 1]} : vector<10x128xf32> to vector<1x128xf32>
    %245 = vector.broadcast %244 : vector<1x128xf32> to vector<16x128xf32>
    %246 = arith.addf %243, %245 : vector<16x128xf32>
    %247 = vector.shape_cast %246 : vector<16x128xf32> to vector<2x8x128xf32>
    %248 = vector.extract_strided_slice %237 {offsets = [0, 0, 0], sizes = [2, 8, 32], strides = [1, 1, 1]} : vector<2x8x128xf32> to vector<2x8x32xf32>
    %249 = arith.truncf %248 : vector<2x8x32xf32> to vector<2x8x32xbf16>
    %250 = vector.extract_strided_slice %242 {offsets = [0, 0, 0], sizes = [2, 8, 32], strides = [1, 1, 1]} : vector<2x8x128xf32> to vector<2x8x32xf32>
    %251 = arith.truncf %250 : vector<2x8x32xf32> to vector<2x8x32xbf16>
    %252 = vector.extract_strided_slice %247 {offsets = [0, 0, 0], sizes = [2, 8, 32], strides = [1, 1, 1]} : vector<2x8x128xf32> to vector<2x8x32xf32>
    %253 = arith.truncf %252 : vector<2x8x32xf32> to vector<2x8x32xbf16>
    "tpu.trace_start"() <{level = 10 : i32, message = "bqd,bkd->bqk"}> : () -> ()
    %cst_66 = arith.constant dense<0.000000e+00> : vector<2x8x8xf32>
    %254 = tpu.matmul %249, %251, %cst_66 {dimension_numbers = #tpu.dot_dimension_numbers<[2], [2], [1], [1], [0, 0, 0, 1, 1, 1], [0], [0]>} : vector<2x8x32xbf16>, vector<2x8x32xbf16>, vector<2x8x8xf32> -> vector<2x8x8xf32>
    "tpu.trace_stop"() : () -> ()
    %cst_67 = arith.constant dense<0xFF800000> : vector<2x8xf32>
    %255 = vector.multi_reduction <maximumf>, %254, %cst_67 [2] : vector<2x8x8xf32> to vector<2x8xf32>
    %256 = vector.shape_cast %255 : vector<2x8xf32> to vector<2x8x1xf32>
    %257 = vector.broadcast %256 : vector<2x8x1xf32> to vector<2x8x8xf32>
    %258 = arith.subf %254, %257 : vector<2x8x8xf32>
    %259 = math.exp %258 : vector<2x8x8xf32>
    %cst_68 = arith.constant dense<0.000000e+00> : vector<2x8xf32>
    %260 = vector.multi_reduction <add>, %259, %cst_68 [2] : vector<2x8x8xf32> to vector<2x8xf32>
    %261 = vector.shape_cast %260 : vector<2x8xf32> to vector<2x8x1xf32>
    %262 = tpu.reciprocal %261 {approx = true} : vector<2x8x1xf32> -> vector<2x8x1xf32>
    %263 = vector.broadcast %262 : vector<2x8x1xf32> to vector<2x8x8xf32>
    %264 = arith.mulf %259, %263 : vector<2x8x8xf32>
    %265 = arith.truncf %264 : vector<2x8x8xf32> to vector<2x8x8xbf16>
    "tpu.trace_start"() <{level = 10 : i32, message = "bqk,bkd->bqd"}> : () -> ()
    %cst_69 = arith.constant dense<0.000000e+00> : vector<2x8x32xf32>
    %266 = tpu.matmul %265, %253, %cst_69 {dimension_numbers = #tpu.dot_dimension_numbers<[2], [1], [1], [2], [0, 0, 0, 1, 1, 2], [0], [0]>} : vector<2x8x8xbf16>, vector<2x8x32xbf16>, vector<2x8x32xf32> -> vector<2x8x32xf32>
    "tpu.trace_stop"() : () -> ()
    %267 = vector.extract_strided_slice %237 {offsets = [0, 0, 32], sizes = [2, 8, 32], strides = [1, 1, 1]} : vector<2x8x128xf32> to vector<2x8x32xf32>
    %268 = arith.truncf %267 : vector<2x8x32xf32> to vector<2x8x32xbf16>
    %269 = vector.extract_strided_slice %242 {offsets = [0, 0, 32], sizes = [2, 8, 32], strides = [1, 1, 1]} : vector<2x8x128xf32> to vector<2x8x32xf32>
    %270 = arith.truncf %269 : vector<2x8x32xf32> to vector<2x8x32xbf16>
    %271 = vector.extract_strided_slice %247 {offsets = [0, 0, 32], sizes = [2, 8, 32], strides = [1, 1, 1]} : vector<2x8x128xf32> to vector<2x8x32xf32>
    %272 = arith.truncf %271 : vector<2x8x32xf32> to vector<2x8x32xbf16>
    "tpu.trace_start"() <{level = 10 : i32, message = "bqd,bkd->bqk"}> : () -> ()
    %cst_70 = arith.constant dense<0.000000e+00> : vector<2x8x8xf32>
    %273 = tpu.matmul %268, %270, %cst_70 {dimension_numbers = #tpu.dot_dimension_numbers<[2], [2], [1], [1], [0, 0, 0, 1, 1, 1], [0], [0]>} : vector<2x8x32xbf16>, vector<2x8x32xbf16>, vector<2x8x8xf32> -> vector<2x8x8xf32>
    "tpu.trace_stop"() : () -> ()
    %cst_71 = arith.constant dense<0xFF800000> : vector<2x8xf32>
    %274 = vector.multi_reduction <maximumf>, %273, %cst_71 [2] : vector<2x8x8xf32> to vector<2x8xf32>
    %275 = vector.shape_cast %274 : vector<2x8xf32> to vector<2x8x1xf32>
    %276 = vector.broadcast %275 : vector<2x8x1xf32> to vector<2x8x8xf32>
    %277 = arith.subf %273, %276 : vector<2x8x8xf32>
    %278 = math.exp %277 : vector<2x8x8xf32>
    %cst_72 = arith.constant dense<0.000000e+00> : vector<2x8xf32>
    %279 = vector.multi_reduction <add>, %278, %cst_72 [2] : vector<2x8x8xf32> to vector<2x8xf32>
    %280 = vector.shape_cast %279 : vector<2x8xf32> to vector<2x8x1xf32>
    %281 = tpu.reciprocal %280 {approx = true} : vector<2x8x1xf32> -> vector<2x8x1xf32>
    %282 = vector.broadcast %281 : vector<2x8x1xf32> to vector<2x8x8xf32>
    %283 = arith.mulf %278, %282 : vector<2x8x8xf32>
    %284 = arith.truncf %283 : vector<2x8x8xf32> to vector<2x8x8xbf16>
    "tpu.trace_start"() <{level = 10 : i32, message = "bqk,bkd->bqd"}> : () -> ()
    %cst_73 = arith.constant dense<0.000000e+00> : vector<2x8x32xf32>
    %285 = tpu.matmul %284, %272, %cst_73 {dimension_numbers = #tpu.dot_dimension_numbers<[2], [1], [1], [2], [0, 0, 0, 1, 1, 2], [0], [0]>} : vector<2x8x8xbf16>, vector<2x8x32xbf16>, vector<2x8x32xf32> -> vector<2x8x32xf32>
    "tpu.trace_stop"() : () -> ()
    %286 = vector.extract_strided_slice %237 {offsets = [0, 0, 64], sizes = [2, 8, 32], strides = [1, 1, 1]} : vector<2x8x128xf32> to vector<2x8x32xf32>
    %287 = arith.truncf %286 : vector<2x8x32xf32> to vector<2x8x32xbf16>
    %288 = vector.extract_strided_slice %242 {offsets = [0, 0, 64], sizes = [2, 8, 32], strides = [1, 1, 1]} : vector<2x8x128xf32> to vector<2x8x32xf32>
    %289 = arith.truncf %288 : vector<2x8x32xf32> to vector<2x8x32xbf16>
    %290 = vector.extract_strided_slice %247 {offsets = [0, 0, 64], sizes = [2, 8, 32], strides = [1, 1, 1]} : vector<2x8x128xf32> to vector<2x8x32xf32>
    %291 = arith.truncf %290 : vector<2x8x32xf32> to vector<2x8x32xbf16>
    "tpu.trace_start"() <{level = 10 : i32, message = "bqd,bkd->bqk"}> : () -> ()
    %cst_74 = arith.constant dense<0.000000e+00> : vector<2x8x8xf32>
    %292 = tpu.matmul %287, %289, %cst_74 {dimension_numbers = #tpu.dot_dimension_numbers<[2], [2], [1], [1], [0, 0, 0, 1, 1, 1], [0], [0]>} : vector<2x8x32xbf16>, vector<2x8x32xbf16>, vector<2x8x8xf32> -> vector<2x8x8xf32>
    "tpu.trace_stop"() : () -> ()
    %cst_75 = arith.constant dense<0xFF800000> : vector<2x8xf32>
    %293 = vector.multi_reduction <maximumf>, %292, %cst_75 [2] : vector<2x8x8xf32> to vector<2x8xf32>
    %294 = vector.shape_cast %293 : vector<2x8xf32> to vector<2x8x1xf32>
    %295 = vector.broadcast %294 : vector<2x8x1xf32> to vector<2x8x8xf32>
    %296 = arith.subf %292, %295 : vector<2x8x8xf32>
    %297 = math.exp %296 : vector<2x8x8xf32>
    %cst_76 = arith.constant dense<0.000000e+00> : vector<2x8xf32>
    %298 = vector.multi_reduction <add>, %297, %cst_76 [2] : vector<2x8x8xf32> to vector<2x8xf32>
    %299 = vector.shape_cast %298 : vector<2x8xf32> to vector<2x8x1xf32>
    %300 = tpu.reciprocal %299 {approx = true} : vector<2x8x1xf32> -> vector<2x8x1xf32>
    %301 = vector.broadcast %300 : vector<2x8x1xf32> to vector<2x8x8xf32>
    %302 = arith.mulf %297, %301 : vector<2x8x8xf32>
    %303 = arith.truncf %302 : vector<2x8x8xf32> to vector<2x8x8xbf16>
    "tpu.trace_start"() <{level = 10 : i32, message = "bqk,bkd->bqd"}> : () -> ()
    %cst_77 = arith.constant dense<0.000000e+00> : vector<2x8x32xf32>
    %304 = tpu.matmul %303, %291, %cst_77 {dimension_numbers = #tpu.dot_dimension_numbers<[2], [1], [1], [2], [0, 0, 0, 1, 1, 2], [0], [0]>} : vector<2x8x8xbf16>, vector<2x8x32xbf16>, vector<2x8x32xf32> -> vector<2x8x32xf32>
    "tpu.trace_stop"() : () -> ()
    %305 = vector.extract_strided_slice %237 {offsets = [0, 0, 96], sizes = [2, 8, 32], strides = [1, 1, 1]} : vector<2x8x128xf32> to vector<2x8x32xf32>
    %306 = arith.truncf %305 : vector<2x8x32xf32> to vector<2x8x32xbf16>
    %307 = vector.extract_strided_slice %242 {offsets = [0, 0, 96], sizes = [2, 8, 32], strides = [1, 1, 1]} : vector<2x8x128xf32> to vector<2x8x32xf32>
    %308 = arith.truncf %307 : vector<2x8x32xf32> to vector<2x8x32xbf16>
    %309 = vector.extract_strided_slice %247 {offsets = [0, 0, 96], sizes = [2, 8, 32], strides = [1, 1, 1]} : vector<2x8x128xf32> to vector<2x8x32xf32>
    %310 = arith.truncf %309 : vector<2x8x32xf32> to vector<2x8x32xbf16>
    "tpu.trace_start"() <{level = 10 : i32, message = "bqd,bkd->bqk"}> : () -> ()
    %cst_78 = arith.constant dense<0.000000e+00> : vector<2x8x8xf32>
    %311 = tpu.matmul %306, %308, %cst_78 {dimension_numbers = #tpu.dot_dimension_numbers<[2], [2], [1], [1], [0, 0, 0, 1, 1, 1], [0], [0]>} : vector<2x8x32xbf16>, vector<2x8x32xbf16>, vector<2x8x8xf32> -> vector<2x8x8xf32>
    "tpu.trace_stop"() : () -> ()
    %cst_79 = arith.constant dense<0xFF800000> : vector<2x8xf32>
    %312 = vector.multi_reduction <maximumf>, %311, %cst_79 [2] : vector<2x8x8xf32> to vector<2x8xf32>
    %313 = vector.shape_cast %312 : vector<2x8xf32> to vector<2x8x1xf32>
    %314 = vector.broadcast %313 : vector<2x8x1xf32> to vector<2x8x8xf32>
    %315 = arith.subf %311, %314 : vector<2x8x8xf32>
    %316 = math.exp %315 : vector<2x8x8xf32>
    %cst_80 = arith.constant dense<0.000000e+00> : vector<2x8xf32>
    %317 = vector.multi_reduction <add>, %316, %cst_80 [2] : vector<2x8x8xf32> to vector<2x8xf32>
    %318 = vector.shape_cast %317 : vector<2x8xf32> to vector<2x8x1xf32>
    %319 = tpu.reciprocal %318 {approx = true} : vector<2x8x1xf32> -> vector<2x8x1xf32>
    %320 = vector.broadcast %319 : vector<2x8x1xf32> to vector<2x8x8xf32>
    %321 = arith.mulf %316, %320 : vector<2x8x8xf32>
    %322 = arith.truncf %321 : vector<2x8x8xf32> to vector<2x8x8xbf16>
    "tpu.trace_start"() <{level = 10 : i32, message = "bqk,bkd->bqd"}> : () -> ()
    %cst_81 = arith.constant dense<0.000000e+00> : vector<2x8x32xf32>
    %323 = tpu.matmul %322, %310, %cst_81 {dimension_numbers = #tpu.dot_dimension_numbers<[2], [1], [1], [2], [0, 0, 0, 1, 1, 2], [0], [0]>} : vector<2x8x8xbf16>, vector<2x8x32xbf16>, vector<2x8x32xf32> -> vector<2x8x32xf32>
    "tpu.trace_stop"() : () -> ()
    %324 = tpu.concatenate %266, %285, %304, %323 in 2 : vector<2x8x32xf32>, vector<2x8x32xf32>, vector<2x8x32xf32>, vector<2x8x32xf32> -> vector<2x8x128xf32>
    %325 = vector.shape_cast %324 : vector<2x8x128xf32> to vector<16x128xf32>
    %326 = arith.truncf %325 : vector<16x128xf32> to vector<16x128xbf16>
    %c1_82 = arith.constant 1 : index
    %c0_83 = arith.constant 0 : index
    %c384_84 = arith.constant 384 : index
    %327 = vector.load %arg3[%c1_82, %c0_83, %c384_84] : memref<2x128x640xbf16, #tpu.memory_space<vmem>>, vector<1x128x128xbf16>
    %328 = vector.shape_cast %327 : vector<1x128x128xbf16> to vector<128x128xbf16>
    %cst_85 = arith.constant dense<0.000000e+00> : vector<16x128xf32>
    %329 = tpu.matmul %326, %328, %cst_85 {dimension_numbers = #tpu.dot_dimension_numbers<[1], [0], [0], [1], [0, 0, 1, 1], [], []>} : vector<16x128xbf16>, vector<128x128xbf16>, vector<16x128xf32> -> vector<16x128xf32>
    %330 = vector.extract_strided_slice %228 {offsets = [3, 0], sizes = [1, 128], strides = [1, 1]} : vector<10x128xf32> to vector<1x128xf32>
    %331 = vector.broadcast %330 : vector<1x128xf32> to vector<16x128xf32>
    %332 = arith.addf %329, %331 : vector<16x128xf32>
    %333 = arith.addf %226, %332 : vector<16x128xf32>
    %334 = vector.extract_strided_slice %228 {offsets = [4, 0], sizes = [1, 128], strides = [1, 1]} : vector<10x128xf32> to vector<1x128xf32>
    %335 = vector.extract_strided_slice %228 {offsets = [5, 0], sizes = [1, 128], strides = [1, 1]} : vector<10x128xf32> to vector<1x128xf32>
    %cst_86 = arith.constant dense<0.000000e+00> : vector<16xf32>
    %336 = vector.multi_reduction <add>, %333, %cst_86 [1] : vector<16x128xf32> to vector<16xf32>
    %337 = vector.shape_cast %336 : vector<16xf32> to vector<16x1xf32>
    %cst_87 = arith.constant 3.125000e-02 : f32
    %338 = vector.broadcast %cst_87 : f32 to vector<16x1xf32>
    %339 = arith.mulf %337, %338 : vector<16x1xf32>
    %340 = vector.broadcast %339 : vector<16x1xf32> to vector<16x128xf32>
    %341 = arith.subf %333, %340 : vector<16x128xf32>
    %342 = vector.broadcast %4 : vector<1x128xf32> to vector<16x128xf32>
    %343 = arith.mulf %341, %342 : vector<16x128xf32>
    %344 = arith.mulf %343, %343 : vector<16x128xf32>
    %cst_88 = arith.constant dense<0.000000e+00> : vector<16xf32>
    %345 = vector.multi_reduction <add>, %344, %cst_88 [1] : vector<16x128xf32> to vector<16xf32>
    %346 = vector.shape_cast %345 : vector<16xf32> to vector<16x1xf32>
    %cst_89 = arith.constant 3.125000e-02 : f32
    %347 = vector.broadcast %cst_89 : f32 to vector<16x1xf32>
    %348 = arith.mulf %346, %347 : vector<16x1xf32>
    %cst_90 = arith.constant 9.99999996E-13 : f32
    %349 = vector.broadcast %cst_90 : f32 to vector<16x1xf32>
    %350 = arith.addf %348, %349 : vector<16x1xf32>
    %351 = math.rsqrt %350 : vector<16x1xf32>
    %352 = vector.broadcast %351 : vector<16x1xf32> to vector<16x128xf32>
    %353 = arith.mulf %343, %352 : vector<16x128xf32>
    %354 = vector.broadcast %334 : vector<1x128xf32> to vector<16x128xf32>
    %355 = arith.mulf %353, %354 : vector<16x128xf32>
    %356 = vector.broadcast %335 : vector<1x128xf32> to vector<16x128xf32>
    %357 = arith.addf %355, %356 : vector<16x128xf32>
    %358 = arith.truncf %357 : vector<16x128xf32> to vector<16x128xbf16>
    %c1_91 = arith.constant 1 : index
    %c0_92 = arith.constant 0 : index
    %c512_93 = arith.constant 512 : index
    %359 = vector.load %arg3[%c1_91, %c0_92, %c512_93] : memref<2x128x640xbf16, #tpu.memory_space<vmem>>, vector<1x128x128xbf16>
    %360 = vector.shape_cast %359 : vector<1x128x128xbf16> to vector<128x128xbf16>
    %cst_94 = arith.constant dense<0.000000e+00> : vector<16x128xf32>
    %361 = tpu.matmul %358, %360, %cst_94 {dimension_numbers = #tpu.dot_dimension_numbers<[1], [0], [0], [1], [0, 0, 1, 1], [], []>} : vector<16x128xbf16>, vector<128x128xbf16>, vector<16x128xf32> -> vector<16x128xf32>
    %362 = vector.extract_strided_slice %228 {offsets = [6, 0], sizes = [1, 128], strides = [1, 1]} : vector<10x128xf32> to vector<1x128xf32>
    %363 = vector.broadcast %362 : vector<1x128xf32> to vector<16x128xf32>
    %364 = arith.addf %361, %363 : vector<16x128xf32>
    %365 = arith.mulf %364, %364 : vector<16x128xf32>
    %366 = arith.mulf %364, %365 : vector<16x128xf32>
    %cst_95 = arith.constant 4.471500e-02 : f32
    %367 = vector.broadcast %cst_95 : f32 to vector<16x128xf32>
    %368 = arith.mulf %367, %366 : vector<16x128xf32>
    %369 = arith.addf %364, %368 : vector<16x128xf32>
    %cst_96 = arith.constant 0.797884583 : f32
    %370 = vector.broadcast %cst_96 : f32 to vector<16x128xf32>
    %371 = arith.mulf %370, %369 : vector<16x128xf32>
    %372 = math.tanh %371 : vector<16x128xf32>
    %cst_97 = arith.constant 1.000000e+00 : f32
    %373 = vector.broadcast %cst_97 : f32 to vector<16x128xf32>
    %374 = arith.addf %373, %372 : vector<16x128xf32>
    %cst_98 = arith.constant 5.000000e-01 : f32
    %375 = vector.broadcast %cst_98 : f32 to vector<16x128xf32>
    %376 = arith.mulf %375, %374 : vector<16x128xf32>
    %377 = arith.mulf %364, %376 : vector<16x128xf32>
    %378 = arith.truncf %377 : vector<16x128xf32> to vector<16x128xbf16>
    %c1_99 = arith.constant 1 : index
    %c0_100 = arith.constant 0 : index
    %c0_101 = arith.constant 0 : index
    %379 = vector.load %arg4[%c1_99, %c0_100, %c0_101] : memref<2x128x128xbf16, #tpu.memory_space<vmem>>, vector<1x128x128xbf16>
    %380 = vector.shape_cast %379 : vector<1x128x128xbf16> to vector<128x128xbf16>
    %cst_102 = arith.constant dense<0.000000e+00> : vector<16x128xf32>
    %381 = tpu.matmul %378, %380, %cst_102 {dimension_numbers = #tpu.dot_dimension_numbers<[1], [0], [0], [1], [0, 0, 1, 1], [], []>} : vector<16x128xbf16>, vector<128x128xbf16>, vector<16x128xf32> -> vector<16x128xf32>
    %382 = vector.extract_strided_slice %228 {offsets = [7, 0], sizes = [1, 128], strides = [1, 1]} : vector<10x128xf32> to vector<1x128xf32>
    %383 = vector.broadcast %382 : vector<1x128xf32> to vector<16x128xf32>
    %384 = arith.addf %381, %383 : vector<16x128xf32>
    %385 = arith.addf %357, %384 : vector<16x128xf32>
    %386 = vector.extract_strided_slice %228 {offsets = [8, 0], sizes = [1, 128], strides = [1, 1]} : vector<10x128xf32> to vector<1x128xf32>
    %387 = vector.extract_strided_slice %228 {offsets = [9, 0], sizes = [1, 128], strides = [1, 1]} : vector<10x128xf32> to vector<1x128xf32>
    %cst_103 = arith.constant dense<0.000000e+00> : vector<16xf32>
    %388 = vector.multi_reduction <add>, %385, %cst_103 [1] : vector<16x128xf32> to vector<16xf32>
    %389 = vector.shape_cast %388 : vector<16xf32> to vector<16x1xf32>
    %cst_104 = arith.constant 3.125000e-02 : f32
    %390 = vector.broadcast %cst_104 : f32 to vector<16x1xf32>
    %391 = arith.mulf %389, %390 : vector<16x1xf32>
    %392 = vector.broadcast %391 : vector<16x1xf32> to vector<16x128xf32>
    %393 = arith.subf %385, %392 : vector<16x128xf32>
    %394 = vector.broadcast %4 : vector<1x128xf32> to vector<16x128xf32>
    %395 = arith.mulf %393, %394 : vector<16x128xf32>
    %396 = arith.mulf %395, %395 : vector<16x128xf32>
    %cst_105 = arith.constant dense<0.000000e+00> : vector<16xf32>
    %397 = vector.multi_reduction <add>, %396, %cst_105 [1] : vector<16x128xf32> to vector<16xf32>
    %398 = vector.shape_cast %397 : vector<16xf32> to vector<16x1xf32>
    %cst_106 = arith.constant 3.125000e-02 : f32
    %399 = vector.broadcast %cst_106 : f32 to vector<16x1xf32>
    %400 = arith.mulf %398, %399 : vector<16x1xf32>
    %cst_107 = arith.constant 9.99999996E-13 : f32
    %401 = vector.broadcast %cst_107 : f32 to vector<16x1xf32>
    %402 = arith.addf %400, %401 : vector<16x1xf32>
    %403 = math.rsqrt %402 : vector<16x1xf32>
    %404 = vector.broadcast %403 : vector<16x1xf32> to vector<16x128xf32>
    %405 = arith.mulf %395, %404 : vector<16x128xf32>
    %406 = vector.broadcast %386 : vector<1x128xf32> to vector<16x128xf32>
    %407 = arith.mulf %405, %406 : vector<16x128xf32>
    %408 = vector.broadcast %387 : vector<1x128xf32> to vector<16x128xf32>
    %409 = arith.addf %407, %408 : vector<16x128xf32>
    %410 = vector.extract_strided_slice %409 {offsets = [0, 0], sizes = [1, 128], strides = [1, 1]} : vector<16x128xf32> to vector<1x128xf32>
    %c0_108 = arith.constant 0 : index
    %c0_109 = arith.constant 0 : index
    %411 = vector.load %arg6[%c0_108, %c0_109] : memref<2x128xf32, #tpu.memory_space<vmem>>, vector<1x128xf32>
    tpu.vector_store %arg6[%c0_108, %c0_109], %410 {strides = array<i32>} : memref<2x128xf32, #tpu.memory_space<vmem>>, vector<1x128xf32>,
    %412 = vector.extract_strided_slice %409 {offsets = [8, 0], sizes = [1, 128], strides = [1, 1]} : vector<16x128xf32> to vector<1x128xf32>
    %c1_110 = arith.constant 1 : index
    %c0_111 = arith.constant 0 : index
    %413 = vector.load %arg6[%c1_110, %c0_111] : memref<2x128xf32, #tpu.memory_space<vmem>>, vector<1x128xf32>
    tpu.vector_store %arg6[%c1_110, %c0_111], %412 {strides = array<i32>} : memref<2x128xf32, #tpu.memory_space<vmem>>, vector<1x128xf32>,
    return
  }
}

</mosaic_0001>

<bundles_post_ra>
// kernel: embedder_forward.1
= control target key start
LH: loop header
LB: loop body
LE: loop exit
PB: predicated region body
PF: predicated region fallthrough
CT: control target
= control target key end

     0   :  { %11 = vsyncpa [#allocation3], 0  ;;  %s5143_s0 = inlined_call_operand.vmem [shape: s32[16,1], index: 0, kind: input, shape index: {}]   ;;  %s5144_s1 = inlined_call_operand.vmem [shape: bf16[128,128], index: 1, kind: input, shape index: {}]   ;;  %s5145_s2 = inlined_call_operand.vmem [shape: f32[11,128], index: 2, kind: input, shape index: {}]   ;;  %s5146_s3 = inlined_call_operand.hbm [shape: bf16[2,128,640], index: 3, kind: input, shape index: {}]   ;;  %s5147_s4 = inlined_call_operand.hbm [shape: bf16[2,128,128], index: 4, kind: input, shape index: {}]   ;;  %s5148_s5 = inlined_call_operand.vmem [shape: f32[2,10,128], index: 5, kind: input, shape index: {}]   ;;  %s5149_s6 = inlined_call_operand.hbm [shape: f32[2,128], index: 6, kind: output, shape index: {}]  }
   0x1   :  { %12 = vsyncpa [#allocation6], 0 }
   0x2   :  { %13 = vsyncpa [#allocation4], 0  ;;  %s4439_s21 = smov [#allocation2]   ;;  %s4367_s25 = scalar_lea.hbm %s5146_s3, 10240 }
   0x3   :  { %s25_s22 = sshll.u32 %s4439_s21, 4  ;;  %p4368_p0 = scmp.ne.s32.totalorder %s5146_s3, %s4367_s25  ;;  %s26_s22 = int_to_ptr.vmem [resolvable:$true] %s25_s22 }
   0x4   :  { %p4371_p1 = scmp.lt.u32.totalorder %s4367_s25, %s5146_s3 }
   0x6   :  { %p4373_p2 = pnand %p4371_p1, %p4368_p0 }
   0x8   :  { %4376 = shalt.err (!%p4373_p2)
}
   0x9   :  { %s4377_s30 = scalar_lea.vmem %s26_s22, 10240  ;;  %p4382_p4 = scmp.lt.s32.totalorder %s26_s22, %s26_s22 }
   0xa   :  { %p4378_p3 = scmp.ne.s32.totalorder %s26_s22, %s4377_s30  ;;  %p4383_p5 = scmp.lt.s32.totalorder %s4377_s30, %s4377_s30 }
   0xc   :  { %p4384_p6 = por %p4383_p5, %p4382_p4 }
   0xe   :  { %p4385_p7 = pnand %p4384_p6, %p4378_p3 }
  0x10   :  { %4388 = shalt.err (!%p4385_p7)
}
  0x11   :  { %s4440_s7 = smov 320   ;;  %s4441_s8 = smov 20  }
  0x12   :  { %31 = dma.hbm_to_vmem [thread:$0]  %s5146_s3, 10240, %s26_s22, [#allocation3], %s4440_s7, %s4440_s7, %s4441_s8  }
  0x13   :  { %s4442_s11 = smov [#allocation5]   ;;  %s4389_s15 = scalar_lea.hbm %s5147_s4, 2048 }
  0x14   :  { %s37_s12 = sshll.u32 %s4442_s11, 4  ;;  %p4390_p8 = scmp.ne.s32.totalorder %s5147_s4, %s4389_s15  ;;  %s38_s12 = int_to_ptr.vmem [resolvable:$true] %s37_s12 }
  0x15   :  { %p4393_p9 = scmp.lt.u32.totalorder %s4389_s15, %s5147_s4 }
  0x17   :  { %p4395_p10 = pnand %p4393_p9, %p4390_p8 }
  0x19   :  { %4398 = shalt.err (!%p4395_p10)
}
  0x1a   :  { %s4399_s20 = scalar_lea.vmem %s38_s12, 2048  ;;  %p4404_p12 = scmp.lt.s32.totalorder %s38_s12, %s38_s12 }
  0x1b   :  { %p4400_p11 = scmp.ne.s32.totalorder %s38_s12, %s4399_s20  ;;  %p4405_p13 = scmp.lt.s32.totalorder %s4399_s20, %s4399_s20 }
  0x1d   :  { %p4406_p0 = por %p4405_p13, %p4404_p12 }
  0x1f   :  { %p4407_p1 = pnand %p4406_p0, %p4400_p11 }
  0x21   :  { %4410 = shalt.err (!%p4407_p1)
}
  0x22   :  { %s4443_s3 = smov 64   ;;  %s4444_s21 = smov 4  }
  0x23   :  { %43 = dma.hbm_to_vmem [thread:$0]  %s5147_s4, 2048, %s38_s12, [#allocation6], %s4443_s3, %s4443_s3, %s4444_s21  }
  0x24   :  { %4433 = dma.done.wait [#allocation3], 10240  }
  0x25   :  { %4434 = vsyncadd [#allocation3], 4294957056 }
  0x26   :  { %4435 = dma.done.wait [#allocation6], 2048  }
  0x27   :  { %4436 = vsyncadd [#allocation6], 4294965248  ;;  %v4445_v0 = vmov 0   ;;  %v4446_v1 = vmov 0.0   ;;  %v58_v2 = vld [vmem:[%s5143_s0] sm:$0xff]  ;;  %v59_v4 = vld [vmem:[%s5143_s0 + $0x8] sm:$0xff]  ;;  %v53_v12 = vlaneseq }
  0x28   :  { %4124 = vset.pattern.permute.xlu0 %v4445_v0  ;;  %3739 = vmatprep.subr.bf16.mxu0 %v4446_v1  ;;  %v4155_v3 = vld [vmem:[%s5144_s1] sm:$0xff]   ;;  %v4156_v5 = vld [vmem:[%s5144_s1 + $0x8] sm:$0xff]   ;;  %vm4447_vm0 = vmmov 0   ;;  %v4157_v6 = vld [vmem:[%s5144_s1 + $0x10] sm:$0xff]   ;;  %v4448_v16 = vmov 1.0|1.0  }
  0x29   :  { %419 = vmatprep.mubr.bf16.mxu1 %v4445_v0  ;;  %61 = vperm.xlu0 %4124, %v58_v2   ;;  %v4158_v7 = vld [vmem:[%s5144_s1 + $0x18] sm:$0xff]   ;;  %v4159_v8 = vld [vmem:[%s5144_s1 + $0x20] sm:$0xff]   ;;  %v4160_v9 = vld [vmem:[%s5144_s1 + $0x28] sm:$0xff]   ;;  %v54_v14 = vand.u32 127, %v53_v12  ;;  %vm495_vm5 = vcmask 261120   ;;  %s4449_s26 = smov 96  }
  0x2a   :  { %3740 = vmatpush3.bf16.msra.mxu0 %v4155_v3  ;;  %3755 = vmatprep.mubr.msk.bf16.mxu0 %vm4447_vm0, %v4446_v1  ;;  %v4161_v10 = vld [vmem:[%s5144_s1 + $0x30] sm:$0xff]   ;;  %v4162_v11 = vld [vmem:[%s5144_s1 + $0x38] sm:$0xff]   ;;  %v89_v17 = vld [vmem:[%s5145_s2] sm:$0xff]  ;;  %vm616_vm6 = vcmask 1043456   ;;  %vm588_vm7 = vcmask 64512   ;;  %s4450_s27 = smov 32  }
  0x2b   :  { %3741 = vmatprep.subr.bf16.mxu0 %v4446_v1  ;;  %v3461_v19 = vld [vmem:[%s5145_s2 + $0x8] ss:$0 sm:$0xff]  ;;  %v4163_v27 = vld [vmem:[#allocation2 + $0x4] ss:$20 sps:$4 sm:$0xff]   ;;  %v4165_v28 = vld [vmem:[#allocation2] ss:$20 sps:$4 sm:$0xff]  }
  0x2c   :  { %v4166_v29 = vld [vmem:[#allocation2 + $0x8] ss:$20 sps:$4 sm:$0xff]   ;;  %v4167_v30 = vld [vmem:[#allocation2 + $0x2c] ss:$20 sps:$4 sm:$0xff]   ;;  %387 = vmatprep.subr.bf16.mxu1 %v4163_v27  ;;  %vm55_vm4 = vcmp.lt.s32.totalorder %v54_v14, 32  ;;  %vm1398_vm8 = vcmask 523264  }
  0x2d   :  { %64 = vperm.xlu0 %4124, %v59_v4   ;;  %388 = vmatpush1.bf16.msra.mxu1 %v4165_v28  ;;  %v4567_v33 = vsel %vm55_vm4, 1.0, %v4446_v1  ;;  %v4169_v42 = vld [vmem:[#allocation2 + $0x28] ss:$20 sps:$4 sm:$0xff]   ;;  %v4170_v43 = vld [vmem:[#allocation2 + $0x30] ss:$20 sps:$4 sm:$0xff]   ;;  %vm1401_vm9 = vcmask 785408  }
  0x2e   :  { %3742 = vmatpush3.bf16.msra.mxu0 %v4156_v5  ;;  %389 = vmatprep.subr.bf16.mxu1 %v4167_v30  ;;  %v4171_v44 = vld [vmem:[#allocation2 + $0x54] ss:$20 sps:$4 sm:$0xff]   ;;  %v4173_v45 = vld [vmem:[#allocation2 + $0x50] ss:$20 sps:$4 sm:$0xff]   ;;  %v4174_v46 = vld [vmem:[#allocation2 + $0x58] ss:$20 sps:$4 sm:$0xff]  }
  0x2f   :  { %3743 = vmatprep.subr.bf16.mxu0 %v4446_v1  ;;  %v4175_v47 = vld [vmem:[#allocation2 + $0x7c] ss:$20 sps:$4 sm:$0xff]   ;;  %v4177_v48 = vld [vmem:[#allocation2 + $0x78] ss:$20 sps:$4 sm:$0xff]   ;;  %v4178_v49 = vld [vmem:[#allocation2 + $0x80] ss:$20 sps:$4 sm:$0xff]  }
  0x30   :  { %v4179_v50 = vld [vmem:[#allocation2 + $0xa4] ss:$20 sps:$4 sm:$0xff]   ;;  %v4181_v51 = vld [vmem:[#allocation2 + $0xa0] ss:$20 sps:$4 sm:$0xff]   ;;  %v4182_v52 = vld [vmem:[#allocation2 + $0xa8] ss:$20 sps:$4 sm:$0xff]  }
  0x31   :  { %390 = vmatpush1.bf16.msra.mxu1 %v4169_v42  ;;  %v4183_v53 = vld [vmem:[#allocation2 + $0xcc] ss:$20 sps:$4 sm:$0xff]   ;;  %v4185_v54 = vld [vmem:[#allocation2 + $0xc8] ss:$20 sps:$4 sm:$0xff]   ;;  %v4186_v55 = vld [vmem:[#allocation2 + $0xd0] ss:$20 sps:$4 sm:$0xff]  }
  0x32   :  { %3744 = vmatpush3.bf16.msra.mxu0 %v4157_v6  ;;  %391 = vmatprep.subr.bf16.mxu1 %v4171_v44  ;;  %v4187_v56 = vld [vmem:[#allocation2 + $0xf4] ss:$20 sps:$4 sm:$0xff]   ;;  %v4189_v57 = vld [vmem:[#allocation2 + $0xf0] ss:$20 sps:$4 sm:$0xff]   ;;  %v4190_v58 = vld [vmem:[#allocation2 + $0xf8] ss:$20 sps:$4 sm:$0xff]  }
  0x33   :  { %3745 = vmatprep.subr.bf16.mxu0 %v4446_v1  ;;  %v4191_v59 = vld [vmem:[#allocation2 + $0x11c] ss:$20 sps:$4 sm:$0xff]   ;;  %v4193_v60 = vld [vmem:[#allocation2 + $0x118] ss:$20 sps:$4 sm:$0xff]   ;;  %v4194_v61 = vld [vmem:[#allocation2 + $0x120] ss:$20 sps:$4 sm:$0xff]  }
  0x34   :  { %s4451_s8 = smov [#allocation7]  }
  0x35   :  { %392 = vmatpush1.bf16.msra.mxu1 %v4173_v45  ;;  %s3438_s0 = sshll.u32 %s4451_s8, 4  ;;  %s3439_s0 = int_to_ptr.vmem [resolvable:$true] %s3438_s0 }
  0x36   :  { %3746 = vmatpush3.bf16.msra.mxu0 %v4158_v7  ;;  %393 = vmatprep.subr.bf16.mxu1 %v4175_v47  ;;  %s4411_s9 = scalar_lea.vmem %s3439_s0, 32  ;;  %p4416_p3 = scmp.lt.s32.totalorder %s3439_s0, %s3439_s0 }
  0x37   :  { %3747 = vmatprep.subr.bf16.mxu0 %v4446_v1  ;;  %p4412_p2 = scmp.ne.s32.totalorder %s3439_s0, %s4411_s9  ;;  %p4417_p4 = scmp.lt.s32.totalorder %s4411_s9, %s4411_s9 }
  0x39   :  { %394 = vmatpush1.bf16.msra.mxu1 %v4177_v48  ;;  %p4418_p5 = por %p4417_p4, %p4416_p3 }
  0x3a   :  { %3748 = vmatpush3.bf16.msra.mxu0 %v4159_v8  ;;  %395 = vmatprep.subr.bf16.mxu1 %v4179_v50  ;;  %v3462_v8 = vld [vmem:[%s5145_s2 + $0x9] ss:$0 sm:$0xff] }
  0x3b   :  { %3749 = vmatprep.subr.bf16.mxu0 %v4446_v1  ;;  %p4419_p6 = pnand %p4418_p5, %p4412_p2 }
  0x3d   :  { %396 = vmatpush1.bf16.msra.mxu1 %v4181_v51 }
  0x3e   :  { %3750 = vmatpush3.bf16.msra.mxu0 %v4160_v9  ;;  %397 = vmatprep.subr.bf16.mxu1 %v4183_v53 }
  0x3f   :  { %3751 = vmatprep.subr.bf16.mxu0 %v4446_v1 }
  0x41   :  { %398 = vmatpush1.bf16.msra.mxu1 %v4185_v54 }
  0x42   :  { %3752 = vmatpush3.bf16.msra.mxu0 %v4161_v10  ;;  %399 = vmatprep.subr.bf16.mxu1 %v4187_v56 }
  0x43   :  { %3753 = vmatprep.subr.bf16.mxu0 %v4446_v1 }
  0x45   :  { %400 = vmatpush1.bf16.msra.mxu1 %v4189_v57 }
  0x46   :  { %3754 = vmatpush3.bf16.msra.mxu0 %v4162_v11  ;;  %401 = vmatprep.subr.bf16.mxu1 %v4191_v59 }
  0x47   :  { %3759 = vmatprep.subr.bf16.mxu0 %v4446_v1 }
  0x49   :  { %402 = vmatpush1.bf16.msra.mxu1 %v4193_v60 }
  0x4a   :  { %3779 = vmatprep.subr.bf16.mxu1 %v4446_v1 }
  0xa8   :  { %v62_v13 = vpop.permute.xlu0 %61 }
  0xa9   :  { %vm66_vm1 = vcmp.eq.s32.totalorder %v62_v13, %v54_v14  ;;  %v3463_v13 = vld [vmem:[%s5145_s2 + $0xa] ss:$0 sm:$0xff] }
  0xac   :  { %v65_v15 = vpop.permute.xlu0 %64 }
  0xad   :  { %vm67_vm2 = vcmp.eq.s32.totalorder %v65_v15, %v54_v14 }
  0xae   :  { %vm3459_vm3 = vmpackc.low %vm67_vm2, %vm66_vm1 }
  0xaf   :  { %3756 = vmatmul.mubr.msk.bf16.vlgmr.msra.gmra.mrb[0].mxu0 %vm3459_vm3, %v4448_v16 }
  0xb0   :  { %3775 = vmatprep.mubr.msk.bf16.mxu0 %vm4447_vm0, %v4446_v1  ;;  %3760 = vmatpush3.bf16.msra.mxu0 %v4166_v29 }
  0xb1   :  { %3761 = vmatprep.subr.bf16.mxu0 %v4446_v1 }
  0xb4   :  { %3762 = vmatpush3.bf16.msra.mxu0 %v4170_v43 }
  0xb5   :  { %3763 = vmatprep.subr.bf16.mxu0 %v4446_v1 }
  0xb8   :  { %3764 = vmatpush3.bf16.msra.mxu0 %v4174_v46 }
  0xb9   :  { %3765 = vmatprep.subr.bf16.mxu0 %v4446_v1 }
  0xbc   :  { %3766 = vmatpush3.bf16.msra.mxu0 %v4178_v49 }
  0xbd   :  { %3767 = vmatprep.subr.bf16.mxu0 %v4446_v1 }
  0xc0   :  { %3768 = vmatpush3.bf16.msra.mxu0 %v4182_v52 }
  0xc1   :  { %3769 = vmatprep.subr.bf16.mxu0 %v4446_v1 }
  0xc4   :  { %3770 = vmatpush3.bf16.msra.mxu0 %v4186_v55 }
  0xc5   :  { %3771 = vmatprep.subr.bf16.mxu0 %v4446_v1 }
  0xc8   :  { %3772 = vmatpush3.bf16.msra.mxu0 %v4190_v58 }
  0xc9   :  { %3773 = vmatprep.subr.bf16.mxu0 %v4446_v1 }
  0xcc   :  { %3774 = vmatpush3.bf16.msra.mxu0 %v4194_v61 }
  0xcd   :  { %3827 = vmatprep.subr.bf16.mxu0 %v4446_v1 }
 0x182   :  { %v175_v18 = vpop.f32.mrb[0].mxu0 }
 0x183   :  { %v176_v20 = vadd.f32 %v175_v18, %v89_v17  ;;  %v3757_v21 = vpop.f32.mrb[1].mxu0  ;;  %v4606_v18 = vshrl.u32 %v53_v12, 7 }
 0x184   :  { %v178_v22 = vpop.f32.mrb[2].mxu0 }
 0x185   :  { %v179_v23 = vadd.f32 %v178_v22, %v89_v17  ;;  %v3758_v24 = vpop.f32.mrb[3].mxu0  ;;  %v186_v25 = vadd.f32 %v3461_v19, %v176_v20  ;;  %v4614_v20 = vld [vmem:[%s5148_s5] sm:$0xff]  ;;  %v4617_v21 = vsub.s32 1, %v4606_v18 }
 0x187   :  { %188 = vadd.xlane.f32.xlu1 %v186_v25  ;;  %v187_v26 = vadd.f32 %v3461_v19, %v179_v23  ;;  %v4609_v19 = vsub.s32 0, %v4606_v18  ;;  %v485_v23 = vsub.s32 2, %v4606_v18  ;;  %v480_v12 = vrot.slane %v4614_v20, %v4617_v21 }
 0x189   :  { %v474_v22 = vrot.slane %v4614_v20, %v4609_v19  ;;  %v486_v27 = vrot.slane %v4614_v20, %v485_v23 }
 0x18b   :  { %190 = vadd.xlane.f32.xlu1 %v187_v26 }
 0x214   :  { %v189_v31 = vpop.xlane.xlu1 %188 }
 0x215   :  { %v192_v32 = vmul.f32 0.03125, %v189_v31 }
 0x217   :  { %v194_v34 = vsub.f32 %v186_v25, %v192_v32 }
 0x218   :  { %v191_v35 = vpop.xlane.xlu1 %190 }
 0x219   :  { %v193_v36 = vmul.f32 0.03125, %v191_v35  ;;  %v4570_v37 = vmul.f32 %v4567_v33, %v194_v34 }
 0x21b   :  { %v195_v38 = vsub.f32 %v187_v26, %v193_v36  ;;  %v198_v39 = vmul.f32 %v4570_v37, %v4570_v37 }
 0x21d   :  { %200 = vadd.xlane.f32.xlu0 %v198_v39  ;;  %v4575_v40 = vmul.f32 %v4567_v33, %v195_v38 }
 0x21f   :  { %v199_v41 = vmul.f32 %v4575_v40, %v4575_v40 }
 0x221   :  { %202 = vadd.xlane.f32.xlu1 %v199_v41 }
 0x2aa   :  { %v201_v62 = vpop.xlane.xlu0 %200 }
 0x2ab   :  { %v204_v63 = vmul.f32 0.03125, %v201_v62 }
 0x2ad   :  { %v206_v2 = vadd.f32 1e-12, %v204_v63 }
 0x2ae   :  { %v203_v3 = vpop.xlane.xlu1 %202 }
 0x2af   :  { %4275 = vrsqrt.f32 %v206_v2  ;;  %v205_v4 = vmul.f32 0.03125, %v203_v3 }
 0x2b1   :  { %v207_v5 = vadd.f32 1e-12, %v205_v4 }
 0x2b3   :  { %4277 = vrsqrt.f32 %v207_v5 }
 0x2b9   :  { %v4276_v6 = vpop.eup %4275 }
 0x2ba   :  { %v210_v7 = vmul.f32 %v4276_v6, %v4570_v37 }
 0x2bc   :  { %v216_v11 = vmul.f32 %v3462_v8, %v210_v7 }
 0x2bd   :  { %v4278_v9 = vpop.eup %4277 }
 0x2be   :  { %v211_v10 = vmul.f32 %v4278_v9, %v4575_v40  ;;  %v4595_v15 = vadd.f32 %v3463_v13, %v216_v11 }
 0x2c0   :  { %v217_v14 = vmul.f32 %v3462_v8, %v211_v10 }
 0x2c2   :  { %v4597_v16 = vadd.f32 %v3463_v13, %v217_v14 }
 0x2c4   :  { %v226_v17 = vpack.c.bf16 %v4597_v16, %v4595_v15 }
 0x2c6   :  { %420 = vmatmul.mubr.bf16.vlgmr.msra.gmra.mrb[0].mxu1 %v226_v17  ;;  %3776 = vmatmul.mubr.bf16.vlgmr.msra.gmra.mrb[4].mxu0 %v226_v17 }
 0x2c7   :  { %3781 = vmatprep.mubr.msk.bf16.mxu1 %vm4447_vm0, %v4446_v1  ;;  %3829 = vmatprep.mubr.msk.bf16.mxu0 %vm4447_vm0, %v4446_v1 }
 0x399   :  { %v421_v24 = vpop.f32.mrb[0].mxu1  ;;  %v464_v25 = vpop.f32.mrb[4].mxu0 }
 0x39a   :  { %v475_v26 = vadd.f32 %v474_v22, %v421_v24  ;;  %v423_v28 = vpop.f32.mrb[1].mxu1  ;;  %v3777_v29 = vpop.f32.mrb[5].mxu0  ;;  %v487_v42 = vadd.f32 %v486_v27, %v464_v25 }
 0x39b   :  { %v481_v30 = vadd.f32 %v480_v12, %v423_v28  ;;  %v425_v31 = vpop.f32.mrb[2].mxu1  ;;  %v467_v32 = vpop.f32.mrb[6].mxu0 }
 0x39c   :  { %v4627_v34 = vpack.c.bf16 %v475_v26, %v475_v26  ;;  %v488_v35 = vadd.f32 %v486_v27, %v467_v32  ;;  %v427_v36 = vpop.f32.mrb[3].mxu1  ;;  %v3778_v37 = vpop.f32.mrb[7].mxu0  ;;  %v476_v44 = vadd.f32 %v474_v22, %v425_v31  ;;  %v4645_v45 = vpack.c.bf16 %v487_v42, %v487_v42 }
 0x39d   :  { %v4629_v38 = vpack.c.bf16 %v481_v30, %v481_v30  ;;  %v482_v39 = vadd.f32 %v480_v12, %v427_v36 }
 0x39e   :  { %707 = vrot.lane.b32.xlu0 %v4627_v34, %s4449_s26  ;;  %v4647_v46 = vpack.c.bf16 %v476_v44, %v476_v44  ;;  %v618_v47 = vsel %vm616_vm6, %v4645_v45, 0  ;;  %v4666_v9 = vpack.c.bf16 %v488_v35, %v488_v35 }
 0x39f   :  { %v500_v40 = vsel %vm495_vm5, %v4629_v38, 0  ;;  %v4636_v41 = vpack.c.bf16 %v482_v39, %v482_v39 }
 0x3a0   :  { %3780 = vmatpush3.bf16.xpose.msra.mxu1 %v500_v40  ;;  %v664_v13 = vsel %vm616_vm6, %v4666_v9, 0 }
 0x3a1   :  { %3785 = vmatprep.subr.bf16.mxu1 %v4446_v1  ;;  %v546_v43 = vsel %vm495_vm5, %v4636_v41, 0 }
 0x3a7   :  { %3782 = vmatmul.mubr.msk.bf16.vlgmr.msra.gmra.mrb[4].mxu1 %vm495_vm5, %v4627_v34 }
 0x3a8   :  { %3786 = vmatpush3.bf16.xpose.msra.mxu1 %v546_v43  ;;  %3787 = vmatprep.mubr.msk.bf16.mxu1 %vm4447_vm0, %v4446_v1 }
 0x3a9   :  { %3791 = vmatprep.subr.bf16.mxu1 %v4446_v1 }
 0x3af   :  { %3788 = vmatmul.mubr.msk.bf16.vlgmr.msra.gmra.mrb[8].mxu1 %vm495_vm5, %v4647_v46 }
 0x3b0   :  { %3792 = vmatpush3.bf16.msra.mxu1 %v618_v47  ;;  %3793 = vmatprep.mubr.msk.bf16.mxu1 %vm4447_vm0, %v4446_v1 }
 0x3b1   :  { %3797 = vmatprep.subr.bf16.mxu1 %v4446_v1 }
 0x410   :  { %v708_v26 = vpop.permute.xlu0 %707 }
 0x47a   :  { %v536_v48 = vpop.f32.mrb[4].mxu1 }
 0x47b   :  { %v3783_v49 = vpop.f32.mrb[5].mxu1  ;;  %v589_v50 = vsel %vm588_vm7, %v536_v48, -inf }
 0x47c   :  { %590 = vmax.xlane.f32.xlu1 %v589_v50  ;;  %v539_v51 = vpop.f32.mrb[6].mxu1 }
 0x47d   :  { %v3784_v52 = vpop.f32.mrb[7].mxu1 }
 0x482   :  { %v582_v53 = vpop.f32.mrb[8].mxu1 }
 0x483   :  { %v3789_v54 = vpop.f32.mrb[9].mxu1  ;;  %v592_v55 = vsel %vm588_vm7, %v582_v53, -inf }
 0x484   :  { %593 = vmax.xlane.f32.xlu1 %v592_v55  ;;  %v585_v56 = vpop.f32.mrb[10].mxu1 }
 0x485   :  { %v3790_v57 = vpop.f32.mrb[11].mxu1 }
 0x509   :  { %v591_v58 = vpop.xlane.xlu1 %590 }
 0x50a   :  { %v595_v59 = vsub.f32 %v536_v48, %v591_v58 }
 0x50c   :  { %v597_v60 = vmul.f32 1.442695, %v595_v59 }
 0x50e   :  { %4279 = vpow2.f32 %v597_v60 }
 0x511   :  { %v594_v61 = vpop.xlane.xlu1 %593 }
 0x512   :  { %v596_v62 = vsub.f32 %v582_v53, %v594_v61 }
 0x514   :  { %v599_v63 = vmul.f32 1.442695, %v596_v62 }
 0x516   :  { %4281 = vpow2.f32 %v599_v63 }
 0x518   :  { %v4280_v2 = vpop.eup %4279 }
 0x519   :  { %v601_v3 = vsel %vm588_vm7, %v4280_v2, 0.0 }
 0x51a   :  { %602 = vadd.xlane.f32.xlu1 %v601_v3 }
 0x520   :  { %v4282_v4 = vpop.eup %4281 }
 0x521   :  { %v604_v5 = vsel %vm588_vm7, %v4282_v4, 0.0 }
 0x522   :  { %605 = vadd.xlane.f32.xlu1 %v604_v5 }
 0x533   :  { %710 = vrot.lane.b32.xlu1 %v4629_v38, %s4449_s26 }
 0x537   :  { %762 = vrot.lane.b32.xlu1 %v4636_v41, %s4449_s26 }
 0x53b   :  { %759 = vrot.lane.b32.xlu1 %v4647_v46, %s4449_s26 }
 0x5a7   :  { %v603_v6 = vpop.xlane.xlu1 %602 }
 0x5a8   :  { %4283 = vrcp.f32 %v603_v6 }
 0x5af   :  { %v606_v7 = vpop.xlane.xlu1 %605 }
 0x5b0   :  { %4285 = vrcp.f32 %v606_v7 }
 0x5b2   :  { %v4284_v8 = vpop.eup %4283 }
 0x5b3   :  { %v609_v10 = vmul.f32 %v4284_v8, %v4280_v2  ;;  %v711_v22 = vpop.permute.xlu1 %710 }
 0x5b4   :  { %v716_v24 = vsel %vm495_vm5, %v711_v22, 0 }
 0x5b5   :  { %v611_v11 = vpack.c.bf16 %v609_v10, %v609_v10 }
 0x5b7   :  { %3794 = vmatmul.mubr.msk.bf16.vlgmr.msra.gmra.mrb[12].mxu1 %vm588_vm7, %v611_v11  ;;  %v763_v25 = vpop.permute.xlu1 %762 }
 0x5b8   :  { %3798 = vmatpush3.bf16.msra.mxu1 %v664_v13  ;;  %3799 = vmatprep.mubr.msk.bf16.mxu1 %vm4447_vm0, %v4446_v1  ;;  %v768_v27 = vsel %vm495_vm5, %v763_v25, 0 }
 0x5b9   :  { %3803 = vmatprep.subr.bf16.mxu1 %v4446_v1 }
 0x5ba   :  { %v4286_v14 = vpop.eup %4285 }
 0x5bb   :  { %v610_v17 = vmul.f32 %v4286_v14, %v4282_v4  ;;  %v760_v28 = vpop.permute.xlu1 %759 }
 0x5bd   :  { %v612_v12 = vpack.c.bf16 %v610_v17, %v610_v17 }
 0x5bf   :  { %3800 = vmatmul.mubr.msk.bf16.vlgmr.msra.gmra.mrb[16].mxu1 %vm588_vm7, %v612_v12 }
 0x5c0   :  { %3805 = vmatprep.mubr.msk.bf16.mxu1 %vm4447_vm0, %v4446_v1 }
 0x5c1   :  { %3804 = vmatpush3.bf16.xpose.msra.mxu1 %v716_v24 }
 0x5c2   :  { %3809 = vmatprep.subr.bf16.mxu1 %v4446_v1 }
 0x5c8   :  { %3806 = vmatmul.mubr.msk.bf16.vlgmr.msra.gmra.mrb[20].mxu1 %vm495_vm5, %v708_v26 }
 0x5c9   :  { %3810 = vmatpush3.bf16.xpose.msra.mxu1 %v768_v27  ;;  %3811 = vmatprep.mubr.msk.bf16.mxu1 %vm4447_vm0, %v4446_v1 }
 0x5ca   :  { %3815 = vmatprep.subr.bf16.mxu1 %v4446_v1 }
 0x5d0   :  { %3812 = vmatmul.mubr.msk.bf16.vlgmr.msra.gmra.mrb[24].mxu1 %vm495_vm5, %v760_v28 }
 0x5d1   :  { %3817 = vmatprep.mubr.msk.bf16.mxu1 %vm4447_vm0, %v4446_v1 }
 0x68a   :  { %v4687_v29 = vpop.f32.mrb[12].mxu1 }
 0x68b   :  { %v3795_v30 = vpop.f32.mrb[13].mxu1 }
 0x68c   :  { %v657_v31 = vpop.f32.mrb[14].mxu1 }
 0x68d   :  { %v3796_v32 = vpop.f32.mrb[15].mxu1 }
 0x692   :  { %v4689_v35 = vpop.f32.mrb[16].mxu1 }
 0x693   :  { %v3801_v36 = vpop.f32.mrb[17].mxu1 }
 0x694   :  { %v703_v37 = vpop.f32.mrb[18].mxu1 }
 0x695   :  { %v3802_v39 = vpop.f32.mrb[19].mxu1 }
 0x69b   :  { %v752_v40 = vpop.f32.mrb[20].mxu1 }
 0x69c   :  { %v3807_v42 = vpop.f32.mrb[21].mxu1  ;;  %v810_v43 = vsel %vm588_vm7, %v752_v40, -inf }
 0x69d   :  { %811 = vmax.xlane.f32.xlu1 %v810_v43  ;;  %v755_v44 = vpop.f32.mrb[22].mxu1 }
 0x69e   :  { %v3808_v47 = vpop.f32.mrb[23].mxu1 }
 0x6a3   :  { %v804_v48 = vpop.f32.mrb[24].mxu1 }
 0x6a4   :  { %v3813_v49 = vpop.f32.mrb[25].mxu1  ;;  %v813_v50 = vsel %vm588_vm7, %v804_v48, -inf }
 0x6a5   :  { %814 = vmax.xlane.f32.xlu0 %v813_v50  ;;  %v807_v51 = vpop.f32.mrb[26].mxu1 }
 0x6a6   :  { %v3814_v52 = vpop.f32.mrb[27].mxu1 }
 0x6ae   :  { %835 = vrot.lane.b32.xlu1 %v4645_v45, %s4449_s26 }
 0x72a   :  { %v812_v53 = vpop.xlane.xlu1 %811 }
 0x72b   :  { %v816_v54 = vsub.f32 %v752_v40, %v812_v53 }
 0x72d   :  { %v818_v55 = vmul.f32 1.442695, %v816_v54 }
 0x72e   :  { %v836_v56 = vpop.permute.xlu1 %835 }
 0x72f   :  { %4287 = vpow2.f32 %v818_v55  ;;  %v841_v57 = vsel %vm616_vm6, %v836_v56, 0 }
 0x730   :  { %3816 = vmatpush3.bf16.msra.mxu1 %v841_v57 }
 0x731   :  { %3821 = vmatprep.subr.bf16.mxu1 %v4446_v1 }
 0x732   :  { %v815_v58 = vpop.xlane.xlu0 %814 }
 0x733   :  { %v817_v59 = vsub.f32 %v804_v48, %v815_v58 }
 0x735   :  { %v820_v60 = vmul.f32 1.442695, %v817_v59 }
 0x737   :  { %4289 = vpow2.f32 %v820_v60 }
 0x739   :  { %v4288_v61 = vpop.eup %4287 }
 0x73a   :  { %v822_v62 = vsel %vm588_vm7, %v4288_v61, 0.0 }
 0x73b   :  { %823 = vadd.xlane.f32.xlu1 %v822_v62 }
 0x741   :  { %v4290_v63 = vpop.eup %4289 }
 0x742   :  { %v825_v2 = vsel %vm588_vm7, %v4290_v63, 0.0 }
 0x743   :  { %826 = vadd.xlane.f32.xlu0 %v825_v2 }
 0x74c   :  { %934 = vrot.lane.b32.xlu1 %v4629_v38, %s4443_s3 }
 0x750   :  { %984 = vrot.lane.b32.xlu1 %v4636_v41, %s4443_s3 }
 0x754   :  { %982 = vrot.lane.b32.xlu1 %v4647_v46, %s4443_s3 }
 0x759   :  { %884 = vrot.lane.b32.xlu0 %v4666_v9, %s4449_s26 }
 0x75d   :  { %932 = vrot.lane.b32.xlu0 %v4627_v34, %s4443_s3 }
 0x7c8   :  { %v824_v3 = vpop.xlane.xlu1 %823 }
 0x7c9   :  { %4291 = vrcp.f32 %v824_v3 }
 0x7cc   :  { %v935_v4 = vpop.permute.xlu1 %934 }
 0x7cd   :  { %v940_v5 = vsel %vm495_vm5, %v935_v4, 0 }
 0x7ce   :  { %3828 = vmatpush3.bf16.xpose.msra.mxu0 %v940_v5 }
 0x7cf   :  { %3839 = vmatprep.subr.bf16.mxu0 %v4446_v1 }
 0x7d0   :  { %v827_v6 = vpop.xlane.xlu0 %826  ;;  %v985_v12 = vpop.permute.xlu1 %984 }
 0x7d1   :  { %4293 = vrcp.f32 %v827_v6  ;;  %v990_v25 = vsel %vm495_vm5, %v985_v12, 0 }
 0x7d3   :  { %v4292_v7 = vpop.eup %4291 }
 0x7d4   :  { %v830_v8 = vmul.f32 %v4292_v7, %v4288_v61  ;;  %v885_v10 = vpop.permute.xlu0 %884  ;;  %v983_v26 = vpop.permute.xlu1 %982 }
 0x7d5   :  { %v890_v13 = vsel %vm616_vm6, %v885_v10, 0 }
 0x7d6   :  { %v832_v11 = vpack.c.bf16 %v830_v8, %v830_v8 }
 0x7d8   :  { %3818 = vmatmul.mubr.msk.bf16.vlgmr.msra.gmra.mrb[28].mxu1 %vm588_vm7, %v832_v11  ;;  %v933_v14 = vpop.permute.xlu0 %932 }
 0x7d9   :  { %3822 = vmatpush3.bf16.msra.mxu1 %v890_v13  ;;  %3830 = vmatmul.mubr.msk.bf16.vlgmr.msra.gmra.mrb[8].mxu0 %vm495_vm5, %v933_v14 }
 0x7da   :  { %3823 = vmatprep.mubr.msk.bf16.mxu1 %vm4447_vm0, %v4446_v1  ;;  %3833 = vmatprep.subr.bf16.mxu1 %v4446_v1 }
 0x7db   :  { %v4294_v17 = vpop.eup %4293  ;;  %3841 = vmatprep.mubr.msk.bf16.mxu0 %vm4447_vm0, %v4446_v1 }
 0x7dc   :  { %v831_v22 = vmul.f32 %v4294_v17, %v4290_v63 }
 0x7de   :  { %v833_v24 = vpack.c.bf16 %v831_v22, %v831_v22 }
 0x7e0   :  { %3824 = vmatmul.mubr.msk.bf16.vlgmr.msra.gmra.mrb[32].mxu1 %vm588_vm7, %v833_v24 }
 0x7e1   :  { %3835 = vmatprep.mubr.msk.bf16.mxu1 %vm4447_vm0, %v4446_v1 }
 0x7e2   :  { %3834 = vmatpush3.bf16.xpose.msra.mxu1 %v990_v25 }
 0x7e3   :  { %3845 = vmatprep.subr.bf16.mxu1 %v4446_v1 }
 0x7e9   :  { %3836 = vmatmul.mubr.msk.bf16.vlgmr.msra.gmra.mrb[36].mxu1 %vm495_vm5, %v983_v26 }
 0x7ea   :  { %3847 = vmatprep.mubr.msk.bf16.mxu1 %vm4447_vm0, %v4446_v1 }
 0x8ab   :  { %v4727_v27 = vpop.f32.mrb[28].mxu1 }
 0x8ac   :  { %v3819_v28 = vpop.f32.mrb[29].mxu1  ;;  %v976_v30 = vpop.f32.mrb[8].mxu0 }
 0x8ad   :  { %v880_v31 = vpop.f32.mrb[30].mxu1  ;;  %v3831_v32 = vpop.f32.mrb[9].mxu0  ;;  %v1032_v36 = vsel %vm588_vm7, %v976_v30, -inf }
 0x8ae   :  { %v3820_v37 = vpop.f32.mrb[31].mxu1  ;;  %1033 = vmax.xlane.f32.xlu0 %v1032_v36  ;;  %v979_v39 = vpop.f32.mrb[10].mxu0 }
 0x8af   :  { %v3832_v40 = vpop.f32.mrb[11].mxu0 }
 0x8b3   :  { %v4730_v42 = vpop.f32.mrb[32].mxu1 }
 0x8b4   :  { %v4125_v43 = vpack.i.bf16 %v4730_v42, %v4727_v27  ;;  %v3825_v44 = vpop.f32.mrb[33].mxu1 }
 0x8b5   :  { %v929_v47 = vpop.f32.mrb[34].mxu1 }
 0x8b6   :  { %v3826_v48 = vpop.f32.mrb[35].mxu1 }
 0x8bc   :  { %v1026_v49 = vpop.f32.mrb[36].mxu1 }
 0x8bd   :  { %v3837_v50 = vpop.f32.mrb[37].mxu1  ;;  %v1035_v51 = vsel %vm588_vm7, %v1026_v49, -inf }
 0x8be   :  { %1036 = vmax.xlane.f32.xlu1 %v1035_v51  ;;  %v1029_v52 = vpop.f32.mrb[38].mxu1 }
 0x8bf   :  { %v3838_v53 = vpop.f32.mrb[39].mxu1 }
 0x8cf   :  { %1056 = vrot.lane.b32.xlu1 %v4645_v45, %s4443_s3 }
 0x8d3   :  { %1154 = vrot.lane.b32.xlu1 %v4629_v38, %s4450_s27 }
 0x8d7   :  { %1204 = vrot.lane.b32.xlu1 %v4636_v41, %s4450_s27 }
 0x8db   :  { %1202 = vrot.lane.b32.xlu1 %v4647_v46, %s4450_s27 }
 0x93b   :  { %v1034_v54 = vpop.xlane.xlu0 %1033 }
 0x93c   :  { %v1038_v55 = vsub.f32 %v976_v30, %v1034_v54 }
 0x93e   :  { %v1040_v56 = vmul.f32 1.442695, %v1038_v55 }
 0x940   :  { %4295 = vpow2.f32 %v1040_v56 }
 0x94a   :  { %v4296_v57 = vpop.eup %4295 }
 0x94b   :  { %v1037_v58 = vpop.xlane.xlu1 %1036  ;;  %v1044_v59 = vsel %vm588_vm7, %v4296_v57, 0.0 }
 0x94c   :  { %v1039_v60 = vsub.f32 %v1026_v49, %v1037_v58  ;;  %1045 = vadd.xlane.f32.xlu0 %v1044_v59 }
 0x94e   :  { %v1042_v61 = vmul.f32 1.442695, %v1039_v60 }
 0x94f   :  { %v1057_v62 = vpop.permute.xlu1 %1056 }
 0x950   :  { %4297 = vpow2.f32 %v1042_v61  ;;  %v1062_v38 = vsel %vm616_vm6, %v1057_v62, 0 }
 0x951   :  { %3840 = vmatpush3.bf16.msra.mxu0 %v1062_v38 }
 0x952   :  { %3851 = vmatprep.subr.bf16.mxu0 %v4446_v1 }
 0x953   :  { %v1155_v4 = vpop.permute.xlu1 %1154 }
 0x954   :  { %v1160_v6 = vsel %vm495_vm5, %v1155_v4, 0 }
 0x957   :  { %v1205_v14 = vpop.permute.xlu1 %1204 }
 0x958   :  { %v1210_v22 = vsel %vm495_vm5, %v1205_v14, 0 }
 0x95a   :  { %v4298_v41 = vpop.eup %4297 }
 0x95b   :  { %v1047_v46 = vsel %vm588_vm7, %v4298_v41, 0.0  ;;  %v1203_v12 = vpop.permute.xlu1 %1202 }
 0x95c   :  { %1048 = vadd.xlane.f32.xlu0 %v1047_v46 }
 0x972   :  { %1104 = vrot.lane.b32.xlu0 %v4666_v9, %s4443_s3 }
 0x976   :  { %1152 = vrot.lane.b32.xlu0 %v4627_v34, %s4450_s27 }
 0x9d9   :  { %v1046_v63 = vpop.xlane.xlu0 %1045 }
 0x9da   :  { %4299 = vrcp.f32 %v1046_v63 }
 0x9e4   :  { %v4300_v2 = vpop.eup %4299 }
 0x9e5   :  { %v1052_v3 = vmul.f32 %v4300_v2, %v4296_v57 }
 0x9e7   :  { %v1054_v5 = vpack.c.bf16 %v1052_v3, %v1052_v3 }
 0x9e9   :  { %v1049_v7 = vpop.xlane.xlu0 %1048  ;;  %3842 = vmatmul.mubr.msk.bf16.vlgmr.msra.gmra.mrb[12].mxu0 %vm588_vm7, %v1054_v5 }
 0x9ea   :  { %4301 = vrcp.f32 %v1049_v7  ;;  %3852 = vmatpush3.bf16.xpose.msra.mxu0 %v1160_v6  ;;  %3853 = vmatprep.mubr.msk.bf16.mxu0 %vm4447_vm0, %v4446_v1  ;;  %v4195_v6 = vld [vmem:[#allocation2 + $0xc] ss:$20 sps:$4 sm:$0xff]   ;;  %v4196_v7 = vld [vmem:[#allocation2 + $0x34] ss:$20 sps:$4 sm:$0xff]  }
 0x9eb   :  { %3863 = vmatprep.subr.bf16.mxu0 %v4446_v1 }
 0x9ed   :  { %v1105_v8 = vpop.permute.xlu0 %1104 }
 0x9ee   :  { %v1110_v34 = vsel %vm616_vm6, %v1105_v8, 0  ;;  %v4197_v8 = vld [vmem:[#allocation2 + $0x5c] ss:$20 sps:$4 sm:$0xff]  }
 0x9ef   :  { %3846 = vmatpush3.bf16.msra.mxu1 %v1110_v34  ;;  %v4198_v34 = vld [vmem:[#allocation2 + $0x84] ss:$20 sps:$4 sm:$0xff]  }
 0x9f0   :  { %3857 = vmatprep.subr.bf16.mxu1 %v4446_v1 }
 0x9f1   :  { %v1153_v10 = vpop.permute.xlu0 %1152 }
 0x9f2   :  { %3854 = vmatmul.mubr.msk.bf16.vlgmr.msra.gmra.mrb[16].mxu0 %vm495_vm5, %v1153_v10  ;;  %v4199_v10 = vld [vmem:[#allocation2 + $0xac] ss:$20 sps:$4 sm:$0xff]  }
 0x9f3   :  { %3865 = vmatprep.mubr.msk.bf16.mxu0 %vm4447_vm0, %v4446_v1 }
 0x9f4   :  { %v4302_v11 = vpop.eup %4301 }
 0x9f5   :  { %v1053_v13 = vmul.f32 %v4302_v11, %v4298_v41  ;;  %v4200_v11 = vld [vmem:[#allocation2 + $0xd4] ss:$20 sps:$4 sm:$0xff]  }
 0x9f7   :  { %v1055_v17 = vpack.c.bf16 %v1053_v13, %v1053_v13  ;;  %v4201_v13 = vld [vmem:[#allocation2 + $0xfc] ss:$20 sps:$4 sm:$0xff]  }
 0x9f9   :  { %3848 = vmatmul.mubr.msk.bf16.vlgmr.msra.gmra.mrb[40].mxu1 %vm588_vm7, %v1055_v17 }
 0x9fa   :  { %3858 = vmatpush3.bf16.xpose.msra.mxu1 %v1210_v22  ;;  %3859 = vmatprep.mubr.msk.bf16.mxu1 %vm4447_vm0, %v4446_v1 }
 0x9fb   :  { %3869 = vmatprep.subr.bf16.mxu1 %v4446_v1 }
 0xa01   :  { %3860 = vmatmul.mubr.msk.bf16.vlgmr.msra.gmra.mrb[44].mxu1 %vm495_vm5, %v1203_v12 }
 0xa02   :  { %3871 = vmatprep.mubr.msk.bf16.mxu1 %vm4447_vm0, %v4446_v1 }
 0xabc   :  { %v1098_v24 = vpop.f32.mrb[12].mxu0 }
 0xabd   :  { %v3843_v25 = vpop.f32.mrb[13].mxu0 }
 0xabe   :  { %v1101_v26 = vpop.f32.mrb[14].mxu0 }
 0xabf   :  { %v3844_v28 = vpop.f32.mrb[15].mxu0 }
 0xac5   :  { %v1196_v30 = vpop.f32.mrb[16].mxu0 }
 0xac6   :  { %v3855_v31 = vpop.f32.mrb[17].mxu0  ;;  %v1252_v32 = vsel %vm588_vm7, %v1196_v30, -inf }
 0xac7   :  { %1253 = vmax.xlane.f32.xlu0 %v1252_v32  ;;  %v1199_v36 = vpop.f32.mrb[18].mxu0 }
 0xac8   :  { %v3856_v37 = vpop.f32.mrb[19].mxu0 }
 0xacc   :  { %v1146_v39 = vpop.f32.mrb[40].mxu1 }
 0xacd   :  { %v4130_v40 = vpack.i.bf16 %v1146_v39, %v1098_v24  ;;  %v3849_v44 = vpop.f32.mrb[41].mxu1  ;;  %v4202_v24 = vld [vmem:[#allocation2 + $0x124] ss:$20 sps:$4 sm:$0xff]  }
 0xace   :  { %v1149_v47 = vpop.f32.mrb[42].mxu1 }
 0xacf   :  { %v3850_v48 = vpop.f32.mrb[43].mxu1 }
 0xad4   :  { %v1246_v49 = vpop.f32.mrb[44].mxu1 }
 0xad5   :  { %v3861_v50 = vpop.f32.mrb[45].mxu1  ;;  %v1255_v51 = vsel %vm588_vm7, %v1246_v49, -inf }
 0xad6   :  { %1256 = vmax.xlane.f32.xlu1 %v1255_v51  ;;  %v1249_v52 = vpop.f32.mrb[46].mxu1 }
 0xad7   :  { %v3862_v53 = vpop.f32.mrb[47].mxu1 }
 0xae7   :  { %1276 = vrot.lane.b32.xlu1 %v4645_v45, %s4450_s27 }
 0xaeb   :  { %4126 = vrot.lane.b32.xlu1 %v4125_v43, %s4450_s27 }
 0xaef   :  { %4131 = vrot.lane.b32.xlu1 %v4130_v40, %s4443_s3 }
 0xb54   :  { %v1254_v54 = vpop.xlane.xlu0 %1253 }
 0xb55   :  { %v1258_v55 = vsub.f32 %v1196_v30, %v1254_v54 }
 0xb57   :  { %v1260_v56 = vmul.f32 1.442695, %v1258_v55 }
 0xb59   :  { %4303 = vpow2.f32 %v1260_v56 }
 0xb63   :  { %v4304_v57 = vpop.eup %4303  ;;  %v1257_v58 = vpop.xlane.xlu1 %1256 }
 0xb64   :  { %v1259_v59 = vsub.f32 %v1246_v49, %v1257_v58  ;;  %v1264_v60 = vsel %vm588_vm7, %v4304_v57, 0.0 }
 0xb65   :  { %1265 = vadd.xlane.f32.xlu0 %v1264_v60 }
 0xb66   :  { %v1262_v61 = vmul.f32 1.442695, %v1259_v59 }
 0xb67   :  { %v1277_v62 = vpop.permute.xlu1 %1276 }
 0xb68   :  { %4305 = vpow2.f32 %v1262_v61  ;;  %v1282_v45 = vsel %vm616_vm6, %v1277_v62, 0 }
 0xb69   :  { %3864 = vmatpush3.bf16.msra.mxu0 %v1282_v45 }
 0xb6a   :  { %3875 = vmatprep.subr.bf16.mxu0 %v4446_v1 }
 0xb6b   :  { %v4127_v32 = vpop.permute.xlu1 %4126 }
 0xb6c   :  { %v4129_v37 = vunpack.i.h.bf16 %v4127_v32  ;;  %v4128_v39 = vunpack.i.l.bf16 %v4127_v32 }
 0xb6e   :  { %v1397_v48 = vsel %vm495_vm5, %v4689_v35, %v4129_v37  ;;  %v1396_v49 = vsel %vm495_vm5, %v4687_v29, %v4128_v39  ;;  %v1423_v35 = vsub.s32 3, %v4606_v18 }
 0xb6f   :  { %v4132_v36 = vpop.permute.xlu1 %4131 }
 0xb70   :  { %v4134_v40 = vunpack.i.h.bf16 %v4132_v36  ;;  %v4133_v44 = vunpack.i.l.bf16 %v4132_v36  ;;  %v1424_v29 = vrot.slane %v4614_v20, %v1423_v35 }
 0xb72   :  { %v4306_v27 = vpop.eup %4305  ;;  %v1400_v52 = vsel %vm1398_vm8, %v1397_v48, %v4134_v40  ;;  %v1399_v53 = vsel %vm1398_vm8, %v1396_v49, %v4133_v44  ;;  %v4211_v48 = vld [vmem:[#allocation5] sm:$0xff]   ;;  %v4212_v49 = vld [vmem:[#allocation5 + $0x8] sm:$0xff]  }
 0xb73   :  { %v1267_v42 = vsel %vm588_vm7, %v4306_v27, 0.0 }
 0xb74   :  { %1268 = vadd.xlane.f32.xlu0 %v1267_v42  ;;  %v4203_v42 = vld [vmem:[#allocation2 + $0x10] ss:$20 sps:$4 sm:$0xff]  }
 0xb8a   :  { %1324 = vrot.lane.b32.xlu0 %v4666_v9, %s4450_s27 }
 0xbf2   :  { %v1266_v43 = vpop.xlane.xlu0 %1265 }
 0xbf3   :  { %4307 = vrcp.f32 %v1266_v43  ;;  %v4204_v43 = vld [vmem:[#allocation2 + $0x38] ss:$20 sps:$4 sm:$0xff]  }
 0xbfd   :  { %v4308_v38 = vpop.eup %4307 }
 0xbfe   :  { %v1272_v41 = vmul.f32 %v4308_v38, %v4304_v57 }
 0xc00   :  { %v1274_v46 = vpack.c.bf16 %v1272_v41, %v1272_v41 }
 0xc01   :  { %v1269_v63 = vpop.xlane.xlu0 %1268 }
 0xc02   :  { %4309 = vrcp.f32 %v1269_v63  ;;  %3866 = vmatmul.mubr.msk.bf16.vlgmr.msra.gmra.mrb[20].mxu0 %vm588_vm7, %v1274_v46 }
 0xc03   :  { %3891 = vmatprep.mubr.msk.bf16.mxu0 %vm4447_vm0, %v4446_v1  ;;  %3876 = vmatpush3.bf16.msra.mxu0 %v4195_v6  ;;  %v4206_v6 = vld [vmem:[#allocation2 + $0x88] ss:$20 sps:$4 sm:$0xff]  }
 0xc04   :  { %3877 = vmatprep.subr.bf16.mxu0 %v4446_v1 }
 0xc05   :  { %v1325_v2 = vpop.permute.xlu0 %1324 }
 0xc06   :  { %v1330_v3 = vsel %vm616_vm6, %v1325_v2, 0 }
 0xc07   :  { %3870 = vmatpush3.bf16.msra.mxu1 %v1330_v3  ;;  %3878 = vmatpush3.bf16.msra.mxu0 %v4196_v7  ;;  %v4207_v7 = vld [vmem:[#allocation2 + $0xb0] ss:$20 sps:$4 sm:$0xff]  }
 0xc08   :  { %3895 = vmatprep.subr.bf16.mxu1 %v4446_v1  ;;  %3879 = vmatprep.subr.bf16.mxu0 %v4446_v1 }
 0xc0b   :  { %3880 = vmatpush3.bf16.msra.mxu0 %v4197_v8  ;;  %v4208_v8 = vld [vmem:[#allocation2 + $0xd8] ss:$20 sps:$4 sm:$0xff]  }
 0xc0c   :  { %v4310_v4 = vpop.eup %4309  ;;  %3881 = vmatprep.subr.bf16.mxu0 %v4446_v1 }
 0xc0d   :  { %v1273_v9 = vmul.f32 %v4310_v4, %v4306_v27 }
 0xc0f   :  { %v1275_v5 = vpack.c.bf16 %v1273_v9, %v1273_v9  ;;  %3882 = vmatpush3.bf16.msra.mxu0 %v4198_v34  ;;  %v4209_v34 = vld [vmem:[#allocation2 + $0x100] ss:$20 sps:$4 sm:$0xff]  }
 0xc10   :  { %3883 = vmatprep.subr.bf16.mxu0 %v4446_v1 }
 0xc11   :  { %3872 = vmatmul.mubr.msk.bf16.vlgmr.msra.gmra.mrb[48].mxu1 %vm588_vm7, %v1275_v5  ;;  %v4205_v5 = vld [vmem:[#allocation2 + $0x60] ss:$20 sps:$4 sm:$0xff]  }
 0xc12   :  { %3911 = vmatprep.mubr.msk.bf16.mxu1 %vm4447_vm0, %v4446_v1  ;;  %3896 = vmatpush3.bf16.msra.mxu1 %v4203_v42 }
 0xc13   :  { %3884 = vmatpush3.bf16.msra.mxu0 %v4199_v10  ;;  %3897 = vmatprep.subr.bf16.mxu1 %v4446_v1  ;;  %v4210_v10 = vld [vmem:[#allocation2 + $0x128] ss:$20 sps:$4 sm:$0xff]  }
 0xc14   :  { %3885 = vmatprep.subr.bf16.mxu0 %v4446_v1 }
 0xc16   :  { %3898 = vmatpush3.bf16.msra.mxu1 %v4204_v43 }
 0xc17   :  { %3886 = vmatpush3.bf16.msra.mxu0 %v4200_v11  ;;  %3899 = vmatprep.subr.bf16.mxu1 %v4446_v1 }
 0xc18   :  { %3887 = vmatprep.subr.bf16.mxu0 %v4446_v1 }
 0xc1a   :  { %3900 = vmatpush3.bf16.msra.mxu1 %v4205_v5 }
 0xc1b   :  { %3888 = vmatpush3.bf16.msra.mxu0 %v4201_v13  ;;  %3901 = vmatprep.subr.bf16.mxu1 %v4446_v1 }
 0xc1c   :  { %3889 = vmatprep.subr.bf16.mxu0 %v4446_v1 }
 0xc1e   :  { %3902 = vmatpush3.bf16.msra.mxu1 %v4206_v6 }
 0xc1f   :  { %3890 = vmatpush3.bf16.msra.mxu0 %v4202_v24  ;;  %3903 = vmatprep.subr.bf16.mxu1 %v4446_v1  ;;  %v1542_v24 = vsub.s32 4, %v4606_v18 }
 0xc20   :  { %3915 = vmatprep.subr.bf16.mxu0 %v4446_v1 }
 0xc22   :  { %3904 = vmatpush3.bf16.msra.mxu1 %v4207_v7 }
 0xc23   :  { %3905 = vmatprep.subr.bf16.mxu1 %v4446_v1 }
 0xc26   :  { %3906 = vmatpush3.bf16.msra.mxu1 %v4208_v8 }
 0xc27   :  { %3907 = vmatprep.subr.bf16.mxu1 %v4446_v1 }
 0xc2a   :  { %3908 = vmatpush3.bf16.msra.mxu1 %v4209_v34  ;;  %v1699_v34 = vsub.s32 7, %v4606_v18 }
 0xc2b   :  { %3909 = vmatprep.subr.bf16.mxu1 %v4446_v1 }
 0xc2e   :  { %3910 = vmatpush3.bf16.msra.mxu1 %v4210_v10  ;;  %v1700_v10 = vrot.slane %v4614_v20, %v1699_v34 }
 0xcd5   :  { %v1318_v14 = vpop.f32.mrb[20].mxu0 }
 0xcd6   :  { %v3867_v17 = vpop.f32.mrb[21].mxu0 }
 0xcd7   :  { %v1321_v22 = vpop.f32.mrb[22].mxu0 }
 0xcd8   :  { %v3868_v12 = vpop.f32.mrb[23].mxu0 }
 0xce4   :  { %v1366_v25 = vpop.f32.mrb[48].mxu1 }
 0xce5   :  { %v4135_v26 = vpack.i.bf16 %v1366_v25, %v1318_v14  ;;  %v3873_v28 = vpop.f32.mrb[49].mxu1  ;;  %v1543_v25 = vrot.slane %v4614_v20, %v1542_v24 }
 0xce6   :  { %v1369_v30 = vpop.f32.mrb[50].mxu1 }
 0xce7   :  { %v3874_v31 = vpop.f32.mrb[51].mxu1  ;;  %4136 = vrot.lane.b32.xlu0 %v4135_v26, %s4449_s26  ;;  %v1548_v26 = vsub.s32 5, %v4606_v18 }
 0xce9   :  { %v1549_v37 = vrot.slane %v4614_v20, %v1548_v26 }
 0xd59   :  { %v4137_v47 = vpop.permute.xlu0 %4136 }
 0xd5a   :  { %v4139_v50 = vunpack.i.h.bf16 %v4137_v47  ;;  %v4138_v51 = vunpack.i.l.bf16 %v4137_v47 }
 0xd5c   :  { %v1403_v54 = vsel %vm1401_vm9, %v1400_v52, %v4139_v50  ;;  %v1402_v55 = vsel %vm1401_vm9, %v1399_v53, %v4138_v51  ;;  %v4213_v50 = vld [vmem:[#allocation5 + $0x10] sm:$0xff]   ;;  %v4214_v51 = vld [vmem:[#allocation5 + $0x18] sm:$0xff]   ;;  %v4215_v52 = vld [vmem:[#allocation5 + $0x20] sm:$0xff]  }
 0xd5d   :  { %v1404_v56 = vpack.c.bf16 %v1403_v54, %v1402_v55  ;;  %v4217_v53 = vld [vmem:[#allocation5 + $0x30] sm:$0xff]   ;;  %v4218_v54 = vld [vmem:[#allocation5 + $0x38] sm:$0xff]   ;;  %v1571_v55 = vsub.s32 6, %v4606_v18 }
 0xd5f   :  { %3892 = vmatmul.mubr.bf16.vlgmr.msra.gmra.mrb[24].mxu0 %v1404_v56  ;;  %v1572_v56 = vrot.slane %v4614_v20, %v1571_v55  ;;  %v4223_v20 = vld [vmem:[#allocation2 + $0x168] ss:$20 sps:$4 sm:$0xff]  }
 0xd60   :  { %3931 = vmatprep.mubr.msk.bf16.mxu0 %vm4447_vm0, %v4446_v1  ;;  %3916 = vmatpush3.bf16.msra.mxu0 %v4211_v48 }
 0xd61   :  { %3917 = vmatprep.subr.bf16.mxu0 %v4446_v1 }
 0xd64   :  { %3918 = vmatpush3.bf16.msra.mxu0 %v4212_v49 }
 0xd65   :  { %3919 = vmatprep.subr.bf16.mxu0 %v4446_v1 }
 0xd68   :  { %3920 = vmatpush3.bf16.msra.mxu0 %v4213_v50 }
 0xd69   :  { %3921 = vmatprep.subr.bf16.mxu0 %v4446_v1 }
 0xd6c   :  { %3922 = vmatpush3.bf16.msra.mxu0 %v4214_v51 }
 0xd6d   :  { %3923 = vmatprep.subr.bf16.mxu0 %v4446_v1 }
 0xd70   :  { %3924 = vmatpush3.bf16.msra.mxu0 %v4215_v52 }
 0xd71   :  { %3925 = vmatprep.subr.bf16.mxu0 %v4446_v1 }
 0xe32   :  { %v1507_v57 = vpop.f32.mrb[24].mxu0 }
 0xe33   :  { %v1508_v58 = vadd.f32 %v1507_v57, %v1424_v29  ;;  %v3893_v59 = vpop.f32.mrb[25].mxu0 }
 0xe34   :  { %v1510_v60 = vpop.f32.mrb[26].mxu0 }
 0xe35   :  { %v1511_v61 = vadd.f32 %v1510_v60, %v1424_v29  ;;  %v3894_v62 = vpop.f32.mrb[27].mxu0  ;;  %v1514_v45 = vadd.f32 %v1508_v58, %v4595_v15 }
 0xe37   :  { %1516 = vadd.xlane.f32.xlu1 %v1514_v45  ;;  %v1515_v27 = vadd.f32 %v1511_v61, %v4597_v16 }
 0xe39   :  { %1518 = vadd.xlane.f32.xlu0 %v1515_v27 }
 0xec4   :  { %v1517_v38 = vpop.xlane.xlu1 %1516 }
 0xec5   :  { %v1520_v41 = vmul.f32 0.03125, %v1517_v38 }
 0xec6   :  { %v1519_v46 = vpop.xlane.xlu0 %1518 }
 0xec7   :  { %v1522_v63 = vsub.f32 %v1514_v45, %v1520_v41  ;;  %v1521_v2 = vmul.f32 0.03125, %v1519_v46 }
 0xec9   :  { %v1523_v3 = vsub.f32 %v1515_v27, %v1521_v2  ;;  %v1524_v15 = vmul.f32 %v4567_v33, %v1522_v63 }
 0xecb   :  { %v1526_v4 = vmul.f32 %v1524_v15, %v1524_v15  ;;  %v1525_v16 = vmul.f32 %v4567_v33, %v1523_v3 }
 0xecd   :  { %1528 = vadd.xlane.f32.xlu0 %v1526_v4  ;;  %v1527_v9 = vmul.f32 %v1525_v16, %v1525_v16 }
 0xecf   :  { %1530 = vadd.xlane.f32.xlu1 %v1527_v9 }
 0xf5a   :  { %v1529_v11 = vpop.xlane.xlu0 %1528 }
 0xf5b   :  { %v1532_v13 = vmul.f32 0.03125, %v1529_v11 }
 0xf5c   :  { %v1531_v14 = vpop.xlane.xlu1 %1530 }
 0xf5d   :  { %v1534_v17 = vadd.f32 1e-12, %v1532_v13  ;;  %v1533_v22 = vmul.f32 0.03125, %v1531_v14 }
 0xf5f   :  { %4311 = vrsqrt.f32 %v1534_v17  ;;  %v1535_v12 = vadd.f32 1e-12, %v1533_v22 }
 0xf61   :  { %4313 = vrsqrt.f32 %v1535_v12 }
 0xf69   :  { %v4312_v28 = vpop.eup %4311 }
 0xf6a   :  { %v1538_v30 = vmul.f32 %v4312_v28, %v1524_v15 }
 0xf6b   :  { %v4314_v31 = vpop.eup %4313 }
 0xf6c   :  { %v1539_v32 = vmul.f32 %v4314_v31, %v1525_v16  ;;  %v1544_v36 = vmul.f32 %v1543_v25, %v1538_v30  ;;  %v4219_v30 = vld [vmem:[#allocation2 + $0x140] ss:$20 sps:$4 sm:$0xff]   ;;  %v4221_v31 = vld [vmem:[#allocation2 + $0x144] ss:$20 sps:$4 sm:$0xff]  }
 0xf6d   :  { %1993 = vmatprep.subr.bf16.mxu1 %v4221_v31 }
 0xf6e   :  { %v1545_v39 = vmul.f32 %v1543_v25, %v1539_v32  ;;  %v4834_v40 = vadd.f32 %v1549_v37, %v1544_v36  ;;  %v4222_v32 = vld [vmem:[#allocation2 + $0x148] ss:$20 sps:$4 sm:$0xff]   ;;  %v4225_v36 = vld [vmem:[#allocation2 + $0x16c] ss:$20 sps:$4 sm:$0xff]  }
 0xf70   :  { %v4836_v44 = vadd.f32 %v1549_v37, %v1545_v39  ;;  %v4226_v37 = vld [vmem:[#allocation2 + $0x170] ss:$20 sps:$4 sm:$0xff]  }
 0xf72   :  { %v1552_v47 = vpack.c.bf16 %v4836_v44, %v4834_v40 }
 0xf74   :  { %3912 = vmatmul.mubr.bf16.vlgmr.msra.gmra.mrb[52].mxu1 %v1552_v47 }
 0xf75   :  { %2025 = vmatprep.mubr.bf16.mxu1 %v4445_v0  ;;  %v4216_v0 = vld [vmem:[#allocation5 + $0x28] sm:$0xff]   ;;  %1994 = vmatpush1.bf16.msra.mxu1 %v4219_v30 }
 0xf76   :  { %3926 = vmatpush3.bf16.msra.mxu0 %v4216_v0  ;;  %1995 = vmatprep.subr.bf16.mxu1 %v4225_v36 }
 0xf77   :  { %3927 = vmatprep.subr.bf16.mxu0 %v4446_v1 }
 0xf79   :  { %1996 = vmatpush1.bf16.msra.mxu1 %v4223_v20 }
 0xf7a   :  { %3928 = vmatpush3.bf16.msra.mxu0 %v4217_v53  ;;  %v4229_v53 = vld [vmem:[#allocation2 + $0x194] ss:$20 sps:$4 sm:$0xff]  }
 0xf7b   :  { %3929 = vmatprep.subr.bf16.mxu0 %v4446_v1  ;;  %1997 = vmatprep.subr.bf16.mxu1 %v4229_v53 }
 0xf7e   :  { %3930 = vmatpush3.bf16.msra.mxu0 %v4218_v54  ;;  %v4227_v54 = vld [vmem:[#allocation2 + $0x190] ss:$20 sps:$4 sm:$0xff]  }
 0xf7f   :  { %3935 = vmatprep.subr.bf16.mxu0 %v4446_v1  ;;  %1998 = vmatpush1.bf16.msra.mxu1 %v4227_v54 }
0x1047   :  { %v1655_v29 = vpop.f32.mrb[52].mxu1 }
0x1048   :  { %v1656_v57 = vadd.f32 %v1655_v29, %v1572_v56  ;;  %v3913_v58 = vpop.f32.mrb[53].mxu1  ;;  %v4233_v29 = vld [vmem:[#allocation2 + $0x1bc] ss:$20 sps:$4 sm:$0xff]  }
0x1049   :  { %v1658_v59 = vpop.f32.mrb[54].mxu1  ;;  %v4234_v58 = vld [vmem:[#allocation2 + $0x1c0] ss:$20 sps:$4 sm:$0xff]   ;;  %1999 = vmatprep.subr.bf16.mxu1 %v4233_v29 }
0x104a   :  { %v1662_v60 = vmul.f32 %v1656_v57, %v1656_v57  ;;  %v1659_v61 = vadd.f32 %v1658_v59, %v1572_v56  ;;  %v3914_v62 = vpop.f32.mrb[55].mxu1  ;;  %v4230_v56 = vld [vmem:[#allocation2 + $0x198] ss:$20 sps:$4 sm:$0xff]  }
0x104b   :  { %v4237_v59 = vld [vmem:[#allocation2 + $0x1e4] ss:$20 sps:$4 sm:$0xff]   ;;  %v4241_v62 = vld [vmem:[#allocation2 + $0x20c] ss:$20 sps:$4 sm:$0xff]  }
0x104c   :  { %v1664_v45 = vmul.f32 %v1662_v60, %v1656_v57  ;;  %v1663_v27 = vmul.f32 %v1659_v61, %v1659_v61  ;;  %v4235_v60 = vld [vmem:[#allocation2 + $0x1e0] ss:$20 sps:$4 sm:$0xff]  }
0x104e   :  { %v1666_v42 = vmul.f32 0.044715, %v1664_v45  ;;  %v1665_v43 = vmul.f32 %v1663_v27, %v1659_v61  ;;  %v4239_v45 = vld [vmem:[#allocation2 + $0x208] ss:$20 sps:$4 sm:$0xff]   ;;  %v4242_v27 = vld [vmem:[#allocation2 + $0x210] ss:$20 sps:$4 sm:$0xff]  }
0x1050   :  { %v1668_v38 = vadd.f32 %v1666_v42, %v1656_v57  ;;  %v1667_v41 = vmul.f32 0.044715, %v1665_v43  ;;  %v4245_v42 = vld [vmem:[#allocation2 + $0x234] ss:$20 sps:$4 sm:$0xff]   ;;  %v4243_v43 = vld [vmem:[#allocation2 + $0x230] ss:$20 sps:$4 sm:$0xff]  }
0x1052   :  { %v1670_v46 = vmul.f32 0.7978846, %v1668_v38  ;;  %v1669_v63 = vadd.f32 %v1667_v41, %v1659_v61  ;;  %v4246_v38 = vld [vmem:[#allocation2 + $0x238] ss:$20 sps:$4 sm:$0xff]   ;;  %v4249_v41 = vld [vmem:[#allocation2 + $0x25c] ss:$20 sps:$4 sm:$0xff]  }
0x1054   :  { %4315 = vtanh.f32 %v1670_v46  ;;  %v1671_v2 = vmul.f32 0.7978846, %v1669_v63  ;;  %v4247_v46 = vld [vmem:[#allocation2 + $0x258] ss:$20 sps:$4 sm:$0xff]   ;;  %v4250_v63 = vld [vmem:[#allocation2 + $0x260] ss:$20 sps:$4 sm:$0xff]  }
0x1056   :  { %4317 = vtanh.f32 %v1671_v2 }
0x105e   :  { %v4316_v3 = vpop.eup %4315 }
0x105f   :  { %v1674_v15 = vadd.f32 1.0, %v4316_v3 }
0x1060   :  { %v4318_v4 = vpop.eup %4317 }
0x1061   :  { %v1676_v16 = vmul.f32 0.5, %v1674_v15  ;;  %v1675_v9 = vadd.f32 1.0, %v4318_v4 }
0x1063   :  { %v1677_v5 = vmul.f32 0.5, %v1675_v9  ;;  %v1678_v6 = vmul.f32 %v1676_v16, %v1656_v57  ;;  %v4231_v57 = vld [vmem:[#allocation2 + $0x1b8] ss:$20 sps:$4 sm:$0xff]  }
0x1064   :  { %2000 = vmatpush1.bf16.msra.mxu1 %v4231_v57 }
0x1065   :  { %v1679_v7 = vmul.f32 %v1677_v5, %v1659_v61  ;;  %v4238_v61 = vld [vmem:[#allocation2 + $0x1e8] ss:$20 sps:$4 sm:$0xff]   ;;  %2001 = vmatprep.subr.bf16.mxu1 %v4237_v59 }
0x1066   :  { %v225_v5 = vld [vmem:[%s5148_s5 + $0x8] sm:$0x3] }
0x1067   :  { %v1680_v8 = vpack.c.bf16 %v1679_v7, %v1678_v6  ;;  %v1819_v6 = vrot.slane %v225_v5, %v4609_v19 }
0x1068   :  { %2002 = vmatpush1.bf16.msra.mxu1 %v4235_v60 }
0x1069   :  { %3932 = vmatmul.mubr.bf16.vlgmr.msra.gmra.mrb[28].mxu0 %v1680_v8  ;;  %2003 = vmatprep.subr.bf16.mxu1 %v4241_v62 }
0x106a   :  { %3951 = vmatprep.mubr.msk.bf16.mxu0 %vm4447_vm0, %v4446_v1  ;;  %3936 = vmatpush3.bf16.msra.mxu0 %v4222_v32 }
0x106b   :  { %3937 = vmatprep.subr.bf16.mxu0 %v4446_v1 }
0x106c   :  { %2004 = vmatpush1.bf16.msra.mxu1 %v4239_v45 }
0x106d   :  { %2005 = vmatprep.subr.bf16.mxu1 %v4245_v42 }
0x106e   :  { %3938 = vmatpush3.bf16.msra.mxu0 %v4226_v37 }
0x106f   :  { %3939 = vmatprep.subr.bf16.mxu0 %v4446_v1 }
0x1070   :  { %2006 = vmatpush1.bf16.msra.mxu1 %v4243_v43 }
0x1071   :  { %2007 = vmatprep.subr.bf16.mxu1 %v4249_v41 }
0x1072   :  { %3940 = vmatpush3.bf16.msra.mxu0 %v4230_v56 }
0x1073   :  { %3941 = vmatprep.subr.bf16.mxu0 %v4446_v1 }
0x1074   :  { %2008 = vmatpush1.bf16.msra.mxu1 %v4247_v46 }
0x1075   :  { %3955 = vmatprep.subr.bf16.mxu1 %v4446_v1 }
0x1076   :  { %3942 = vmatpush3.bf16.msra.mxu0 %v4234_v58 }
0x1077   :  { %3943 = vmatprep.subr.bf16.mxu0 %v4446_v1 }
0x107a   :  { %3944 = vmatpush3.bf16.msra.mxu0 %v4238_v61 }
0x107b   :  { %3945 = vmatprep.subr.bf16.mxu0 %v4446_v1 }
0x107e   :  { %3946 = vmatpush3.bf16.msra.mxu0 %v4242_v27 }
0x107f   :  { %3947 = vmatprep.subr.bf16.mxu0 %v4446_v1 }
0x1082   :  { %3948 = vmatpush3.bf16.msra.mxu0 %v4246_v38 }
0x1083   :  { %3949 = vmatprep.subr.bf16.mxu0 %v4446_v1 }
0x1086   :  { %3950 = vmatpush3.bf16.msra.mxu0 %v4250_v63 }
0x1087   :  { %3979 = vmatprep.subr.bf16.mxu0 %v4446_v1 }
0x113c   :  { %v1783_v11 = vpop.f32.mrb[28].mxu0 }
0x113d   :  { %v1784_v13 = vadd.f32 %v1783_v11, %v1700_v10  ;;  %v3933_v14 = vpop.f32.mrb[29].mxu0 }
0x113e   :  { %v1786_v17 = vpop.f32.mrb[30].mxu0  ;;  %v1825_v14 = vrot.slane %v225_v5, %v4617_v21 }
0x113f   :  { %v1787_v22 = vadd.f32 %v1786_v17, %v1700_v10  ;;  %v3934_v12 = vpop.f32.mrb[31].mxu0  ;;  %v1790_v25 = vadd.f32 %v1784_v13, %v4834_v40 }
0x1141   :  { %1792 = vadd.xlane.f32.xlu0 %v1790_v25  ;;  %v1791_v28 = vadd.f32 %v1787_v22, %v4836_v44 }
0x1143   :  { %1794 = vadd.xlane.f32.xlu1 %v1791_v28 }
0x11ce   :  { %v1793_v39 = vpop.xlane.xlu0 %1792 }
0x11cf   :  { %v1796_v40 = vmul.f32 0.03125, %v1793_v39 }
0x11d0   :  { %v1795_v44 = vpop.xlane.xlu1 %1794 }
0x11d1   :  { %v1798_v47 = vsub.f32 %v1790_v25, %v1796_v40  ;;  %v1797_v48 = vmul.f32 0.03125, %v1795_v44 }
0x11d3   :  { %v1799_v49 = vsub.f32 %v1791_v28, %v1797_v48  ;;  %v1800_v50 = vmul.f32 %v4567_v33, %v1798_v47  ;;  %v4890_v28 = vld [vmem:[%s5148_s5 + $0x10] sm:$0xff] }
0x11d4   :  { %v2086_v30 = vrot.slane %v4890_v28, %v4617_v21  ;;  %v2092_v36 = vrot.slane %v4890_v28, %v485_v23 }
0x11d5   :  { %v1802_v51 = vmul.f32 %v1800_v50, %v1800_v50  ;;  %v1801_v52 = vmul.f32 %v4567_v33, %v1799_v49 }
0x11d7   :  { %1804 = vadd.xlane.f32.xlu0 %v1802_v51  ;;  %v1803_v0 = vmul.f32 %v1801_v52, %v1801_v52 }
0x11d9   :  { %1806 = vadd.xlane.f32.xlu1 %v1803_v0 }
0x1264   :  { %v1805_v2 = vpop.xlane.xlu0 %1804 }
0x1265   :  { %v1808_v3 = vmul.f32 0.03125, %v1805_v2 }
0x1266   :  { %v1807_v15 = vpop.xlane.xlu1 %1806 }
0x1267   :  { %v1810_v4 = vadd.f32 1e-12, %v1808_v3  ;;  %v1809_v16 = vmul.f32 0.03125, %v1807_v15 }
0x1269   :  { %4319 = vrsqrt.f32 %v1810_v4  ;;  %v1811_v9 = vadd.f32 1e-12, %v1809_v16 }
0x126b   :  { %4321 = vrsqrt.f32 %v1811_v9 }
0x1273   :  { %v4320_v7 = vpop.eup %4319 }
0x1274   :  { %v1814_v8 = vmul.f32 %v4320_v7, %v1800_v50  ;;  %v2080_v50 = vrot.slane %v4890_v28, %v4609_v19 }
0x1275   :  { %v4322_v10 = vpop.eup %4321 }
0x1276   :  { %v1815_v11 = vmul.f32 %v4322_v10, %v1801_v52  ;;  %v1820_v13 = vmul.f32 %v1819_v6, %v1814_v8 }
0x1278   :  { %v1821_v17 = vmul.f32 %v1819_v6, %v1815_v11  ;;  %v4877_v22 = vadd.f32 %v1825_v14, %v1820_v13 }
0x127a   :  { %v4879_v12 = vadd.f32 %v1825_v14, %v1821_v17 }
0x127c   :  { %v1831_v25 = vpack.c.bf16 %v4879_v12, %v4877_v22 }
0x127e   :  { %2026 = vmatmul.mubr.bf16.vlgmr.msra.gmra.mrb[56].mxu1 %v1831_v25  ;;  %3952 = vmatmul.mubr.bf16.vlgmr.msra.gmra.mrb[32].mxu0 %v1831_v25 }
0x127f   :  { %3957 = vmatprep.mubr.msk.bf16.mxu1 %vm4447_vm0, %v4446_v1  ;;  %3981 = vmatprep.mubr.msk.bf16.mxu0 %vm4447_vm0, %v4446_v1 }
0x1351   :  { %v2027_v31 = vpop.f32.mrb[56].mxu1  ;;  %v2070_v32 = vpop.f32.mrb[32].mxu0 }
0x1352   :  { %v2029_v37 = vpop.f32.mrb[57].mxu1  ;;  %v3953_v20 = vpop.f32.mrb[33].mxu0  ;;  %v2081_v23 = vadd.f32 %v2080_v50, %v2027_v31  ;;  %v2093_v56 = vadd.f32 %v2092_v36, %v2070_v32 }
0x1353   :  { %v2087_v39 = vadd.f32 %v2086_v30, %v2029_v37  ;;  %v2031_v40 = vpop.f32.mrb[58].mxu1  ;;  %v2073_v44 = vpop.f32.mrb[34].mxu0 }
0x1354   :  { %v4897_v47 = vadd.f32 %v2092_v36, %v2073_v44  ;;  %v2033_v48 = vpop.f32.mrb[59].mxu1  ;;  %v3954_v49 = vpop.f32.mrb[35].mxu0  ;;  %v4908_v54 = vpack.c.bf16 %v2081_v23, %v2081_v23  ;;  %v2082_v57 = vadd.f32 %v2080_v50, %v2031_v40  ;;  %v4917_v58 = vpack.c.bf16 %v2093_v56, %v2093_v56 }
0x1355   :  { %v4901_v51 = vpack.c.bf16 %v2087_v39, %v2087_v39  ;;  %v2088_v52 = vadd.f32 %v2086_v30, %v2033_v48 }
0x1356   :  { %v4919_v59 = vpack.c.bf16 %v2082_v57, %v2082_v57  ;;  %v2221_v60 = vsel %vm616_vm6, %v4917_v58, 0  ;;  %v4944_v25 = vpack.c.bf16 %v4897_v47, %v4897_v47 }
0x1357   :  { %v2105_v0 = vsel %vm495_vm5, %v4901_v51, 0  ;;  %v4906_v53 = vpack.c.bf16 %v2088_v52, %v2088_v52 }
0x1358   :  { %3956 = vmatpush3.bf16.xpose.msra.mxu1 %v2105_v0  ;;  %v2267_v37 = vsel %vm616_vm6, %v4944_v25, 0 }
0x1359   :  { %3961 = vmatprep.subr.bf16.mxu1 %v4446_v1  ;;  %v2151_v29 = vsel %vm495_vm5, %v4906_v53, 0 }
0x135f   :  { %3958 = vmatmul.mubr.msk.bf16.vlgmr.msra.gmra.mrb[60].mxu1 %vm495_vm5, %v4908_v54 }
0x1360   :  { %3962 = vmatpush3.bf16.xpose.msra.mxu1 %v2151_v29  ;;  %3963 = vmatprep.mubr.msk.bf16.mxu1 %vm4447_vm0, %v4446_v1 }
0x1361   :  { %3967 = vmatprep.subr.bf16.mxu1 %v4446_v1 }
0x1367   :  { %3964 = vmatmul.mubr.msk.bf16.vlgmr.msra.gmra.mrb[64].mxu1 %vm495_vm5, %v4919_v59 }
0x1368   :  { %3968 = vmatpush3.bf16.msra.mxu1 %v2221_v60  ;;  %3969 = vmatprep.mubr.msk.bf16.mxu1 %vm4447_vm0, %v4446_v1 }
0x1369   :  { %3973 = vmatprep.subr.bf16.mxu1 %v4446_v1 }
0x1432   :  { %v2141_v61 = vpop.f32.mrb[60].mxu1 }
0x1433   :  { %v3959_v62 = vpop.f32.mrb[61].mxu1  ;;  %v2193_v45 = vsel %vm588_vm7, %v2141_v61, -inf }
0x1434   :  { %2194 = vmax.xlane.f32.xlu0 %v2193_v45  ;;  %v2144_v27 = vpop.f32.mrb[62].mxu1 }
0x1435   :  { %v3960_v42 = vpop.f32.mrb[63].mxu1 }
0x143a   :  { %v2187_v43 = vpop.f32.mrb[64].mxu1 }
0x143b   :  { %v3965_v38 = vpop.f32.mrb[65].mxu1  ;;  %v2196_v41 = vsel %vm588_vm7, %v2187_v43, -inf }
0x143c   :  { %2197 = vmax.xlane.f32.xlu1 %v2196_v41  ;;  %v2190_v46 = vpop.f32.mrb[66].mxu1 }
0x143d   :  { %v3966_v63 = vpop.f32.mrb[67].mxu1 }
0x14c1   :  { %v2195_v2 = vpop.xlane.xlu0 %2194 }
0x14c2   :  { %v2199_v3 = vsub.f32 %v2141_v61, %v2195_v2 }
0x14c4   :  { %v2201_v15 = vmul.f32 1.442695, %v2199_v3 }
0x14c6   :  { %4323 = vpow2.f32 %v2201_v15 }
0x14c9   :  { %v2198_v4 = vpop.xlane.xlu1 %2197 }
0x14ca   :  { %v2200_v16 = vsub.f32 %v2187_v43, %v2198_v4 }
0x14cc   :  { %v2203_v9 = vmul.f32 1.442695, %v2200_v16 }
0x14ce   :  { %4325 = vpow2.f32 %v2203_v9 }
0x14d0   :  { %v4324_v5 = vpop.eup %4323 }
0x14d1   :  { %v2205_v6 = vsel %vm588_vm7, %v4324_v5, 0.0 }
0x14d2   :  { %2206 = vadd.xlane.f32.xlu0 %v2205_v6 }
0x14d8   :  { %v4326_v7 = vpop.eup %4325 }
0x14d9   :  { %v2208_v8 = vsel %vm588_vm7, %v4326_v7, 0.0 }
0x14da   :  { %2209 = vadd.xlane.f32.xlu1 %v2208_v8 }
0x14e8   :  { %2313 = vrot.lane.b32.xlu0 %v4901_v51, %s4449_s26 }
0x14eb   :  { %2365 = vrot.lane.b32.xlu1 %v4906_v53, %s4449_s26 }
0x14ec   :  { %2362 = vrot.lane.b32.xlu0 %v4919_v59, %s4449_s26 }
0x14ef   :  { %2310 = vrot.lane.b32.xlu1 %v4908_v54, %s4449_s26 }
0x155f   :  { %v2207_v10 = vpop.xlane.xlu0 %2206 }
0x1560   :  { %4327 = vrcp.f32 %v2207_v10 }
0x1563   :  { %v2314_v11 = vpop.permute.xlu0 %2313 }
0x1564   :  { %v2319_v13 = vsel %vm495_vm5, %v2314_v11, 0 }
0x1565   :  { %3980 = vmatpush3.bf16.xpose.msra.mxu0 %v2319_v13 }
0x1566   :  { %3991 = vmatprep.subr.bf16.mxu0 %v4446_v1 }
0x1567   :  { %v2210_v14 = vpop.xlane.xlu1 %2209  ;;  %v2363_v47 = vpop.permute.xlu0 %2362 }
0x1568   :  { %4329 = vrcp.f32 %v2210_v14 }
0x156a   :  { %v4328_v17 = vpop.eup %4327 }
0x156b   :  { %v2213_v30 = vmul.f32 %v4328_v17, %v4324_v5  ;;  %v2366_v31 = vpop.permute.xlu1 %2365 }
0x156c   :  { %v2371_v44 = vsel %vm495_vm5, %v2366_v31, 0 }
0x156d   :  { %v2215_v32 = vpack.c.bf16 %v2213_v30, %v2213_v30 }
0x156f   :  { %v2311_v36 = vpop.permute.xlu1 %2310  ;;  %3970 = vmatmul.mubr.msk.bf16.vlgmr.msra.gmra.mrb[68].mxu1 %vm588_vm7, %v2215_v32 }
0x1570   :  { %3974 = vmatpush3.bf16.msra.mxu1 %v2267_v37  ;;  %3982 = vmatmul.mubr.msk.bf16.vlgmr.msra.gmra.mrb[36].mxu0 %vm495_vm5, %v2311_v36 }
0x1571   :  { %3975 = vmatprep.mubr.msk.bf16.mxu1 %vm4447_vm0, %v4446_v1  ;;  %3985 = vmatprep.subr.bf16.mxu1 %v4446_v1 }
0x1572   :  { %v4330_v20 = vpop.eup %4329  ;;  %3993 = vmatprep.mubr.msk.bf16.mxu0 %vm4447_vm0, %v4446_v1 }
0x1573   :  { %v2214_v39 = vmul.f32 %v4330_v20, %v4326_v7 }
0x1575   :  { %v2216_v40 = vpack.c.bf16 %v2214_v39, %v2214_v39 }
0x1577   :  { %3976 = vmatmul.mubr.msk.bf16.vlgmr.msra.gmra.mrb[72].mxu1 %vm588_vm7, %v2216_v40 }
0x1578   :  { %3987 = vmatprep.mubr.msk.bf16.mxu1 %vm4447_vm0, %v4446_v1 }
0x1579   :  { %3986 = vmatpush3.bf16.xpose.msra.mxu1 %v2371_v44 }
0x157a   :  { %3997 = vmatprep.subr.bf16.mxu1 %v4446_v1 }
0x1580   :  { %3988 = vmatmul.mubr.msk.bf16.vlgmr.msra.gmra.mrb[76].mxu1 %vm495_vm5, %v2363_v47 }
0x1581   :  { %3999 = vmatprep.mubr.msk.bf16.mxu1 %vm4447_vm0, %v4446_v1 }
0x1642   :  { %v4963_v48 = vpop.f32.mrb[68].mxu1 }
0x1643   :  { %v3971_v49 = vpop.f32.mrb[69].mxu1  ;;  %v2355_v50 = vpop.f32.mrb[36].mxu0 }
0x1644   :  { %v2260_v52 = vpop.f32.mrb[70].mxu1  ;;  %v3983_v0 = vpop.f32.mrb[37].mxu0  ;;  %v2413_v23 = vsel %vm588_vm7, %v2355_v50, -inf }
0x1645   :  { %v3972_v56 = vpop.f32.mrb[71].mxu1  ;;  %2414 = vmax.xlane.f32.xlu1 %v2413_v23  ;;  %v2358_v29 = vpop.f32.mrb[38].mxu0 }
0x1646   :  { %v3984_v57 = vpop.f32.mrb[39].mxu0 }
0x164a   :  { %v4966_v60 = vpop.f32.mrb[72].mxu1 }
0x164b   :  { %v3977_v61 = vpop.f32.mrb[73].mxu1 }
0x164c   :  { %v2306_v62 = vpop.f32.mrb[74].mxu1 }
0x164d   :  { %v3978_v45 = vpop.f32.mrb[75].mxu1 }
0x1653   :  { %v2407_v27 = vpop.f32.mrb[76].mxu1 }
0x1654   :  { %v3989_v42 = vpop.f32.mrb[77].mxu1  ;;  %v2416_v43 = vsel %vm588_vm7, %v2407_v27, -inf }
0x1655   :  { %2417 = vmax.xlane.f32.xlu0 %v2416_v43  ;;  %v2410_v38 = vpop.f32.mrb[78].mxu1 }
0x1656   :  { %v3990_v41 = vpop.f32.mrb[79].mxu1  ;;  %2487 = vrot.lane.b32.xlu1 %v4944_v25, %s4449_s26 }
0x16d2   :  { %v2415_v46 = vpop.xlane.xlu1 %2414 }
0x16d3   :  { %v2419_v63 = vsub.f32 %v2355_v50, %v2415_v46 }
0x16d5   :  { %v2421_v2 = vmul.f32 1.442695, %v2419_v63 }
0x16d6   :  { %v2488_v3 = vpop.permute.xlu1 %2487 }
0x16d7   :  { %4331 = vpow2.f32 %v2421_v2  ;;  %v2493_v15 = vsel %vm616_vm6, %v2488_v3, 0 }
0x16d8   :  { %3998 = vmatpush3.bf16.msra.mxu1 %v2493_v15 }
0x16d9   :  { %4009 = vmatprep.subr.bf16.mxu1 %v4446_v1 }
0x16e1   :  { %v4332_v4 = vpop.eup %4331 }
0x16e2   :  { %v2418_v16 = vpop.xlane.xlu0 %2417  ;;  %v2425_v9 = vsel %vm588_vm7, %v4332_v4, 0.0 }
0x16e3   :  { %v2420_v5 = vsub.f32 %v2407_v27, %v2418_v16  ;;  %2426 = vadd.xlane.f32.xlu0 %v2425_v9 }
0x16e5   :  { %v2423_v6 = vmul.f32 1.442695, %v2420_v5 }
0x16e7   :  { %4333 = vpow2.f32 %v2423_v6 }
0x16f1   :  { %v4334_v7 = vpop.eup %4333 }
0x16f2   :  { %v2428_v8 = vsel %vm588_vm7, %v4334_v7, 0.0 }
0x16f3   :  { %2429 = vadd.xlane.f32.xlu1 %v2428_v8 }
0x16f9   :  { %2438 = vrot.lane.b32.xlu0 %v4917_v58, %s4449_s26 }
0x16fd   :  { %2587 = vrot.lane.b32.xlu0 %v4906_v53, %s4443_s3 }
0x1701   :  { %2585 = vrot.lane.b32.xlu0 %v4919_v59, %s4443_s3 }
0x1704   :  { %2537 = vrot.lane.b32.xlu1 %v4901_v51, %s4443_s3 }
0x1708   :  { %2535 = vrot.lane.b32.xlu1 %v4908_v54, %s4443_s3 }
0x1770   :  { %v2427_v10 = vpop.xlane.xlu0 %2426 }
0x1771   :  { %4335 = vrcp.f32 %v2427_v10 }
0x1774   :  { %v2439_v11 = vpop.permute.xlu0 %2438 }
0x1775   :  { %v2444_v13 = vsel %vm616_vm6, %v2439_v11, 0 }
0x1776   :  { %3992 = vmatpush3.bf16.msra.mxu0 %v2444_v13 }
0x1777   :  { %4003 = vmatprep.subr.bf16.mxu0 %v4446_v1 }
0x1778   :  { %v2588_v40 = vpop.permute.xlu0 %2587 }
0x1779   :  { %v2593_v47 = vsel %vm495_vm5, %v2588_v40, 0 }
0x177b   :  { %v4336_v14 = vpop.eup %4335 }
0x177c   :  { %v2433_v17 = vmul.f32 %v4336_v14, %v4332_v4  ;;  %v2586_v49 = vpop.permute.xlu0 %2585 }
0x177e   :  { %v2435_v30 = vpack.c.bf16 %v2433_v17, %v2433_v17 }
0x1780   :  { %v2430_v31 = vpop.xlane.xlu1 %2429  ;;  %3994 = vmatmul.mubr.msk.bf16.vlgmr.msra.gmra.mrb[40].mxu0 %vm588_vm7, %v2435_v30 }
0x1781   :  { %4337 = vrcp.f32 %v2430_v31  ;;  %4005 = vmatprep.mubr.msk.bf16.mxu0 %vm4447_vm0, %v4446_v1 }
0x1784   :  { %v2538_v32 = vpop.permute.xlu1 %2537 }
0x1785   :  { %v2543_v36 = vsel %vm495_vm5, %v2538_v32, 0 }
0x1786   :  { %4004 = vmatpush3.bf16.xpose.msra.mxu0 %v2543_v36 }
0x1787   :  { %4015 = vmatprep.subr.bf16.mxu0 %v4446_v1 }
0x1788   :  { %v2536_v39 = vpop.permute.xlu1 %2535 }
0x178b   :  { %v4338_v37 = vpop.eup %4337 }
0x178c   :  { %v2434_v20 = vmul.f32 %v4338_v37, %v4334_v7 }
0x178d   :  { %4006 = vmatmul.mubr.msk.bf16.vlgmr.msra.gmra.mrb[44].mxu0 %vm495_vm5, %v2536_v39 }
0x178e   :  { %v2436_v44 = vpack.c.bf16 %v2434_v20, %v2434_v20  ;;  %4017 = vmatprep.mubr.msk.bf16.mxu0 %vm4447_vm0, %v4446_v1 }
0x1790   :  { %4000 = vmatmul.mubr.msk.bf16.vlgmr.msra.gmra.mrb[80].mxu1 %vm588_vm7, %v2436_v44 }
0x1791   :  { %4010 = vmatpush3.bf16.xpose.msra.mxu1 %v2593_v47  ;;  %4011 = vmatprep.mubr.msk.bf16.mxu1 %vm4447_vm0, %v4446_v1 }
0x1792   :  { %4021 = vmatprep.subr.bf16.mxu1 %v4446_v1 }
0x1798   :  { %4012 = vmatmul.mubr.msk.bf16.vlgmr.msra.gmra.mrb[84].mxu1 %vm495_vm5, %v2586_v49 }
0x1799   :  { %4023 = vmatprep.mubr.msk.bf16.mxu1 %vm4447_vm0, %v4446_v1 }
0x1853   :  { %v5003_v50 = vpop.f32.mrb[40].mxu0 }
0x1854   :  { %v3995_v52 = vpop.f32.mrb[41].mxu0 }
0x1855   :  { %v2483_v0 = vpop.f32.mrb[42].mxu0 }
0x1856   :  { %v3996_v23 = vpop.f32.mrb[43].mxu0 }
0x1860   :  { %v2579_v56 = vpop.f32.mrb[44].mxu0 }
0x1861   :  { %v4007_v29 = vpop.f32.mrb[45].mxu0  ;;  %v2635_v57 = vsel %vm588_vm7, %v2579_v56, -inf }
0x1862   :  { %2636 = vmax.xlane.f32.xlu1 %v2635_v57  ;;  %v2582_v61 = vpop.f32.mrb[46].mxu0 }
0x1863   :  { %v5006_v62 = vpop.f32.mrb[80].mxu1  ;;  %v4008_v45 = vpop.f32.mrb[47].mxu0 }
0x1864   :  { %v4140_v27 = vpack.i.bf16 %v5006_v62, %v5003_v50  ;;  %v4001_v42 = vpop.f32.mrb[81].mxu1 }
0x1865   :  { %v2532_v43 = vpop.f32.mrb[82].mxu1 }
0x1866   :  { %v4002_v38 = vpop.f32.mrb[83].mxu1 }
0x186b   :  { %v2629_v41 = vpop.f32.mrb[84].mxu1 }
0x186c   :  { %v4013_v46 = vpop.f32.mrb[85].mxu1  ;;  %v2638_v63 = vsel %vm588_vm7, %v2629_v41, -inf }
0x186d   :  { %2639 = vmax.xlane.f32.xlu0 %v2638_v63  ;;  %v2632_v2 = vpop.f32.mrb[86].mxu1 }
0x186e   :  { %v4014_v3 = vpop.f32.mrb[87].mxu1 }
0x1873   :  { %2707 = vrot.lane.b32.xlu1 %v4944_v25, %s4443_s3 }
0x18ef   :  { %v2637_v15 = vpop.xlane.xlu1 %2636 }
0x18f0   :  { %v2641_v4 = vsub.f32 %v2579_v56, %v2637_v15 }
0x18f2   :  { %v2643_v16 = vmul.f32 1.442695, %v2641_v4 }
0x18f3   :  { %v2708_v9 = vpop.permute.xlu1 %2707 }
0x18f4   :  { %4339 = vpow2.f32 %v2643_v16  ;;  %v2713_v5 = vsel %vm616_vm6, %v2708_v9, 0 }
0x18f5   :  { %4022 = vmatpush3.bf16.msra.mxu1 %v2713_v5 }
0x18f6   :  { %4033 = vmatprep.subr.bf16.mxu1 %v4446_v1 }
0x18fa   :  { %v2640_v6 = vpop.xlane.xlu0 %2639 }
0x18fb   :  { %v2642_v7 = vsub.f32 %v2629_v41, %v2640_v6 }
0x18fd   :  { %v2645_v8 = vmul.f32 1.442695, %v2642_v7 }
0x18fe   :  { %v4340_v10 = vpop.eup %4339 }
0x18ff   :  { %4341 = vpow2.f32 %v2645_v8  ;;  %v2647_v11 = vsel %vm588_vm7, %v4340_v10, 0.0 }
0x1900   :  { %2648 = vadd.xlane.f32.xlu0 %v2647_v11 }
0x1909   :  { %v4342_v13 = vpop.eup %4341 }
0x190a   :  { %v2650_v14 = vsel %vm588_vm7, %v4342_v13, 0.0 }
0x190b   :  { %2651 = vadd.xlane.f32.xlu1 %v2650_v14 }
0x1916   :  { %2659 = vrot.lane.b32.xlu0 %v4917_v58, %s4443_s3 }
0x191a   :  { %2807 = vrot.lane.b32.xlu0 %v4906_v53, %s4450_s27 }
0x191c   :  { %2757 = vrot.lane.b32.xlu1 %v4901_v51, %s4450_s27 }
0x191e   :  { %2805 = vrot.lane.b32.xlu0 %v4919_v59, %s4450_s27 }
0x1920   :  { %2755 = vrot.lane.b32.xlu1 %v4908_v54, %s4450_s27 }
0x198d   :  { %v2649_v17 = vpop.xlane.xlu0 %2648 }
0x198e   :  { %4343 = vrcp.f32 %v2649_v17 }
0x1991   :  { %v2660_v30 = vpop.permute.xlu0 %2659 }
0x1992   :  { %v2665_v31 = vsel %vm616_vm6, %v2660_v30, 0 }
0x1993   :  { %4016 = vmatpush3.bf16.msra.mxu0 %v2665_v31 }
0x1994   :  { %4027 = vmatprep.subr.bf16.mxu0 %v4446_v1 }
0x1995   :  { %v2808_v40 = vpop.permute.xlu0 %2807 }
0x1996   :  { %v2813_v47 = vsel %vm495_vm5, %v2808_v40, 0  ;;  %v4255_v40 = vld [vmem:[#allocation2 + $0x1ec] ss:$20 sps:$4 sm:$0xff]  }
0x1998   :  { %v4344_v32 = vpop.eup %4343  ;;  %v2652_v36 = vpop.xlane.xlu1 %2651 }
0x1999   :  { %v2655_v53 = vmul.f32 %v4344_v32, %v4340_v10  ;;  %4345 = vrcp.f32 %v2652_v36  ;;  %v2806_v49 = vpop.permute.xlu0 %2805 }
0x199b   :  { %v2657_v37 = vpack.c.bf16 %v2655_v53, %v2655_v53 }
0x199c   :  { %v2758_v51 = vpop.permute.xlu1 %2757 }
0x199d   :  { %v2763_v20 = vsel %vm495_vm5, %v2758_v51, 0  ;;  %4018 = vmatmul.mubr.msk.bf16.vlgmr.msra.gmra.mrb[48].mxu0 %vm588_vm7, %v2657_v37 }
0x199e   :  { %4028 = vmatpush3.bf16.xpose.msra.mxu0 %v2763_v20  ;;  %4029 = vmatprep.mubr.msk.bf16.mxu0 %vm4447_vm0, %v4446_v1  ;;  %v4251_v20 = vld [vmem:[#allocation2 + $0x14c] ss:$20 sps:$4 sm:$0xff]  }
0x199f   :  { %4039 = vmatprep.subr.bf16.mxu0 %v4446_v1 }
0x19a0   :  { %v2756_v39 = vpop.permute.xlu1 %2755 }
0x19a3   :  { %v4346_v54 = vpop.eup %4345 }
0x19a4   :  { %v2656_v59 = vmul.f32 %v4346_v54, %v4342_v13  ;;  %v4252_v54 = vld [vmem:[#allocation2 + $0x174] ss:$20 sps:$4 sm:$0xff]  }
0x19a5   :  { %4030 = vmatmul.mubr.msk.bf16.vlgmr.msra.gmra.mrb[52].mxu0 %vm495_vm5, %v2756_v39  ;;  %v4254_v39 = vld [vmem:[#allocation2 + $0x1c4] ss:$20 sps:$4 sm:$0xff]  }
0x19a6   :  { %v2658_v44 = vpack.c.bf16 %v2656_v59, %v2656_v59  ;;  %4041 = vmatprep.mubr.msk.bf16.mxu0 %vm4447_vm0, %v4446_v1  ;;  %v4253_v59 = vld [vmem:[#allocation2 + $0x19c] ss:$20 sps:$4 sm:$0xff]  }
0x19a8   :  { %4024 = vmatmul.mubr.msk.bf16.vlgmr.msra.gmra.mrb[88].mxu1 %vm588_vm7, %v2658_v44  ;;  %v4256_v44 = vld [vmem:[#allocation2 + $0x214] ss:$20 sps:$4 sm:$0xff]  }
0x19a9   :  { %4034 = vmatpush3.bf16.xpose.msra.mxu1 %v2813_v47  ;;  %4035 = vmatprep.mubr.msk.bf16.mxu1 %vm4447_vm0, %v4446_v1  ;;  %v4257_v47 = vld [vmem:[#allocation2 + $0x23c] ss:$20 sps:$4 sm:$0xff]  }
0x19aa   :  { %4045 = vmatprep.subr.bf16.mxu1 %v4446_v1 }
0x19b0   :  { %4036 = vmatmul.mubr.msk.bf16.vlgmr.msra.gmra.mrb[92].mxu1 %vm495_vm5, %v2806_v49 }
0x19b1   :  { %4047 = vmatprep.mubr.msk.bf16.mxu1 %vm4447_vm0, %v4446_v1 }
0x1a70   :  { %v2701_v52 = vpop.f32.mrb[48].mxu0 }
0x1a71   :  { %v4019_v0 = vpop.f32.mrb[49].mxu0 }
0x1a72   :  { %v2704_v23 = vpop.f32.mrb[50].mxu0 }
0x1a73   :  { %v4020_v56 = vpop.f32.mrb[51].mxu0  ;;  %v4258_v23 = vld [vmem:[#allocation2 + $0x264] ss:$20 sps:$4 sm:$0xff]  }
0x1a78   :  { %v2799_v29 = vpop.f32.mrb[52].mxu0 }
0x1a79   :  { %v4031_v57 = vpop.f32.mrb[53].mxu0  ;;  %v2855_v61 = vsel %vm588_vm7, %v2799_v29, -inf }
0x1a7a   :  { %2856 = vmax.xlane.f32.xlu1 %v2855_v61  ;;  %v2802_v45 = vpop.f32.mrb[54].mxu0 }
0x1a7b   :  { %v2749_v42 = vpop.f32.mrb[88].mxu1  ;;  %v4032_v43 = vpop.f32.mrb[55].mxu0 }
0x1a7c   :  { %v4145_v38 = vpack.i.bf16 %v2749_v42, %v2701_v52  ;;  %v4025_v41 = vpop.f32.mrb[89].mxu1 }
0x1a7d   :  { %v2752_v46 = vpop.f32.mrb[90].mxu1 }
0x1a7e   :  { %v4026_v63 = vpop.f32.mrb[91].mxu1 }
0x1a83   :  { %v2849_v2 = vpop.f32.mrb[92].mxu1 }
0x1a84   :  { %v4037_v3 = vpop.f32.mrb[93].mxu1  ;;  %v2858_v15 = vsel %vm588_vm7, %v2849_v2, -inf }
0x1a85   :  { %2859 = vmax.xlane.f32.xlu0 %v2858_v15  ;;  %v2852_v4 = vpop.f32.mrb[94].mxu1 }
0x1a86   :  { %v4038_v16 = vpop.f32.mrb[95].mxu1 }
0x1b07   :  { %v2857_v9 = vpop.xlane.xlu1 %2856 }
0x1b08   :  { %v2861_v5 = vsub.f32 %v2799_v29, %v2857_v9 }
0x1b0a   :  { %v2863_v6 = vmul.f32 1.442695, %v2861_v5 }
0x1b0c   :  { %4347 = vpow2.f32 %v2863_v6 }
0x1b12   :  { %v2860_v7 = vpop.xlane.xlu0 %2859 }
0x1b13   :  { %v2862_v8 = vsub.f32 %v2849_v2, %v2860_v7 }
0x1b15   :  { %v2865_v10 = vmul.f32 1.442695, %v2862_v8 }
0x1b16   :  { %v4348_v11 = vpop.eup %4347 }
0x1b17   :  { %4349 = vpow2.f32 %v2865_v10  ;;  %v2867_v13 = vsel %vm588_vm7, %v4348_v11, 0.0 }
0x1b18   :  { %2868 = vadd.xlane.f32.xlu0 %v2867_v13 }
0x1b21   :  { %v4350_v14 = vpop.eup %4349 }
0x1b22   :  { %v2870_v17 = vsel %vm588_vm7, %v4350_v14, 0.0 }
0x1b23   :  { %2871 = vadd.xlane.f32.xlu1 %v2870_v17 }
0x1b2e   :  { %2879 = vrot.lane.b32.xlu0 %v4917_v58, %s4450_s27 }
0x1b32   :  { %4146 = vrot.lane.b32.xlu0 %v4145_v38, %s4443_s3 }
0x1b34   :  { %2927 = vrot.lane.b32.xlu1 %v4944_v25, %s4450_s27 }
0x1b38   :  { %4141 = vrot.lane.b32.xlu1 %v4140_v27, %s4450_s27 }
0x1ba5   :  { %v2869_v30 = vpop.xlane.xlu0 %2868 }
0x1ba6   :  { %4351 = vrcp.f32 %v2869_v30 }
0x1ba9   :  { %v2880_v31 = vpop.permute.xlu0 %2879 }
0x1baa   :  { %v2885_v32 = vsel %vm616_vm6, %v2880_v31, 0 }
0x1bab   :  { %4040 = vmatpush3.bf16.msra.mxu0 %v2885_v32 }
0x1bac   :  { %4051 = vmatprep.subr.bf16.mxu0 %v4446_v1 }
0x1bad   :  { %v4147_v46 = vpop.permute.xlu0 %4146 }
0x1bae   :  { %v4149_v3 = vunpack.i.h.bf16 %v4147_v46  ;;  %v4148_v15 = vunpack.i.l.bf16 %v4147_v46 }
0x1bb0   :  { %v4352_v36 = vpop.eup %4351  ;;  %v2872_v58 = vpop.xlane.xlu1 %2871 }
0x1bb1   :  { %v2875_v53 = vmul.f32 %v4352_v36, %v4348_v11  ;;  %4353 = vrcp.f32 %v2872_v58  ;;  %v4259_v36 = vld [vmem:[#allocation2 + $0x150] ss:$20 sps:$4 sm:$0xff]  }
0x1bb3   :  { %v2877_v37 = vpack.c.bf16 %v2875_v53, %v2875_v53 }
0x1bb4   :  { %v2928_v51 = vpop.permute.xlu1 %2927 }
0x1bb5   :  { %v2933_v25 = vsel %vm616_vm6, %v2928_v51, 0  ;;  %4042 = vmatmul.mubr.msk.bf16.vlgmr.msra.gmra.mrb[56].mxu0 %vm588_vm7, %v2877_v37 }
0x1bb6   :  { %4046 = vmatpush3.bf16.msra.mxu1 %v2933_v25  ;;  %4067 = vmatprep.mubr.msk.bf16.mxu0 %vm4447_vm0, %v4446_v1 }
0x1bb7   :  { %4071 = vmatprep.subr.bf16.mxu1 %v4446_v1  ;;  %4052 = vmatpush3.bf16.msra.mxu0 %v4251_v20  ;;  %v4261_v20 = vld [vmem:[#allocation2 + $0x1a0] ss:$20 sps:$4 sm:$0xff]  }
0x1bb8   :  { %4053 = vmatprep.subr.bf16.mxu0 %v4446_v1  ;;  %v4142_v43 = vpop.permute.xlu1 %4141 }
0x1bb9   :  { %v4144_v38 = vunpack.i.h.bf16 %v4142_v43  ;;  %v4143_v41 = vunpack.i.l.bf16 %v4142_v43 }
0x1bbb   :  { %v4354_v50 = vpop.eup %4353  ;;  %4054 = vmatpush3.bf16.msra.mxu0 %v4252_v54  ;;  %v3000_v63 = vsel %vm495_vm5, %v4966_v60, %v4144_v38  ;;  %v2999_v2 = vsel %vm495_vm5, %v4963_v48, %v4143_v41  ;;  %v3025_v48 = vrot.slane %v4890_v28, %v1423_v35  ;;  %v4262_v54 = vld [vmem:[#allocation2 + $0x1c8] ss:$20 sps:$4 sm:$0xff]   ;;  %v3150_v38 = vrot.slane %v4890_v28, %v1548_v26 }
0x1bbc   :  { %v2876_v62 = vmul.f32 %v4354_v50, %v4350_v14  ;;  %4055 = vmatprep.subr.bf16.mxu0 %v4446_v1  ;;  %v3001_v5 = vsel %vm1398_vm8, %v2999_v2, %v4148_v15  ;;  %v3002_v6 = vsel %vm1398_vm8, %v3000_v63, %v4149_v3  ;;  %v4267_v3 = vld [vmem:[#allocation5 + $0x40] sm:$0xff]   ;;  %v4268_v15 = vld [vmem:[#allocation5 + $0x48] sm:$0xff]   ;;  %v4270_v26 = vld [vmem:[#allocation5 + $0x58] sm:$0xff]  }
0x1bbe   :  { %v2878_v27 = vpack.c.bf16 %v2876_v62, %v2876_v62 }
0x1bbf   :  { %4056 = vmatpush3.bf16.msra.mxu0 %v4253_v59  ;;  %v4263_v59 = vld [vmem:[#allocation2 + $0x1f0] ss:$20 sps:$4 sm:$0xff]  }
0x1bc0   :  { %4048 = vmatmul.mubr.msk.bf16.vlgmr.msra.gmra.mrb[96].mxu1 %vm588_vm7, %v2878_v27  ;;  %4057 = vmatprep.subr.bf16.mxu0 %v4446_v1 }
0x1bc1   :  { %4087 = vmatprep.mubr.msk.bf16.mxu1 %vm4447_vm0, %v4446_v1  ;;  %4072 = vmatpush3.bf16.msra.mxu1 %v4259_v36 }
0x1bc2   :  { %4073 = vmatprep.subr.bf16.mxu1 %v4446_v1 }
0x1bc3   :  { %4058 = vmatpush3.bf16.msra.mxu0 %v4254_v39  ;;  %v4264_v39 = vld [vmem:[#allocation2 + $0x218] ss:$20 sps:$4 sm:$0xff]  }
0x1bc4   :  { %4059 = vmatprep.subr.bf16.mxu0 %v4446_v1 }
0x1bc7   :  { %4060 = vmatpush3.bf16.msra.mxu0 %v4255_v40  ;;  %v4265_v40 = vld [vmem:[#allocation2 + $0x240] ss:$20 sps:$4 sm:$0xff]  }
0x1bc8   :  { %4061 = vmatprep.subr.bf16.mxu0 %v4446_v1 }
0x1bcb   :  { %4062 = vmatpush3.bf16.msra.mxu0 %v4256_v44  ;;  %v4266_v44 = vld [vmem:[#allocation2 + $0x268] ss:$20 sps:$4 sm:$0xff]  }
0x1bcc   :  { %4063 = vmatprep.subr.bf16.mxu0 %v4446_v1 }
0x1bcf   :  { %4064 = vmatpush3.bf16.msra.mxu0 %v4257_v47 }
0x1bd0   :  { %4065 = vmatprep.subr.bf16.mxu0 %v4446_v1 }
0x1bd3   :  { %4066 = vmatpush3.bf16.msra.mxu0 %v4258_v23 }
0x1bd4   :  { %4091 = vmatprep.subr.bf16.mxu0 %v4446_v1 }
0x1c88   :  { %v2921_v49 = vpop.f32.mrb[56].mxu0 }
0x1c89   :  { %v4043_v52 = vpop.f32.mrb[57].mxu0 }
0x1c8a   :  { %v2924_v0 = vpop.f32.mrb[58].mxu0 }
0x1c8b   :  { %v4044_v56 = vpop.f32.mrb[59].mxu0 }
0x1c93   :  { %v2969_v29 = vpop.f32.mrb[96].mxu1 }
0x1c94   :  { %v4150_v57 = vpack.i.bf16 %v2969_v29, %v2921_v49  ;;  %v4049_v61 = vpop.f32.mrb[97].mxu1 }
0x1c95   :  { %v2972_v45 = vpop.f32.mrb[98].mxu1  ;;  %v3144_v61 = vrot.slane %v4890_v28, %v1542_v24  ;;  %v4269_v24 = vld [vmem:[#allocation5 + $0x50] sm:$0xff]  }
0x1c96   :  { %v4050_v42 = vpop.f32.mrb[99].mxu1  ;;  %4151 = vrot.lane.b32.xlu1 %v4150_v57, %s4449_s26 }
0x1d08   :  { %v4152_v4 = vpop.permute.xlu1 %4151 }
0x1d09   :  { %v4154_v16 = vunpack.i.h.bf16 %v4152_v4  ;;  %v4153_v9 = vunpack.i.l.bf16 %v4152_v4  ;;  %v4271_v4 = vld [vmem:[#allocation5 + $0x60] sm:$0xff]  }
0x1d0b   :  { %v3004_v7 = vsel %vm1401_vm9, %v3002_v6, %v4154_v16  ;;  %v3003_v8 = vsel %vm1401_vm9, %v3001_v5, %v4153_v9  ;;  %v4272_v16 = vld [vmem:[#allocation5 + $0x68] sm:$0xff]   ;;  %v4273_v9 = vld [vmem:[#allocation5 + $0x70] sm:$0xff]   ;;  %v4274_v5 = vld [vmem:[#allocation5 + $0x78] sm:$0xff]   ;;  %v3173_v6 = vrot.slane %v4890_v28, %v1571_v55 }
0x1d0c   :  { %v3005_v10 = vpack.c.bf16 %v3004_v7, %v3003_v8 }
0x1d0e   :  { %4068 = vmatmul.mubr.bf16.vlgmr.msra.gmra.mrb[60].mxu0 %v3005_v10 }
0x1d0f   :  { %4107 = vmatprep.mubr.msk.bf16.mxu0 %vm4447_vm0, %v4446_v1  ;;  %4092 = vmatpush3.bf16.msra.mxu0 %v4267_v3 }
0x1d10   :  { %4093 = vmatprep.subr.bf16.mxu0 %v4446_v1 }
0x1d13   :  { %4094 = vmatpush3.bf16.msra.mxu0 %v4268_v15 }
0x1d14   :  { %4095 = vmatprep.subr.bf16.mxu0 %v4446_v1 }
0x1d17   :  { %4096 = vmatpush3.bf16.msra.mxu0 %v4269_v24 }
0x1d18   :  { %4097 = vmatprep.subr.bf16.mxu0 %v4446_v1 }
0x1d1b   :  { %4098 = vmatpush3.bf16.msra.mxu0 %v4270_v26 }
0x1d1c   :  { %4099 = vmatprep.subr.bf16.mxu0 %v4446_v1 }
0x1d1f   :  { %4100 = vmatpush3.bf16.msra.mxu0 %v4271_v4 }
0x1d20   :  { %4101 = vmatprep.subr.bf16.mxu0 %v4446_v1 }
0x1d23   :  { %4102 = vmatpush3.bf16.msra.mxu0 %v4272_v16 }
0x1d24   :  { %4103 = vmatprep.subr.bf16.mxu0 %v4446_v1 }
0x1d27   :  { %4104 = vmatpush3.bf16.msra.mxu0 %v4273_v9 }
0x1d28   :  { %4105 = vmatprep.subr.bf16.mxu0 %v4446_v1 }
0x1d2b   :  { %4106 = vmatpush3.bf16.msra.mxu0 %v4274_v5 }
0x1de1   :  { %v3108_v60 = vpop.f32.mrb[60].mxu0 }
0x1de2   :  { %v3109_v11 = vadd.f32 %v3108_v60, %v3025_v48  ;;  %v4069_v13 = vpop.f32.mrb[61].mxu0 }
0x1de3   :  { %v3111_v14 = vpop.f32.mrb[62].mxu0 }
0x1de4   :  { %v3112_v17 = vadd.f32 %v3111_v14, %v3025_v48  ;;  %v4070_v30 = vpop.f32.mrb[63].mxu0  ;;  %v3115_v31 = vadd.f32 %v3109_v11, %v4877_v22 }
0x1de6   :  { %3117 = vadd.xlane.f32.xlu0 %v3115_v31  ;;  %v3116_v32 = vadd.f32 %v3112_v17, %v4879_v12  ;;  %v4260_v12 = vld [vmem:[#allocation2 + $0x178] ss:$20 sps:$4 sm:$0xff]  }
0x1de7   :  { %4074 = vmatpush3.bf16.msra.mxu1 %v4260_v12  ;;  %v3302_v12 = vrot.slane %v4890_v28, %v1699_v34 }
0x1de8   :  { %3119 = vadd.xlane.f32.xlu1 %v3116_v32  ;;  %4075 = vmatprep.subr.bf16.mxu1 %v4446_v1 }
0x1deb   :  { %4076 = vmatpush3.bf16.msra.mxu1 %v4261_v20 }
0x1dec   :  { %4077 = vmatprep.subr.bf16.mxu1 %v4446_v1 }
0x1def   :  { %4078 = vmatpush3.bf16.msra.mxu1 %v4262_v54 }
0x1df0   :  { %4079 = vmatprep.subr.bf16.mxu1 %v4446_v1 }
0x1df3   :  { %4080 = vmatpush3.bf16.msra.mxu1 %v4263_v59 }
0x1df4   :  { %4081 = vmatprep.subr.bf16.mxu1 %v4446_v1 }
0x1df7   :  { %4082 = vmatpush3.bf16.msra.mxu1 %v4264_v39 }
0x1df8   :  { %4083 = vmatprep.subr.bf16.mxu1 %v4446_v1 }
0x1dfb   :  { %4084 = vmatpush3.bf16.msra.mxu1 %v4265_v40 }
0x1dfc   :  { %4085 = vmatprep.subr.bf16.mxu1 %v4446_v1 }
0x1dff   :  { %4086 = vmatpush3.bf16.msra.mxu1 %v4266_v44 }
0x1e73   :  { %v3118_v58 = vpop.xlane.xlu0 %3117 }
0x1e74   :  { %v3121_v53 = vmul.f32 0.03125, %v3118_v58 }
0x1e75   :  { %v3120_v37 = vpop.xlane.xlu1 %3119 }
0x1e76   :  { %v3123_v35 = vsub.f32 %v3115_v31, %v3121_v53  ;;  %v3122_v51 = vmul.f32 0.03125, %v3120_v37 }
0x1e78   :  { %v3124_v25 = vsub.f32 %v3116_v32, %v3122_v51  ;;  %v3125_v50 = vmul.f32 %v4567_v33, %v3123_v35 }
0x1e7a   :  { %v3127_v62 = vmul.f32 %v3125_v50, %v3125_v50  ;;  %v3126_v27 = vmul.f32 %v4567_v33, %v3124_v25 }
0x1e7c   :  { %3129 = vadd.xlane.f32.xlu0 %v3127_v62  ;;  %v3128_v22 = vmul.f32 %v3126_v27, %v3126_v27 }
0x1e80   :  { %3131 = vadd.xlane.f32.xlu0 %v3128_v22 }
0x1f09   :  { %v3130_v47 = vpop.xlane.xlu0 %3129 }
0x1f0a   :  { %v3133_v49 = vmul.f32 0.03125, %v3130_v47 }
0x1f0c   :  { %v3135_v52 = vadd.f32 1e-12, %v3133_v49 }
0x1f0d   :  { %v3132_v0 = vpop.xlane.xlu0 %3131 }
0x1f0e   :  { %4355 = vrsqrt.f32 %v3135_v52  ;;  %v3134_v23 = vmul.f32 0.03125, %v3132_v0 }
0x1f10   :  { %v3136_v56 = vadd.f32 1e-12, %v3134_v23 }
0x1f12   :  { %4357 = vrsqrt.f32 %v3136_v56 }
0x1f18   :  { %v4356_v29 = vpop.eup %4355 }
0x1f19   :  { %v3139_v57 = vmul.f32 %v4356_v29, %v3125_v50 }
0x1f1b   :  { %v3145_v43 = vmul.f32 %v3144_v61, %v3139_v57 }
0x1f1c   :  { %v4358_v45 = vpop.eup %4357 }
0x1f1d   :  { %v3140_v42 = vmul.f32 %v4358_v45, %v3126_v27  ;;  %v3151_v46 = vadd.f32 %v3150_v38, %v3145_v43 }
0x1f1f   :  { %v3146_v41 = vmul.f32 %v3144_v61, %v3140_v42 }
0x1f21   :  { %v5107_v63 = vadd.f32 %v3150_v38, %v3146_v41 }
0x1f23   :  { %v3153_v2 = vpack.c.bf16 %v5107_v63, %v3151_v46 }
0x1f25   :  { %4088 = vmatmul.mubr.bf16.vlgmr.msra.gmra.mrb[100].mxu1 %v3153_v2 }
0x1ff8   :  { %v3256_v7 = vpop.f32.mrb[100].mxu1 }
0x1ff9   :  { %v3257_v8 = vadd.f32 %v3256_v7, %v3173_v6  ;;  %v4089_v10 = vpop.f32.mrb[101].mxu1 }
0x1ffa   :  { %v3259_v48 = vpop.f32.mrb[102].mxu1 }
0x1ffb   :  { %v3263_v60 = vmul.f32 %v3257_v8, %v3257_v8  ;;  %v3260_v11 = vadd.f32 %v3259_v48, %v3173_v6  ;;  %v4090_v13 = vpop.f32.mrb[103].mxu1 }
0x1ffd   :  { %v3265_v14 = vmul.f32 %v3263_v60, %v3257_v8  ;;  %v3264_v17 = vmul.f32 %v3260_v11, %v3260_v11 }
0x1fff   :  { %v3267_v30 = vmul.f32 0.044715, %v3265_v14  ;;  %v3266_v31 = vmul.f32 %v3264_v17, %v3260_v11 }
0x2001   :  { %v3269_v32 = vadd.f32 %v3267_v30, %v3257_v8  ;;  %v3268_v36 = vmul.f32 0.044715, %v3266_v31 }
0x2003   :  { %v3271_v1 = vmul.f32 0.7978846, %v3269_v32  ;;  %v3270_v58 = vadd.f32 %v3268_v36, %v3260_v11 }
0x2005   :  { %4359 = vtanh.f32 %v3271_v1  ;;  %v3272_v53 = vmul.f32 0.7978846, %v3270_v58 }
0x2007   :  { %4361 = vtanh.f32 %v3272_v53 }
0x200f   :  { %v4360_v37 = vpop.eup %4359 }
0x2010   :  { %v3275_v55 = vadd.f32 1.0, %v4360_v37 }
0x2011   :  { %v4362_v35 = vpop.eup %4361 }
0x2012   :  { %v3277_v51 = vmul.f32 0.5, %v3275_v55  ;;  %v3276_v25 = vadd.f32 1.0, %v4362_v35 }
0x2014   :  { %v3278_v50 = vmul.f32 0.5, %v3276_v25  ;;  %v3279_v62 = vmul.f32 %v3277_v51, %v3257_v8 }
0x2016   :  { %v3280_v27 = vmul.f32 %v3278_v50, %v3260_v11 }
0x2018   :  { %v3281_v22 = vpack.c.bf16 %v3280_v27, %v3279_v62 }
0x201a   :  { %4108 = vmatmul.mubr.bf16.vlgmr.msra.gmra.mrb[64].mxu0 %v3281_v22 }
0x20ed   :  { %v3385_v20 = vpop.f32.mrb[64].mxu0 }
0x20ee   :  { %v3386_v54 = vadd.f32 %v3385_v20, %v3302_v12  ;;  %v4109_v59 = vpop.f32.mrb[65].mxu0 }
0x20ef   :  { %v3388_v39 = vpop.f32.mrb[66].mxu0 }
0x20f0   :  { %v3392_v40 = vadd.f32 %v3386_v54, %v3151_v46  ;;  %v3389_v44 = vadd.f32 %v3388_v39, %v3302_v12  ;;  %v4110_v47 = vpop.f32.mrb[67].mxu0 }
0x20f2   :  { %3394 = vadd.xlane.f32.xlu1 %v3392_v40  ;;  %v3393_v49 = vadd.f32 %v3389_v44, %v5107_v63  ;;  %v3529_v63 = vld [vmem:[%s5148_s5 + $0x18] sm:$0x3] }
0x20f3   :  { %v3421_v2 = vrot.slane %v3529_v63, %v4609_v19 }
0x20f4   :  { %3396 = vadd.xlane.f32.xlu0 %v3393_v49 }
0x217f   :  { %v3395_v52 = vpop.xlane.xlu1 %3394 }
0x2180   :  { %v3398_v0 = vmul.f32 0.03125, %v3395_v52 }
0x2181   :  { %v3397_v23 = vpop.xlane.xlu0 %3396 }
0x2182   :  { %v3400_v56 = vsub.f32 %v3392_v40, %v3398_v0  ;;  %v3399_v29 = vmul.f32 0.03125, %v3397_v23 }
0x2184   :  { %v3402_v18 = vmul.f32 %v4567_v33, %v3400_v56  ;;  %v3401_v57 = vsub.f32 %v3393_v49, %v3399_v29 }
0x2186   :  { %v3404_v34 = vmul.f32 %v3402_v18, %v3402_v18  ;;  %v3403_v28 = vmul.f32 %v4567_v33, %v3401_v57  ;;  %v3427_v33 = vrot.slane %v3529_v63, %v4617_v21 }
0x2188   :  { %3406 = vadd.xlane.f32.xlu1 %v3404_v34  ;;  %v3405_v61 = vmul.f32 %v3403_v28, %v3403_v28 }
0x218a   :  { %3408 = vadd.xlane.f32.xlu0 %v3405_v61 }
0x2215   :  { %v3407_v45 = vpop.xlane.xlu1 %3406 }
0x2216   :  { %v3410_v42 = vmul.f32 0.03125, %v3407_v45 }
0x2217   :  { %v3409_v43 = vpop.xlane.xlu0 %3408 }
0x2218   :  { %v3412_v38 = vadd.f32 1e-12, %v3410_v42  ;;  %v3411_v41 = vmul.f32 0.03125, %v3409_v43 }
0x221a   :  { %4363 = vrsqrt.f32 %v3412_v38  ;;  %v3413_v46 = vadd.f32 1e-12, %v3411_v41 }
0x221c   :  { %4365 = vrsqrt.f32 %v3413_v46 }
0x2224   :  { %v4364_v3 = vpop.eup %4363 }
0x2225   :  { %v3416_v15 = vmul.f32 %v4364_v3, %v3402_v18 }
0x2226   :  { %v4366_v24 = vpop.eup %4365 }
0x2227   :  { %v3417_v26 = vmul.f32 %v4366_v24, %v3403_v28  ;;  %v3422_v4 = vmul.f32 %v3421_v2, %v3416_v15 }
0x2229   :  { %v3423_v16 = vmul.f32 %v3421_v2, %v3417_v26  ;;  %v3428_v9 = vadd.f32 %v3427_v33, %v3422_v4 }
0x222b   :  { %v3429_v5 = vadd.f32 %v3427_v33, %v3423_v16  ;;  %3430 = vst [vmem:[#allocation7] sm:$0x1] %v3428_v9 }
0x222d   :  { %3431 = vst [vmem:[#allocation7 + $0x1] sm:$0x1] %v3429_v5 }
0x222e   :  { %4422 = shalt.err (!%p4419_p6)
}
0x222f   :  { %s4423_s11 = scalar_lea.hbm %s5149_s6, 32 }
0x2230   :  { %p4424_p7 = scmp.ne.s32.totalorder %s5149_s6, %s4423_s11  ;;  %p4427_p8 = scmp.lt.u32.totalorder %s4423_s11, %s5149_s6 }
0x2232   :  { %p4429_p9 = pnand %p4427_p8, %p4424_p7 }
0x2234   :  { %4432 = shalt.err (!%p4429_p9)
}
0x2235   :  { %3441 = dma.vmem_to_hbm [thread:$0]  %s3439_s0, 32, %s5149_s6, [#allocation4]  }
0x2236   :  { %4437 = dma.done.wait [#allocation4], 32  }
0x2237   :  { %4438 = vsyncadd [#allocation4], 4294967264 }
0x2238   :  { %3445 = vsyncpa [#allocation3], 1 }
0x2239   :  { %3446 = vsyncpa [#allocation6], 1 }
0x223a   :  { %3447 = vsyncpa [#allocation4], 1 }

</bundles_post_ra>
